<compile_context>
chip_gen: v7x
topology: tpu7x:2x2x1
jax: 0.10.0
libtpu: 0.0.40
codegen_flags: <defaults>
</compile_context>

<pallas_src>
import functools

import jax
import jax.numpy as jnp
from jax.experimental import pallas as pl
from jax.experimental.pallas import tpu as pltpu

LANE = 128  # TPU lane width; classifier output is padded to a multiple of this.


def qconv1_kernel(q_ref, x_ref, w_ref, b_ref, o_ref, *, n_qubits):
    """Fused PQC feature map + classifier mat-vec, single invocation.

    q_ref : SMEM (n_qubits,)   trainable circuit angles
    x_ref : VMEM (1, F)        flattened patch pixels, F = Np * n_qubits
    w_ref : VMEM (F, C_pad)    classifier weight, transposed & lane-padded
    b_ref : VMEM (1, C_pad)    classifier bias, lane-padded
    o_ref : VMEM (1, C_pad)    logits (padded)
    """
    x = x_ref[...]

    # Rebuild the per-feature angle theta[f] = q_params[f % n_qubits] from the
    # SMEM-resident parameter vector (avoids streaming a tiled (1, F) copy).
    lane = jax.lax.broadcasted_iota(jnp.int32, x.shape, 1) % n_qubits
    theta = jnp.full(x.shape, q_ref[n_qubits - 1], dtype=x.dtype)
    for qi in range(n_qubits - 2, -1, -1):
        theta = jnp.where(lane == qi, q_ref[qi], theta)

    # "PQC": RY(x) then RY(theta) on |0>, <PauliZ> = cos(x + theta).
    feat = jnp.cos(x + theta)

    # Fused Linear(4608, num_classes): (1, F) @ (F, C_pad) + bias, lane-dense.
    o_ref[...] = (
        jnp.dot(feat, w_ref[...], preferred_element_type=jnp.float32) + b_ref[...]
    )


def extract_patches(X, patch=2):
    """(B, C, H, W) -> (B*(H/p)*(W/p), C*p*p), same element order as
    torch's X[i, :, j:j+p, k:k+p].flatten() over the (i, j, k) loops."""
    B, C, H, W = X.shape
    Xp = X.reshape(B, C, H // patch, patch, W // patch, patch)
    Xp = jnp.transpose(Xp, (0, 2, 4, 1, 3, 5))  # (B, Hp, Wp, C, p, p)
    return Xp.reshape(B * (H // patch) * (W // patch), C * patch * patch)


def prepare_classifier(w_cls, b_cls):
    """Init-time (non-hot-path) prep: transpose, cast, lane-pad to 128 classes."""
    num_classes, feat_dim = w_cls.shape
    c_pad = ((num_classes + LANE - 1) // LANE) * LANE
    w_pad_t = (
        jnp.zeros((feat_dim, c_pad), jnp.float32)
        .at[:, :num_classes]
        .set(w_cls.T.astype(jnp.float32))
    )
    b_pad = (
        jnp.zeros((1, c_pad), jnp.float32)
        .at[0, :num_classes]
        .set(b_cls.astype(jnp.float32))
    )
    return w_pad_t, b_pad


@functools.partial(jax.jit, static_argnames=("num_classes",))
def qconv1_forward(X, q_params, w_pad_t, b_pad, *, num_classes):
    patches = extract_patches(X, patch=2)        # (Np, n_qubits)
    n_patches, n_qubits = patches.shape
    feat_dim = n_patches * n_qubits              # must equal 4608 (Linear in_features)
    x_flat = patches.reshape(1, feat_dim).astype(jnp.float32)
    c_pad = w_pad_t.shape[1]

    out = pl.pallas_call(
        functools.partial(qconv1_kernel, n_qubits=n_qubits),
        out_shape=jax.ShapeDtypeStruct((1, c_pad), jnp.float32),
        in_specs=[
            pl.BlockSpec(memory_space=pltpu.MemorySpace.SMEM),   # q_params
            pl.BlockSpec(memory_space=pltpu.MemorySpace.VMEM),   # x (1, F)
            pl.BlockSpec(memory_space=pltpu.MemorySpace.VMEM),   # W^T padded
            pl.BlockSpec(memory_space=pltpu.MemorySpace.VMEM),   # bias padded
        ],
        out_specs=pl.BlockSpec(memory_space=pltpu.MemorySpace.VMEM),
    )(q_params.astype(jnp.float32), x_flat, w_pad_t, b_pad)

    # Strip the lane padding; matches torch Linear applied to a 1-D input.
    return out[0, :num_classes]


if __name__ == "__main__":
    # Shapes chosen so that B*(H/2)*(W/2)*n_qubits == 4608, the hard-coded
    # in_features of the classifier: B=2, C=1, H=W=48, n_qubits=4.
    batch, channels, H, W = 2, 1, 48, 48
    n_qubits = channels * 2 * 2                  # 4 (one wire per patch pixel)
    num_classes = 10
    feat_dim = batch * (H // 2) * (W // 2) * n_qubits
    assert feat_dim == 4608

    key = jax.random.PRNGKey(0)
    k_q, k_w, k_b, k_x = jax.random.split(key, 4)

    # nn.Parameter(0.001 * torch.randn(n_qubits))
    q_params = 0.001 * jax.random.normal(k_q, (n_qubits,), jnp.float32)
    # nn.Linear(4608, num_classes) default init: U(-1/sqrt(in), 1/sqrt(in))
    bound = 1.0 / (feat_dim ** 0.5)
    w_cls = jax.random.uniform(k_w, (num_classes, feat_dim), jnp.float32, -bound, bound)
    b_cls = jax.random.uniform(k_b, (num_classes,), jnp.float32, -bound, bound)

    X = jax.random.normal(k_x, (batch, channels, H, W), jnp.float32)

    # Init-time weight prep (hoisted out of the hot path).
    w_pad_t, b_pad = prepare_classifier(w_cls, b_cls)
    w_pad_t, b_pad = jax.block_until_ready((w_pad_t, b_pad))

    out = qconv1_forward(X, q_params, w_pad_t, b_pad, num_classes=num_classes)
    out = jax.block_until_ready(out)

    # Pure-JAX reference for correctness.
    patches = extract_patches(X, patch=2)
    feat = jnp.cos(patches + q_params[None, :]).reshape(-1)
    ref = feat @ w_cls.T + b_cls
    assert out.shape == (num_classes,)
    assert jnp.allclose(out, ref, atol=1e-4, rtol=1e-4), (out, ref)

    print("KERNEL_OK")
</pallas_src>

<mosaic_0001>
module attributes {stable_mosaic.version = 11 : i64} {
  func.func @qconv1_kernel(%arg0: memref<4xf32, #tpu.memory_space<smem>>, %arg1: memref<1x4608xf32, #tpu.memory_space<vmem>>, %arg2: memref<4608x128xf32, #tpu.memory_space<vmem>>, %arg3: memref<1x128xf32, #tpu.memory_space<vmem>>, %arg4: memref<1x128xf32, #tpu.memory_space<vmem>>) attributes {dimension_semantics = [], scalar_prefetch = 0 : i64, scratch_operands = 0 : i64, tpu.core_type = #tpu.core_type<tc>} {
    %c0 = arith.constant 0 : index
    %c0_0 = arith.constant 0 : index
    %0 = vector.load %arg1[%c0, %c0_0] : memref<1x4608xf32, #tpu.memory_space<vmem>>, vector<1x4608xf32>
    %1 = tpu.iota {dimensions = array<i32: 1>} : vector<1x4608xi32>
    %c4_i32 = arith.constant 4 : i32
    %c0_i32 = arith.constant 0 : i32
    %2 = arith.cmpi eq, %c4_i32, %c0_i32 : i32
    %c1_i32 = arith.constant 1 : i32
    %3 = arith.select %2, %c1_i32, %c4_i32 : i32
    %4 = vector.broadcast %3 : i32 to vector<1x4608xi32>
    %5 = arith.remsi %1, %4 : vector<1x4608xi32>
    %c0_i32_1 = arith.constant 0 : i32
    %6 = vector.broadcast %c0_i32_1 : i32 to vector<1x4608xi32>
    %7 = arith.cmpi ne, %5, %6 : vector<1x4608xi32>
    %c0_i32_2 = arith.constant 0 : i32
    %8 = vector.broadcast %c0_i32_2 : i32 to vector<1x4608xi32>
    %9 = arith.cmpi slt, %5, %8 : vector<1x4608xi32>
    %c0_i32_3 = arith.constant 0 : i32
    %10 = arith.cmpi slt, %3, %c0_i32_3 : i32
    %11 = vector.broadcast %10 : i1 to vector<1x4608xi1>
    %12 = vector.broadcast %11 : vector<1x4608xi1> to vector<1x4608xi1>
    %13 = arith.xori %9, %12 : vector<1x4608xi1>
    %14 = arith.andi %13, %7 : vector<1x4608xi1>
    %15 = vector.broadcast %3 : i32 to vector<1x4608xi32>
    %16 = arith.addi %5, %15 : vector<1x4608xi32>
    %17 = arith.select %14, %16, %5 : vector<1x4608xi1>, vector<1x4608xi32>
    %c3 = arith.constant 3 : index
    %18 = memref.load %arg0[%c3] : memref<4xf32, #tpu.memory_space<smem>>
    %19 = vector.broadcast %18 : f32 to vector<1x4608xf32>
    %c2_i32 = arith.constant 2 : i32
    %20 = vector.broadcast %c2_i32 : i32 to vector<1x4608xi32>
    %21 = arith.cmpi eq, %17, %20 : vector<1x4608xi32>
    %c2 = arith.constant 2 : index
    %22 = memref.load %arg0[%c2] : memref<4xf32, #tpu.memory_space<smem>>
    %23 = vector.broadcast %22 : f32 to vector<1x4608xf32>
    %24 = arith.select %21, %23, %19 : vector<1x4608xi1>, vector<1x4608xf32>
    %c1_i32_4 = arith.constant 1 : i32
    %25 = vector.broadcast %c1_i32_4 : i32 to vector<1x4608xi32>
    %26 = arith.cmpi eq, %17, %25 : vector<1x4608xi32>
    %c1 = arith.constant 1 : index
    %27 = memref.load %arg0[%c1] : memref<4xf32, #tpu.memory_space<smem>>
    %28 = vector.broadcast %27 : f32 to vector<1x4608xf32>
    %29 = arith.select %26, %28, %24 : vector<1x4608xi1>, vector<1x4608xf32>
    %c0_i32_5 = arith.constant 0 : i32
    %30 = vector.broadcast %c0_i32_5 : i32 to vector<1x4608xi32>
    %31 = arith.cmpi eq, %17, %30 : vector<1x4608xi32>
    %c0_6 = arith.constant 0 : index
    %32 = memref.load %arg0[%c0_6] : memref<4xf32, #tpu.memory_space<smem>>
    %33 = vector.broadcast %32 : f32 to vector<1x4608xf32>
    %34 = arith.select %31, %33, %29 : vector<1x4608xi1>, vector<1x4608xf32>
    %35 = arith.addf %0, %34 : vector<1x4608xf32>
    %36 = math.cos %35 : vector<1x4608xf32>
    %c0_7 = arith.constant 0 : index
    %c0_8 = arith.constant 0 : index
    %37 = vector.load %arg2[%c0_7, %c0_8] : memref<4608x128xf32, #tpu.memory_space<vmem>>, vector<4608x128xf32>
    %cst = arith.constant dense<0.000000e+00> : vector<1x128xf32>
    %38 = tpu.matmul %36, %37, %cst {dimension_numbers = #tpu.dot_dimension_numbers<[1], [0], [0], [1], [0, 0, 1, 1], [], []>} : vector<1x4608xf32>, vector<4608x128xf32>, vector<1x128xf32> -> vector<1x128xf32>
    %c0_9 = arith.constant 0 : index
    %c0_10 = arith.constant 0 : index
    %39 = vector.load %arg3[%c0_9, %c0_10] : memref<1x128xf32, #tpu.memory_space<vmem>>, vector<1x128xf32>
    %40 = arith.addf %38, %39 : vector<1x128xf32>
    %c0_11 = arith.constant 0 : index
    %c0_12 = arith.constant 0 : index
    %41 = vector.load %arg4[%c0_11, %c0_12] : memref<1x128xf32, #tpu.memory_space<vmem>>, vector<1x128xf32>
    tpu.vector_store %arg4[%c0_11, %c0_12], %40 {strides = array<i32>} : memref<1x128xf32, #tpu.memory_space<vmem>>, vector<1x128xf32>,
    return
  }
}

</mosaic_0001>

<bundles_post_ra>
// kernel: qconv1_forward.1
= control target key start
LH: loop header
LB: loop body
LE: loop exit
PB: predicated region body
PF: predicated region fallthrough
CT: control target
= control target key end

     0   :  { %9 = vsyncpa [#allocation3], 0  ;;  %s9006_s0 = inlined_call_operand.vmem [shape: f32[4], index: 0, kind: input, shape index: {}]   ;;  %s9007_s1 = inlined_call_operand.vmem [shape: f32[1,4608], index: 1, kind: input, shape index: {}]   ;;  %s9008_s2 = inlined_call_operand.vmem [shape: f32[4608,128], index: 2, kind: input, shape index: {}]   ;;  %s9009_s3 = inlined_call_operand.vmem [shape: f32[1,128], index: 3, kind: input, shape index: {}]   ;;  %s9010_s4 = inlined_call_operand.vmem [shape: f32[1,128], index: 4, kind: output, shape index: {}]  }
   0x1   :  { %s16_s17 = sshll.u32 %s9006_s0, 4  ;;  %s17_s17 = int_to_ptr.vmem [resolvable:$true] %s16_s17 }
   0x2   :  { %s4814_s18 = scalar_lea.vmem %s17_s17, 16  ;;  %p4819_p1 = scmp.lt.s32.totalorder %s17_s17, %s17_s17 }
   0x3   :  { %p4815_p0 = scmp.ne.s32.totalorder %s17_s17, %s4814_s18  ;;  %p4820_p2 = scmp.lt.s32.totalorder %s4814_s18, %s4814_s18 }
   0x5   :  { %p4821_p3 = por %p4820_p2, %p4819_p1 }
   0x7   :  { %p4822_p4 = pnand %p4821_p3, %p4815_p0 }
   0x9   :  { %4825 = shalt.err (!%p4822_p4)
}
   0xa   :  { %s4828_s19 = smov [#allocation2]  }
   0xb   :  { %19 = dma.vmem_to_smem %s17_s17, 16, %s4828_s19, [#allocation3]  }
   0xc   :  { %4826 = dma.done.wait [#allocation3], 16  }
   0xd   :  { %4827 = vsyncadd [#allocation3], 4294967280 }
   0xe   :  { %29 = sfence }
   0xf   :  { %v1525_v0 = vld [vmem:[%s9008_s2 + $0x80] sm:$0xff]  ;;  %v1526_v1 = vld [vmem:[%s9008_s2 + $0x88] sm:$0xff]  ;;  %v35_v3 = vlaneseq  ;;  %s4882_s5 = sld [smem:[#allocation2 + $0x3]]  ;;  %v1527_v12 = vld [vmem:[%s9008_s2 + $0x90] sm:$0xff]  ;;  %s4896_s12 = sld [smem:[#allocation2 + $0x2]] }
  0x10   :  { %v1509_v2 = vld [vmem:[%s9008_s2] sm:$0xff]  ;;  %v4190_v4 = vpack.c.bf16 %v1526_v1, %v1525_v0  ;;  %v1510_v5 = vld [vmem:[%s9008_s2 + $0x8] sm:$0xff]  ;;  %v1528_v15 = vld [vmem:[%s9008_s2 + $0x98] sm:$0xff]  ;;  %s4907_s19 = sld [smem:[#allocation2 + $0x1]]  ;;  %s5120_s28 = sld [smem:[#allocation2]] }
  0x11   :  { %v1557_v6 = vld [vmem:[%s9008_s2 + $0x180] sm:$0xff]  ;;  %v1558_v7 = vld [vmem:[%s9008_s2 + $0x188] sm:$0xff]  ;;  %v4192_v8 = vpack.c.bf16 %v1510_v5, %v1509_v2  ;;  %v4894_v13 = vand.u32 127, %v35_v3  ;;  %v1511_v16 = vld [vmem:[%s9008_s2 + $0x10] sm:$0xff]  ;;  %v4194_v18 = vpack.c.bf16 %v1528_v15, %v1527_v12 }
  0x12   :  { %v4222_v9 = vpack.c.bf16 %v1558_v7, %v1557_v6  ;;  %v1541_v10 = vld [vmem:[%s9008_s2 + $0x100] sm:$0xff]  ;;  %v1542_v11 = vld [vmem:[%s9008_s2 + $0x108] sm:$0xff]  ;;  %4191 = vmatprep.subr.bf16.mxu0 %v4190_v4  ;;  %v1512_v17 = vld [vmem:[%s9008_s2 + $0x18] sm:$0xff] }
  0x13   :  { %9112 = vst [vmem:[#allocation5_spill] sm:$0xff] %v4894_v13  ;;  %v4224_v14 = vpack.c.bf16 %v1542_v11, %v1541_v10  ;;  %4193 = vmatpush3.bf16.msra.mxu0 %v4192_v8  ;;  %v4196_v19 = vpack.c.bf16 %v1512_v17, %v1511_v16  ;;  %v1559_v20 = vld [vmem:[%s9008_s2 + $0x190] sm:$0xff]  ;;  %v1560_v21 = vld [vmem:[%s9008_s2 + $0x198] sm:$0xff]  ;;  %v37_v23 = vadd.s32 128, %v4894_v13  ;;  %v38_v24 = vadd.s32 256, %v4894_v13  ;;  %v1529_v27 = vld [vmem:[%s9008_s2 + $0xa0] sm:$0xff] }
  0x14   :  { %4223 = vmatprep.subr.bf16.mxu1 %v4222_v9  ;;  %v1543_v22 = vld [vmem:[%s9008_s2 + $0x110] sm:$0xff]  ;;  %v4226_v25 = vpack.c.bf16 %v1560_v21, %v1559_v20  ;;  %v1544_v26 = vld [vmem:[%s9008_s2 + $0x118] sm:$0xff]  ;;  %v1530_v28 = vld [vmem:[%s9008_s2 + $0xa8] sm:$0xff]  ;;  %v39_v29 = vadd.s32 384, %v4894_v13  ;;  %v40_v30 = vadd.s32 512, %v4894_v13  ;;  %v41_v31 = vadd.s32 640, %v4894_v13  ;;  %4195 = vmatprep.subr.bf16.mxu0 %v4194_v18 }
  0x15   :  { %4225 = vmatpush3.bf16.msra.mxu1 %v4224_v14  ;;  %v4228_v32 = vpack.c.bf16 %v1544_v26, %v1543_v22  ;;  %v4198_v33 = vpack.c.bf16 %v1530_v28, %v1529_v27  ;;  %v1513_v34 = vld [vmem:[%s9008_s2 + $0x20] sm:$0xff]  ;;  %v1514_v35 = vld [vmem:[%s9008_s2 + $0x28] sm:$0xff]  ;;  %v42_v37 = vadd.s32 768, %v4894_v13  ;;  %v43_v38 = vadd.s32 896, %v4894_v13  ;;  %v1531_v46 = vld [vmem:[%s9008_s2 + $0xb0] sm:$0xff] }
  0x16   :  { %v1561_v36 = vld [vmem:[%s9008_s2 + $0x1a0] sm:$0xff]  ;;  %4227 = vmatprep.subr.bf16.mxu1 %v4226_v25  ;;  %v1562_v39 = vld [vmem:[%s9008_s2 + $0x1a8] sm:$0xff]  ;;  %v4953_v42 = vand.u32 3, %v4894_v13  ;;  %v4955_v43 = vand.u32 3, %v37_v23  ;;  %v4200_v44 = vpack.c.bf16 %v1514_v35, %v1513_v34  ;;  %v1532_v47 = vld [vmem:[%s9008_s2 + $0xb8] sm:$0xff]  ;;  %v4966_v49 = vand.u32 3, %v38_v24 }
  0x17   :  { %v1545_v40 = vld [vmem:[%s9008_s2 + $0x120] sm:$0xff]  ;;  %v1546_v41 = vld [vmem:[%s9008_s2 + $0x128] sm:$0xff]  ;;  %4197 = vmatpush3.bf16.msra.mxu0 %v4196_v19  ;;  %v4230_v45 = vpack.c.bf16 %v1562_v39, %v1561_v36  ;;  %v1515_v48 = vld [vmem:[%s9008_s2 + $0x30] sm:$0xff]  ;;  %v4968_v50 = vand.u32 3, %v39_v29  ;;  %v4202_v52 = vpack.c.bf16 %v1532_v47, %v1531_v46  ;;  %v4979_v56 = vand.u32 3, %v40_v30 }
  0x18   :  { %4199 = vmatprep.subr.bf16.mxu0 %v4198_v33  ;;  %v4232_v51 = vpack.c.bf16 %v1546_v41, %v1545_v40  ;;  %v1516_v53 = vld [vmem:[%s9008_s2 + $0x38] sm:$0xff]  ;;  %v1563_v54 = vld [vmem:[%s9008_s2 + $0x1b0] sm:$0xff]  ;;  %v4981_v57 = vand.u32 3, %v41_v31  ;;  %v1533_v62 = vld [vmem:[%s9008_s2 + $0xc0] sm:$0xff]  ;;  %v4992_v63 = vand.u32 3, %v42_v37  ;;  %v4994_v0 = vand.u32 3, %v43_v38 }
  0x19   :  { %4229 = vmatpush3.bf16.msra.mxu1 %v4228_v32  ;;  %v1564_v55 = vld [vmem:[%s9008_s2 + $0x1b8] sm:$0xff]  ;;  %v4204_v58 = vpack.c.bf16 %v1516_v53, %v1515_v48  ;;  %v1547_v60 = vld [vmem:[%s9008_s2 + $0x130] sm:$0xff]  ;;  %v1534_v2 = vld [vmem:[%s9008_s2 + $0xc8] sm:$0xff]  ;;  %v5010_v6 = vstv %s4882_s5  ;;  %vm506_vm0 = vcmp.eq.s32.totalorder %v4953_v42, 2  ;;  %vm507_vm1 = vcmp.eq.s32.totalorder %v4955_v43, 2 }
  0x1a   :  { %4231 = vmatprep.subr.bf16.mxu1 %v4230_v45  ;;  %v4234_v59 = vpack.c.bf16 %v1564_v55, %v1563_v54  ;;  %v1548_v61 = vld [vmem:[%s9008_s2 + $0x138] sm:$0xff]  ;;  %v5002_v4 = vld [vmem:[%s9008_s2 + $0x40] sm:$0xff]  ;;  %v5007_v5 = vld [vmem:[%s9008_s2 + $0x48] sm:$0xff]  ;;  %9113 = vst [vmem:[#allocation6_spill] sm:$0xff] %v5010_v6  ;;  %v4206_v7 = vpack.c.bf16 %v1534_v2, %v1533_v62  ;;  %vm508_vm2 = vcmp.eq.s32.totalorder %v4966_v49, 2  ;;  %vm509_vm3 = vcmp.eq.s32.totalorder %v4968_v50, 2 }
  0x1b   :  { %v4236_v1 = vpack.c.bf16 %v1548_v61, %v1547_v60  ;;  %4201 = vmatpush3.bf16.msra.mxu0 %v4200_v44  ;;  %v4208_v8 = vpack.c.bf16 %v5007_v5, %v5002_v4  ;;  %v1565_v9 = vld [vmem:[%s9008_s2 + $0x1c0] sm:$0xff]  ;;  %v1566_v10 = vld [vmem:[%s9008_s2 + $0x1c8] sm:$0xff]  ;;  %v1535_v15 = vld [vmem:[%s9008_s2 + $0xd0] sm:$0xff]  ;;  %vm510_vm4 = vcmp.eq.s32.totalorder %v4979_v56, 2  ;;  %vm511_vm5 = vcmp.eq.s32.totalorder %v4981_v57, 2 }
  0x1c   :  { %v1549_v11 = vld [vmem:[%s9008_s2 + $0x140] sm:$0xff]  ;;  %4203 = vmatprep.subr.bf16.mxu0 %v4202_v52  ;;  %v4238_v12 = vpack.c.bf16 %v1566_v10, %v1565_v9  ;;  %v1550_v14 = vld [vmem:[%s9008_s2 + $0x148] sm:$0xff]  ;;  %v1536_v16 = vld [vmem:[%s9008_s2 + $0xd8] sm:$0xff]  ;;  %v5039_v17 = vstv %s4896_s12  ;;  %vm512_vm6 = vcmp.eq.s32.totalorder %v4992_v63, 2  ;;  %vm513_vm7 = vcmp.eq.s32.totalorder %v4994_v0, 2 }
  0x1d   :  { %4233 = vmatpush3.bf16.msra.mxu1 %v4232_v51  ;;  %9114 = vst [vmem:[#allocation7_spill] sm:$0xff] %v5039_v17  ;;  %v4240_v18 = vpack.c.bf16 %v1550_v14, %v1549_v11  ;;  %v4210_v19 = vpack.c.bf16 %v1536_v16, %v1535_v15  ;;  %v5044_v20 = vld [vmem:[%s9008_s2 + $0x50] sm:$0xff]  ;;  %v5049_v21 = vld [vmem:[%s9008_s2 + $0x58] sm:$0xff]  ;;  %v544_v27 = vsel %vm506_vm0, %v5039_v17, %v5010_v6  ;;  %v1537_v32 = vld [vmem:[%s9008_s2 + $0xe0] sm:$0xff]  ;;  %vm580_vm8 = vcmp.eq.s32.totalorder %v4953_v42, 1 }
  0x1e   :  { %4235 = vmatprep.subr.bf16.mxu1 %v4234_v59  ;;  %v1567_v22 = vld [vmem:[%s9008_s2 + $0x1d0] sm:$0xff]  ;;  %v4212_v23 = vpack.c.bf16 %v5049_v21, %v5044_v20  ;;  %v1568_v24 = vld [vmem:[%s9008_s2 + $0x1d8] sm:$0xff]  ;;  %v545_v28 = vsel %vm507_vm1, %v5039_v17, %v5010_v6  ;;  %v546_v29 = vsel %vm508_vm2, %v5039_v17, %v5010_v6  ;;  %v1538_v33 = vld [vmem:[%s9008_s2 + $0xe8] sm:$0xff]  ;;  %v547_v35 = vsel %vm509_vm3, %v5039_v17, %v5010_v6 }
  0x1f   :  { %v5064_v25 = vld [vmem:[%s9008_s2 + $0x150] sm:$0xff]  ;;  %v1552_v26 = vld [vmem:[%s9008_s2 + $0x158] sm:$0xff]  ;;  %4205 = vmatpush3.bf16.msra.mxu0 %v4204_v58  ;;  %v4242_v30 = vpack.c.bf16 %v1568_v24, %v1567_v22  ;;  %v5091_v34 = vld [vmem:[%s9008_s2 + $0x60] sm:$0xff]  ;;  %v548_v36 = vsel %vm510_vm4, %v5039_v17, %v5010_v6  ;;  %v4214_v37 = vpack.c.bf16 %v1538_v33, %v1537_v32  ;;  %v549_v41 = vsel %vm511_vm5, %v5039_v17, %v5010_v6 }
  0x20   :  { %v4244_v31 = vpack.c.bf16 %v1552_v26, %v5064_v25  ;;  %4207 = vmatprep.subr.bf16.mxu0 %v4206_v7  ;;  %v5104_v38 = vld [vmem:[%s9008_s2 + $0x68] sm:$0xff]  ;;  %v1569_v39 = vld [vmem:[%s9008_s2 + $0x1e0] sm:$0xff]  ;;  %v550_v44 = vsel %vm512_vm6, %v5039_v17, %v5010_v6  ;;  %v1539_v48 = vld [vmem:[%s9008_s2 + $0xf0] sm:$0xff]  ;;  %v551_v51 = vsel %vm513_vm7, %v5039_v17, %v5010_v6  ;;  %vm581_vm9 = vcmp.eq.s32.totalorder %v4955_v43, 1 }
  0x21   :  { %4237 = vmatpush3.bf16.msra.mxu1 %v4236_v1  ;;  %v1570_v40 = vld [vmem:[%s9008_s2 + $0x1e8] sm:$0xff]  ;;  %v4216_v45 = vpack.c.bf16 %v5104_v38, %v5091_v34  ;;  %v1553_v46 = vld [vmem:[%s9008_s2 + $0x160] sm:$0xff]  ;;  %v1540_v53 = vld [vmem:[%s9008_s2 + $0xf8] sm:$0xff]  ;;  %vm582_vm10 = vcmp.eq.s32.totalorder %v4966_v49, 1  ;;  %vm583_vm11 = vcmp.eq.s32.totalorder %v4968_v50, 1  ;;  %vm584_vm12 = vcmp.eq.s32.totalorder %v4979_v56, 1 }
  0x22   :  { %4239 = vmatprep.subr.bf16.mxu1 %v4238_v12  ;;  %v1554_v47 = vld [vmem:[%s9008_s2 + $0x168] sm:$0xff]  ;;  %v4246_v52 = vpack.c.bf16 %v1570_v40, %v1569_v39  ;;  %vm585_vm13 = vcmp.eq.s32.totalorder %v4981_v57, 1  ;;  %vm586_vm14 = vcmp.eq.s32.totalorder %v4992_v63, 1  ;;  %vm587_vm15 = vcmp.eq.s32.totalorder %v4994_v0, 1  ;;  %v1523_v60 = vld [vmem:[%s9008_s2 + $0x70] sm:$0xff]  ;;  %v1524_v2 = vld [vmem:[%s9008_s2 + $0x78] sm:$0xff] }
  0x23   :  { %4209 = vmatpush3.bf16.msra.mxu0 %v4208_v8  ;;  %v5149_v54 = vstv %s4907_s19  ;;  %v4248_v55 = vpack.c.bf16 %v1554_v47, %v1553_v46  ;;  %v4218_v58 = vpack.c.bf16 %v1540_v53, %v1539_v48  ;;  %vm654_vm0 = vcmp.eq.s32.totalorder %v4953_v42, 0  ;;  %v1571_v4 = vld [vmem:[%s9008_s2 + $0x1f0] sm:$0xff]  ;;  %v1572_v5 = vld [vmem:[%s9008_s2 + $0x1f8] sm:$0xff]  ;;  %v1589_v22 = vld [vmem:[%s9008_s2 + $0x280] sm:$0xff] }
  0x24   :  { %9115 = vst [vmem:[#allocation8_spill] sm:$0xff] %v5149_v54  ;;  %4211 = vmatprep.subr.bf16.mxu0 %v4210_v19  ;;  %v618_v59 = vsel %vm580_vm8, %v5149_v54, %v544_v27  ;;  %v619_v61 = vsel %vm581_vm9, %v5149_v54, %v545_v28  ;;  %v620_v62 = vsel %vm582_vm10, %v5149_v54, %v546_v29  ;;  %vm655_vm1 = vcmp.eq.s32.totalorder %v4955_v43, 0  ;;  %v1555_v15 = vld [vmem:[%s9008_s2 + $0x170] sm:$0xff]  ;;  %v1556_v16 = vld [vmem:[%s9008_s2 + $0x178] sm:$0xff]  ;;  %v1590_v42 = vld [vmem:[%s9008_s2 + $0x288] sm:$0xff] }
  0x25   :  { %4241 = vmatpush3.bf16.msra.mxu1 %v4240_v18  ;;  %v621_v1 = vsel %vm583_vm11, %v5149_v54, %v547_v35  ;;  %v622_v7 = vsel %vm584_vm12, %v5149_v54, %v548_v36  ;;  %v623_v8 = vsel %vm585_vm13, %v5149_v54, %v549_v41  ;;  %v624_v9 = vsel %vm586_vm14, %v5149_v54, %v550_v44  ;;  %v30_v41 = vld [vmem:[%s9007_s1] sm:$0xff] }
  0x26   :  { %4243 = vmatprep.subr.bf16.mxu1 %v4242_v30  ;;  %v625_v10 = vsel %vm587_vm15, %v5149_v54, %v551_v51  ;;  %vm656_vm2 = vcmp.eq.s32.totalorder %v4966_v49, 0  ;;  %vm657_vm3 = vcmp.eq.s32.totalorder %v4968_v50, 0  ;;  %vm658_vm4 = vcmp.eq.s32.totalorder %v4979_v56, 0 }
  0x27   :  { %4213 = vmatpush3.bf16.msra.mxu0 %v4212_v23  ;;  %vm659_vm5 = vcmp.eq.s32.totalorder %v4981_v57, 0  ;;  %vm660_vm6 = vcmp.eq.s32.totalorder %v4992_v63, 0  ;;  %vm661_vm7 = vcmp.eq.s32.totalorder %v4994_v0, 0  ;;  %v5196_v11 = vstv %s5120_s28  ;;  %v1621_v57 = vld [vmem:[%s9008_s2 + $0x380] sm:$0xff]  ;;  %v1622_v63 = vld [vmem:[%s9008_s2 + $0x388] sm:$0xff] }
  0x28   :  { %4215 = vmatprep.subr.bf16.mxu0 %v4214_v37  ;;  %9116 = vst [vmem:[#allocation9_spill] sm:$0xff] %v5196_v11  ;;  %v4220_v12 = vpack.c.bf16 %v1524_v2, %v1523_v60  ;;  %v4250_v14 = vpack.c.bf16 %v1572_v5, %v1571_v4  ;;  %v692_v18 = vsel %vm654_vm0, %v5196_v11, %v618_v59  ;;  %v4829_v25 = vmov 1966171168  }
  0x29   :  { %4245 = vmatpush3.bf16.msra.mxu1 %v4244_v31  ;;  %v693_v19 = vsel %vm655_vm1, %v5196_v11, %v619_v61  ;;  %v694_v20 = vsel %vm656_vm2, %v5196_v11, %v620_v62  ;;  %v695_v21 = vsel %vm657_vm3, %v5196_v11, %v621_v1  ;;  %v696_v43 = vsel %vm658_vm4, %v5196_v11, %v622_v7 }
  0x2a   :  { %4247 = vmatprep.subr.bf16.mxu1 %v4246_v52  ;;  %v697_v49 = vsel %vm659_vm5, %v5196_v11, %v623_v8  ;;  %v698_v50 = vsel %vm660_vm6, %v5196_v11, %v624_v9  ;;  %v699_v23 = vsel %vm661_vm7, %v5196_v11, %v625_v10  ;;  %v4252_v24 = vpack.c.bf16 %v1556_v16, %v1555_v15 }
  0x2b   :  { %4217 = vmatpush3.bf16.msra.mxu0 %v4216_v45  ;;  %v769_v26 = vunpack.c.l.s4 %v4829_v25  ;;  %v5235_v56 = vshrl.u32 %v35_v3, 7  ;;  %v764_v27 = vcombine.low %v692_v18, %v693_v19  ;;  %v4254_v0 = vpack.c.bf16 %v1590_v42, %v1589_v22 }
  0x2c   :  { %4219 = vmatprep.subr.bf16.mxu0 %v4218_v58  ;;  %v765_v28 = vcombine.low %v694_v20, %v695_v21  ;;  %v766_v29 = vcombine.low %v696_v43, %v697_v49  ;;  %v767_v30 = vcombine.low %v698_v50, %v699_v23  ;;  %v4286_v32 = vpack.c.bf16 %v1622_v63, %v1621_v57 }
  0x2d   :  { %4249 = vmatpush3.bf16.msra.mxu1 %v4248_v55  ;;  %9117 = vst [vmem:[#allocation10_spill] sm:$0xff] %v5235_v56  ;;  %v770_v31 = vunpack.c.0.s8 %v769_v26  ;;  %v44_v55 = vadd.s32 1024, %v4894_v13  ;;  %v45_v58 = vadd.s32 1152, %v4894_v13  ;;  %v46_v60 = vadd.s32 1280, %v4894_v13 }
  0x2e   :  { %4251 = vmatprep.subr.bf16.mxu1 %v4250_v14  ;;  %v47_v61 = vadd.s32 1408, %v4894_v13  ;;  %v48_v62 = vadd.s32 1536, %v4894_v13  ;;  %v49_v2 = vadd.s32 1664, %v4894_v13  ;;  %v50_v4 = vadd.s32 1792, %v4894_v13 }
  0x2f   :  { %4221 = vmatpush3.bf16.msra.mxu0 %v4220_v12  ;;  %v5244_v3 = vsub.s32 %v770_v31, %v5235_v56  ;;  %v51_v5 = vadd.s32 1920, %v4894_v13  ;;  %v5269_v9 = vand.u32 3, %v44_v55  ;;  %v5271_v10 = vand.u32 3, %v45_v58 }
  0x30   :  { %4255 = vmatprep.subr.bf16.mxu0 %v4254_v0  ;;  %v9012_v14 = vmov 683565275   ;;  %v9022_v16 = vmov 2475754826   ;;  %v9014_v19 = vmov 2131351028  }
  0x31   :  { %4253 = vmatpush3.bf16.msra.mxu1 %v4252_v24  ;;  %9118 = vst [vmem:[#allocation11_spill] sm:$0xff] %v5244_v3  ;;  %v774_v33 = vrot.slane %v764_v27, %v5244_v3  ;;  %v781_v34 = vrot.slane %v765_v28, %v5244_v3  ;;  %v788_v35 = vrot.slane %v766_v29, %v5244_v3  ;;  %v9020_v21 = vmov 2102212464  }
  0x32   :  { %4287 = vmatprep.subr.bf16.mxu1 %v4286_v32  ;;  %v795_v36 = vrot.slane %v767_v30, %v5244_v3  ;;  %v9018_v42 = vmov 920167782   ;;  %v5278_v49 = vand.u32 3, %v46_v60  ;;  %v5280_v50 = vand.u32 3, %v47_v61 }
  0x33   :  { %v796_v37 = vcombine.low %v774_v33, %v781_v34  ;;  %v9016_v63 = vmov 1326507024   ;;  %v5297_v55 = vand.u32 3, %v51_v5  ;;  %vm514_vm13 = vcmp.eq.s32.totalorder %v5269_v9, 2 }
  0x34   :  { %v797_v38 = vcombine.low %v788_v35, %v795_v36  ;;  %vm515_vm14 = vcmp.eq.s32.totalorder %v5271_v10, 2  ;;  %vm516_vm15 = vcmp.eq.s32.totalorder %v5278_v49, 2  ;;  %vm517_vm0 = vcmp.eq.s32.totalorder %v5280_v50, 2 }
  0x35   :  { %v804_v39 = vrot.slane %v796_v37, %v5244_v3  ;;  %vm521_vm5 = vcmp.eq.s32.totalorder %v5297_v55, 2  ;;  %v554_v5 = vsel %vm516_vm15, %v5039_v17, %v5010_v6  ;;  %vm588_vm6 = vcmp.eq.s32.totalorder %v5269_v9, 1 }
  0x36   :  { %v811_v40 = vrot.slane %v797_v38, %v5244_v3  ;;  %vm589_vm7 = vcmp.eq.s32.totalorder %v5271_v10, 1  ;;  %vm663_vm15 = vcmp.eq.s32.totalorder %v5271_v10, 0 }
  0x38   :  { %v812_v44 = vcombine.low %v804_v39, %v811_v40  ;;  %v5288_v40 = vand.u32 3, %v48_v62 }
  0x3a   :  { %v5255_v45 = vadd.f32 %v812_v44, %v30_v41  ;;  %vm518_vm1 = vcmp.eq.s32.totalorder %v5288_v40, 2 }
  0x3c   :  { %v997_v46 = vand.u32 2139095040, %v5255_v45  ;;  %v994_v48 = vand.u32 2147483647, %v5255_v45 }
  0x3e   :  { %v998_v47 = vshrl.u32 %v997_v46, 23  ;;  %v1001_v53 = vand.u32 8388607, %v994_v48  ;;  %v5290_v46 = vand.u32 3, %v49_v2  ;;  %v552_v2 = vsel %vm514_vm13, %v5039_v17, %v5010_v6 }
  0x3f   :  { %vm595_vm13 = vcmp.eq.s32.totalorder %v5297_v55, 1 }
  0x40   :  { %v3540_v51 = vadd.s32 4294967169, %v998_v47  ;;  %v1002_v7 = vor.u32 8388608, %v1001_v53  ;;  %v5292_v47 = vand.u32 3, %v50_v4  ;;  %vm519_vm2 = vcmp.eq.s32.totalorder %v5290_v46, 2 }
  0x41   :  { %v553_v4 = vsel %vm515_vm14, %v5039_v17, %v5010_v6  ;;  %vm662_vm14 = vcmp.eq.s32.totalorder %v5269_v9, 0 }
  0x42   :  { %v1004_v52 = vadd.s32 1, %v3540_v51  ;;  %v1042_v0 = vshll.u32 %v1002_v7, 8  ;;  %vm520_vm3 = vcmp.eq.s32.totalorder %v5292_v47, 2  ;;  %v555_v7 = vsel %vm517_vm0, %v5039_v17, %v5010_v6 }
  0x43   :  { %vm664_vm0 = vcmp.eq.s32.totalorder %v5278_v49, 0 }
  0x44   :  { %vm1005_vm8 = vcmp.gt.s32.totalorder %v1004_v52, 0 }
  0x45   :  { %v1006_v59 = vsel %vm1005_vm8, %v1004_v52, 0  ;;  %vm590_vm8 = vcmp.eq.s32.totalorder %v5278_v49, 1 }
  0x46   :  { %v1008_v1 = vand.u32 31, %v1006_v59  ;;  %v1007_v8 = vshrl.u32 %v1006_v59, 5 }
  0x48   :  { %v1009_v12 = vsub.s32 32, %v1008_v1  ;;  %v1011_v15 = vshll.u32 %v9012_v14, %v1008_v1  ;;  %v1014_v18 = vshll.u32 %v9022_v16, %v1008_v1  ;;  %v1017_v20 = vshll.u32 %v9014_v19, %v1008_v1 }
  0x49   :  { %v1020_v22 = vshll.u32 %v9020_v21, %v1008_v1  ;;  %v1023_v43 = vshll.u32 %v9018_v42, %v1008_v1  ;;  %vm1026_vm9 = vcmp.lt.s32.totalorder %v1007_v8, 1  ;;  %vm1029_vm10 = vcmp.lt.s32.totalorder %v1007_v8, 4 }
  0x4a   :  { %v1010_v23 = vshrl.u32 %v9012_v14, %v1009_v12  ;;  %v1012_v24 = vshrl.u32 %v9022_v16, %v1009_v12  ;;  %v1015_v25 = vshrl.u32 %v9014_v19, %v1009_v12  ;;  %v1018_v26 = vshrl.u32 %v9020_v21, %v1009_v12 }
  0x4b   :  { %v1021_v57 = vshrl.u32 %v9018_v42, %v1009_v12  ;;  %v1024_v27 = vshrl.u32 %v9016_v63, %v1009_v12  ;;  %vm1027_vm11 = vcmp.lt.s32.totalorder %v1007_v8, 2  ;;  %vm1028_vm12 = vcmp.lt.s32.totalorder %v1007_v8, 3 }
  0x4c   :  { %v1013_v28 = vor.u32 %v1012_v24, %v1011_v15  ;;  %v1016_v29 = vor.u32 %v1015_v25, %v1014_v18  ;;  %v1019_v30 = vor.u32 %v1018_v26, %v1017_v20  ;;  %v556_v12 = vsel %vm518_vm1, %v5039_v17, %v5010_v6 }
  0x4d   :  { %v1022_v31 = vor.u32 %v1021_v57, %v1020_v22  ;;  %v1025_v32 = vor.u32 %v1024_v27, %v1023_v43  ;;  %v557_v15 = vsel %vm519_vm2, %v5039_v17, %v5010_v6  ;;  %v558_v18 = vsel %vm520_vm3, %v5039_v17, %v5010_v6 }
  0x4e   :  { %v1030_v33 = vsel %vm1026_vm9, %v1010_v23, %v1013_v28  ;;  %v1031_v34 = vsel %vm1029_vm10, %v1019_v30, 2102212464  ;;  %v1034_v35 = vsel %vm1026_vm9, %v1013_v28, %v1016_v29  ;;  %v1038_v36 = vsel %vm1026_vm9, %v1016_v29, %v1019_v30 }
  0x4f   :  { %v1032_v37 = vsel %vm1028_vm12, %v1016_v29, %v1031_v34  ;;  %v1035_v38 = vsel %vm1029_vm10, %v1022_v31, 920167782  ;;  %v1039_v39 = vsel %vm1029_vm10, %v1025_v32, 1326507024  ;;  %vm591_vm9 = vcmp.eq.s32.totalorder %v5280_v50, 1 }
  0x50   :  { %v1036_v41 = vsel %vm1028_vm12, %v1019_v30, %v1035_v38  ;;  %v1040_v44 = vsel %vm1028_vm12, %v1022_v31, %v1039_v39  ;;  %v1033_v51 = vsel %vm1027_vm11, %v1030_v33, %v1032_v37  ;;  %vm592_vm10 = vcmp.eq.s32.totalorder %v5288_v40, 1 }
  0x51   :  { %v1037_v52 = vsel %vm1027_vm11, %v1034_v35, %v1036_v41  ;;  %v1041_v53 = vsel %vm1027_vm11, %v1038_v36, %v1040_v44  ;;  %v1049_v62 = vmul.u32 %v1042_v0, %v1033_v51  ;;  %vm593_vm11 = vcmp.eq.s32.totalorder %v5290_v46, 1 }
  0x52   :  { %v5299_v58 = vmul.u32.u64.low %v1042_v0, %v1041_v53  ;;  %v5300_v59 = vmul.u32.u64.high %v1042_v0, %v1041_v53, %v5299_v58  ;;  %v5302_v60 = vmul.u32.u64.low %v1042_v0, %v1037_v52  ;;  %v5303_v61 = vmul.u32.u64.high %v1042_v0, %v1037_v52, %v5302_v60 }
  0x53   :  { %vm594_vm12 = vcmp.eq.s32.totalorder %v5292_v47, 1  ;;  %v559_v43 = vsel %vm521_vm5, %v5039_v17, %v5010_v6  ;;  %v626_v23 = vsel %vm588_vm6, %v5149_v54, %v552_v2  ;;  %v627_v24 = vsel %vm589_vm7, %v5149_v54, %v553_v4  ;;  %v31_v2 = vld [vmem:[%s9007_s1 + $0x8] sm:$0xff] }
  0x54   :  { %vm1051_vm4 = vc.u32 %v5300_v59, %v5302_v60  ;;  %v1052_v1 = vadd.s32 1, %v5303_v61  ;;  %v628_v25 = vsel %vm590_vm8, %v5149_v54, %v554_v5  ;;  %v629_v26 = vsel %vm591_vm9, %v5149_v54, %v555_v7 }
  0x55   :  { %v630_v57 = vsel %vm592_vm10, %v5149_v54, %v556_v12  ;;  %v631_v0 = vsel %vm593_vm11, %v5149_v54, %v557_v15  ;;  %v632_v28 = vsel %vm594_vm12, %v5149_v54, %v558_v18  ;;  %vm665_vm1 = vcmp.eq.s32.totalorder %v5280_v50, 0 }
  0x56   :  { %v1053_v8 = vsel %vm1051_vm4, %v1052_v1, %v5303_v61  ;;  %vm666_vm2 = vcmp.eq.s32.totalorder %v5288_v40, 0  ;;  %v633_v30 = vsel %vm595_vm13, %v5149_v54, %v559_v43  ;;  %vm667_vm3 = vcmp.eq.s32.totalorder %v5290_v46, 0 }
  0x57   :  { %v1054_v20 = vadd.s32 %v1053_v8, %v1049_v62  ;;  %vm668_vm4 = vcmp.eq.s32.totalorder %v5292_v47, 0  ;;  %vm669_vm5 = vcmp.eq.s32.totalorder %v5297_v55, 0  ;;  %v700_v9 = vsel %vm662_vm14, %v5196_v11, %v626_v23 }
  0x58   :  { %v701_v10 = vsel %vm663_vm15, %v5196_v11, %v627_v24  ;;  %v702_v49 = vsel %vm664_vm0, %v5196_v11, %v628_v25  ;;  %v703_v50 = vsel %vm665_vm1, %v5196_v11, %v629_v26  ;;  %v704_v32 = vsel %vm666_vm2, %v5196_v11, %v630_v57  ;;  %v5398_v24 = vld [vmem:[%s9008_s2 + $0x300] sm:$0xff]  ;;  %v5403_v25 = vld [vmem:[%s9008_s2 + $0x308] sm:$0xff]  ;;  %v5408_v26 = vld [vmem:[%s9008_s2 + $0x290] sm:$0xff] }
  0x59   :  { %v1055_v22 = vadd.s32 536870912, %v1054_v20  ;;  %v705_v33 = vsel %vm667_vm3, %v5196_v11, %v631_v0  ;;  %v706_v34 = vsel %vm668_vm4, %v5196_v11, %v632_v28  ;;  %v707_v35 = vsel %vm669_vm5, %v5196_v11, %v633_v30  ;;  %v5418_v30 = vld [vmem:[%s9008_s2 + $0x210] sm:$0xff] }
  0x5a   :  { %v813_v37 = vcombine.low %v700_v9, %v701_v10  ;;  %v814_v38 = vcombine.low %v702_v49, %v703_v50  ;;  %v815_v39 = vcombine.low %v704_v32, %v705_v33  ;;  %v816_v40 = vcombine.low %v706_v34, %v707_v35  ;;  %v5433_v50 = vld [vmem:[%s9008_s2 + $0x390] sm:$0xff]  ;;  %v5438_v32 = vld [vmem:[%s9008_s2 + $0x398] sm:$0xff] }
  0x5b   :  { %v5349_v27 = vshrl.u32 %v1055_v22, 30  ;;  %v1050_v1 = vadd.s32 %v5302_v60, %v5300_v59  ;;  %v5388_v59 = vld [vmem:[%s9008_s2 + $0x200] sm:$0xff]  ;;  %v5393_v60 = vld [vmem:[%s9008_s2 + $0x208] sm:$0xff]  ;;  %v5423_v49 = vsub.s32 1, %v5235_v56  ;;  %v5441_v35 = vsub.s32 0, %v5235_v56 }
  0x5c   :  { %v823_v44 = vrot.slane %v813_v37, %v5244_v3  ;;  %v830_v46 = vrot.slane %v814_v38, %v5244_v3  ;;  %v837_v47 = vrot.slane %v815_v39, %v5244_v3  ;;  %v844_v51 = vrot.slane %v816_v40, %v5244_v3  ;;  %v5451_v38 = vld [vmem:[%s9008_s2 + $0x310] sm:$0xff]  ;;  %v5456_v39 = vld [vmem:[%s9008_s2 + $0x318] sm:$0xff] }
  0x5d   :  { %v1057_v29 = vshll.u32 %v5349_v27, 30  ;;  %v1080_v10 = vsub.s32 4, %v5349_v27  ;;  %9120 = vst [vmem:[#allocation13_spill] sm:$0xff] %v5423_v49  ;;  %9121 = vst [vmem:[#allocation14_spill] sm:$0xff] %v5441_v35  ;;  %v5459_v40 = vsub.s32 2, %v5235_v56  ;;  %vm996_vm7 = vcmp.lt.s32.totalorder %v5255_v45, 0 }
  0x5e   :  { %v845_v53 = vcombine.low %v823_v44, %v830_v46  ;;  %v846_v55 = vcombine.low %v837_v47, %v844_v51  ;;  %v5468_v46 = vld [vmem:[%s9008_s2 + $0x2a0] sm:$0xff]  ;;  %v5473_v47 = vld [vmem:[%s9008_s2 + $0x2a8] sm:$0xff]  ;;  %vm5510_vm9 = vcmp.le.f32.partialorder %v994_v48, 0.7853982  ;;  %vm1086_vm1 = vweird.f32 %v5255_v45 }
  0x5f   :  { %v1058_v31 = vsub.s32 %v1054_v20, %v1057_v29  ;;  %v5413_v29 = vld [vmem:[%s9008_s2 + $0x298] sm:$0xff]  ;;  %9123 = vst [vmem:[#allocation16_spill] sm:$0xff] %v5459_v40  ;;  %v5478_v51 = vld [vmem:[%s9008_s2 + $0x220] sm:$0xff] }
  0x60   :  { %v853_v61 = vrot.slane %v845_v53, %v5244_v3  ;;  %v860_v62 = vrot.slane %v846_v55, %v5244_v3  ;;  %v5610_v55 = vld [vmem:[%s9008_s2 + $0x2c8] sm:$0xff] }
  0x61   :  { %v1060_v36 = vsub.s32 0, %v1058_v31 }
  0x62   :  { %v861_v5 = vcombine.low %v853_v61, %v860_v62  ;;  %v5491_v61 = vld [vmem:[%s9008_s2 + $0x3a0] sm:$0xff]  ;;  %v5496_v62 = vld [vmem:[%s9008_s2 + $0x3a8] sm:$0xff] }
  0x63   :  { %v3541_v41 = vmin.u32 %v1060_v36, %v1058_v31  ;;  %v5444_v36 = vsub.s32 3, %v5235_v56 }
  0x64   :  { %v5382_v15 = vadd.f32 %v861_v5, %v31_v2  ;;  %v1081_v2 = vsel %vm996_vm7, %v1080_v10, %v5349_v27  ;;  %v5506_v5 = vsub.s32 5, %v5235_v56  ;;  %v5590_v27 = vld [vmem:[%s9008_s2 + $0x330] sm:$0xff] }
  0x65   :  { %v1062_v52 = vclz %v3541_v41  ;;  %9122 = vst [vmem:[#allocation15_spill] sm:$0xff] %v5444_v36 }
  0x66   :  { %9119 = vst [vmem:[#allocation12_spill] sm:$0xff] %v5382_v15  ;;  %v1100_v22 = vand.u32 2139095040, %v5382_v15  ;;  %v9011_v9 = vand.u32 2147483647, %v5382_v15  ;;  %9124 = vst [vmem:[#allocation17_spill] sm:$0xff] %v5506_v5 }
  0x67   :  { %v3542_v58 = vadd.s32 4294967294, %v1062_v52 }
  0x68   :  { %v1101_v57 = vshrl.u32 %v1100_v22, 23 }
  0x69   :  { %vm3543_vm6 = vcmp.lt.s32.totalorder %v3542_v58, 0 }
  0x6a   :  { %v1065_v4 = vsel %vm3543_vm6, 0, %v3542_v58  ;;  %v3544_v33 = vadd.s32 4294967169, %v1101_v57  ;;  %v5486_v58 = vld [vmem:[%s9008_s2 + $0x228] sm:$0xff] }
  0x6b   :  { %v1066_v7 = vsub.s32 32, %v1065_v4  ;;  %v1067_v8 = vshll.u32 %v1058_v31, %v1065_v4  ;;  %v1070_v12 = vsub.s32 4294967266, %v1065_v4  ;;  %v5428_v31 = vld [vmem:[%s9008_s2 + $0x218] sm:$0xff]  ;;  %v5615_v4 = vld [vmem:[%s9008_s2 + $0x240] sm:$0xff] }
  0x6c   :  { %v1107_v52 = vadd.s32 1, %v3544_v33  ;;  %9127 = vst [vmem:[#allocation18_spill] sm:$0xff] %v5615_v4 }
  0x6d   :  { %v1068_v18 = vshrl.u32 %v1050_v1, %v1066_v7  ;;  %v1071_v20 = vadd.s32 127, %v1070_v12  ;;  %v1104_v1 = vand.u32 8388607, %v9011_v9 }
  0x6e   :  { %vm1108_vm8 = vcmp.gt.s32.totalorder %v1107_v52, 0 }
  0x6f   :  { %v1069_v43 = vor.u32 %v1068_v18, %v1067_v8  ;;  %v1072_v23 = vshll.u32 %v1071_v20, 23  ;;  %v1109_v18 = vsel %vm1108_vm8, %v1107_v52, 0  ;;  %v1105_v57 = vor.u32 8388608, %v1104_v1 }
  0x71   :  { %v1073_v0 = vor.u32 4788187, %v1072_v23  ;;  %v1076_v28 = vcvt.s32.f32 %v1069_v43  ;;  %v1111_v43 = vand.u32 31, %v1109_v18  ;;  %v1083_v23 = vsel %vm5510_vm9, 0, %v1081_v2 }
  0x72   :  { %v5540_v20 = vand.u32 3, %v1083_v23  ;;  %v5560_v23 = vld [vmem:[%s9008_s2 + $0x2b8] sm:$0xff] }
  0x73   :  { %v1074_v34 = vand.u32 2147483647, %v1073_v0  ;;  %v1110_v0 = vshrl.u32 %v1109_v18, 5  ;;  %v1112_v10 = vsub.s32 32, %v1111_v43  ;;  %v1114_v33 = vshll.u32 %v9012_v14, %v1111_v43 }
  0x74   :  { %v1120_v52 = vshll.u32 %v9014_v19, %v1111_v43  ;;  %v1123_v9 = vshll.u32 %v9020_v21, %v1111_v43  ;;  %vm1092_vm14 = vcmp.eq.s32.totalorder %v5540_v20, 2  ;;  %vm1089_vm15 = vcmp.eq.s32.totalorder %v5540_v20, 0 }
  0x75   :  { %v1077_v53 = vmul.f32 %v1076_v28, %v1074_v34  ;;  %v1117_v34 = vshll.u32 %v9022_v16, %v1111_v43  ;;  %v1113_v1 = vshrl.u32 %v9012_v14, %v1112_v10  ;;  %v1115_v2 = vshrl.u32 %v9022_v16, %v1112_v10 }
  0x76   :  { %v1118_v7 = vshrl.u32 %v9014_v19, %v1112_v10  ;;  %v1124_v18 = vshrl.u32 %v9018_v42, %v1112_v10  ;;  %vm1129_vm10 = vcmp.lt.s32.totalorder %v1110_v0, 1  ;;  %vm1131_vm11 = vcmp.lt.s32.totalorder %v1110_v0, 3  ;;  %v5550_v19 = vld [vmem:[%s9008_s2 + $0x328] sm:$0xff] }
  0x77   :  { %v1078_v8 = vxor.u32 2147483648, %v1077_v53  ;;  %vm1132_vm12 = vcmp.lt.s32.totalorder %v1110_v0, 4  ;;  %vm1130_vm13 = vcmp.lt.s32.totalorder %v1110_v0, 2  ;;  %v5667_v0 = vld [vmem:[%s9008_s2 + $0x2d0] sm:$0xff]  ;;  %vm1088_vm0 = vcmp.lt.s32.totalorder %v5540_v20, 2  ;;  %v5700_v20 = vld [vmem:[%s9008_s2 + $0x258] sm:$0xff] }
  0x78   :  { %v1119_v14 = vor.u32 %v1118_v7, %v1117_v34  ;;  %v5565_v34 = vld [vmem:[%s9008_s2 + $0x230] sm:$0xff]  ;;  %9133 = vst [vmem:[#allocation24_spill] sm:$0xff] %v5667_v0  ;;  %9137 = vst [vmem:[#allocation28_spill] sm:$0xff] %v5700_v20  ;;  %v55_v0 = vadd.s32 2432, %v4894_v13  ;;  %v5775_v20 = vld [vmem:[%s9008_s2 + $0x3e8] sm:$0xff] }
  0x79   :  { %v1079_v48 = vsel %vm996_vm7, %v1078_v8, %v1077_v53  ;;  %v1126_v53 = vshll.u32 %v9018_v42, %v1111_v43  ;;  %v1121_v8 = vshrl.u32 %v9020_v21, %v1112_v10  ;;  %v5545_v43 = vld [vmem:[%s9008_s2 + $0x320] sm:$0xff]  ;;  %v1125_v42 = vor.u32 %v1124_v18, %v1123_v9  ;;  %v5575_v7 = vld [vmem:[%s9008_s2 + $0x3b0] sm:$0xff]  ;;  %v5580_v9 = vld [vmem:[%s9008_s2 + $0x3b8] sm:$0xff] }
  0x7a   :  { %v1082_v28 = vsel %vm5510_vm9, %v5255_v45, %v1079_v48  ;;  %v1127_v48 = vshrl.u32 %v9016_v63, %v1112_v10  ;;  %v5555_v10 = vld [vmem:[%s9008_s2 + $0x2b0] sm:$0xff] }
  0x7b   :  { %4794 = vcosq.f32 %v1082_v28  ;;  %v1122_v63 = vor.u32 %v1121_v8, %v1120_v52  ;;  %v1145_v8 = vshll.u32 %v1105_v57, 8  ;;  %v5600_v57 = vld [vmem:[%s9008_s2 + $0x2c0] sm:$0xff]  ;;  %v5732_v45 = vld [vmem:[%s9008_s2 + $0x350] sm:$0xff] }
  0x7c   :  { %4796 = vsinq.f32 %v1082_v28  ;;  %v1116_v28 = vor.u32 %v1115_v2, %v1114_v33  ;;  %v1128_v33 = vor.u32 %v1127_v48, %v1126_v53  ;;  %v5570_v2 = vld [vmem:[%s9008_s2 + $0x238] sm:$0xff]  ;;  %v1138_v48 = vsel %vm1132_vm12, %v1125_v42, 920167782 }
  0x7d   :  { %v1134_v18 = vsel %vm1132_vm12, %v1122_v63, 2102212464  ;;  %v1141_v21 = vsel %vm1129_vm10, %v1119_v14, %v1122_v63 }
  0x7e   :  { %v1133_v52 = vsel %vm1129_vm10, %v1113_v1, %v1116_v28  ;;  %v1137_v53 = vsel %vm1129_vm10, %v1116_v28, %v1119_v14  ;;  %v1142_v16 = vsel %vm1132_vm12, %v1128_v33, 1326507024  ;;  %v5595_v1 = vld [vmem:[%s9008_s2 + $0x338] sm:$0xff]  ;;  %v1135_v28 = vsel %vm1131_vm11, %v1119_v14, %v1134_v18  ;;  %v5620_v14 = vld [vmem:[%s9008_s2 + $0x248] sm:$0xff]  ;;  %v5628_v18 = vld [vmem:[%s9008_s2 + $0x3c0] sm:$0xff] }
  0x7f   :  { %v1139_v33 = vsel %vm1131_vm11, %v1122_v63, %v1138_v48  ;;  %v1143_v22 = vsel %vm1131_vm11, %v1125_v42, %v1142_v16  ;;  %9128 = vst [vmem:[#allocation19_spill] sm:$0xff] %v5620_v14  ;;  %v1136_v16 = vsel %vm1130_vm13, %v1133_v52, %v1135_v28  ;;  %9129 = vst [vmem:[#allocation20_spill] sm:$0xff] %v5628_v18  ;;  %v5633_v48 = vld [vmem:[%s9008_s2 + $0x3c8] sm:$0xff] }
  0x80   :  { %v1140_v42 = vsel %vm1130_vm13, %v1137_v53, %v1139_v33  ;;  %v1144_v63 = vsel %vm1130_vm13, %v1141_v21, %v1143_v22  ;;  %9130 = vst [vmem:[#allocation21_spill] sm:$0xff] %v5633_v48  ;;  %v5672_v21 = vld [vmem:[%s9008_s2 + $0x2d8] sm:$0xff]  ;;  %v1152_v22 = vmul.u32 %v1145_v8, %v1136_v16  ;;  %v5695_v16 = vsub.s32 7, %v5235_v56  ;;  %v5806_v48 = vld [vmem:[%s9008_s2 + $0x2f0] sm:$0xff] }
  0x81   :  { %v5635_v12 = vmul.u32.u64.low %v1145_v8, %v1144_v63  ;;  %v5636_v44 = vmul.u32.u64.high %v1145_v8, %v1144_v63, %v5635_v12  ;;  %v5638_v41 = vmul.u32.u64.low %v1145_v8, %v1140_v42  ;;  %v5639_v37 = vmul.u32.u64.high %v1145_v8, %v1140_v42, %v5638_v41  ;;  %v5662_v63 = vld [vmem:[%s9008_s2 + $0x348] sm:$0xff]  ;;  %9134 = vst [vmem:[#allocation25_spill] sm:$0xff] %v5672_v21  ;;  %v5692_v8 = vld [vmem:[%s9008_s2 + $0x250] sm:$0xff] }
  0x82   :  { %v5652_v12 = vld [vmem:[%s9008_s2 + $0x340] sm:$0xff]  ;;  %9132 = vst [vmem:[#allocation23_spill] sm:$0xff] %v5662_v63  ;;  %9135 = vst [vmem:[#allocation26_spill] sm:$0xff] %v5692_v8  ;;  %v52_v42 = vadd.s32 2048, %v4894_v13  ;;  %v54_v56 = vadd.s32 2304, %v4894_v13  ;;  %v58_v63 = vadd.s32 2816, %v4894_v13 }
  0x83   :  { %9131 = vst [vmem:[#allocation22_spill] sm:$0xff] %v5652_v12  ;;  %vm1154_vm2 = vc.u32 %v5636_v44, %v5638_v41  ;;  %v1155_v3 = vadd.s32 1, %v5639_v37  ;;  %9136 = vst [vmem:[#allocation27_spill] sm:$0xff] %v5695_v16  ;;  %v5770_v8 = vld [vmem:[%s9008_s2 + $0x3e0] sm:$0xff] }
  0x84   :  { %v5795_v18 = vand.u32 3, %v54_v56 }
  0x85   :  { %v4795_v52 = vpop.eup %4794 }
  0x86   :  { %v4797_v53 = vpop.eup %4796  ;;  %v1093_v28 = vxor.u32 2147483648, %v4795_v52  ;;  %vm524_vm5 = vcmp.eq.s32.totalorder %v5795_v18, 2  ;;  %vm598_vm13 = vcmp.eq.s32.totalorder %v5795_v18, 1 }
  0x87   :  { %v1090_v33 = vxor.u32 2147483648, %v4797_v53 }
  0x88   :  { %v1094_v15 = vsel %vm1092_vm14, %v1093_v28, %v4797_v53  ;;  %v5710_v28 = vld [vmem:[%s9008_s2 + $0x3d8] sm:$0xff] }
  0x89   :  { %v1091_v4 = vsel %vm1089_vm15, %v4795_v52, %v1090_v33  ;;  %v5705_v52 = vld [vmem:[%s9008_s2 + $0x3d0] sm:$0xff]  ;;  %9139 = vst [vmem:[#allocation30_spill] sm:$0xff] %v5710_v28  ;;  %v1156_v33 = vsel %vm1154_vm2, %v1155_v3, %v5639_v37  ;;  %v56_v28 = vadd.s32 2560, %v4894_v13 }
  0x8a   :  { %v1095_v53 = vsel %vm1088_vm0, %v1091_v4, %v1094_v15  ;;  %9138 = vst [vmem:[#allocation29_spill] sm:$0xff] %v5705_v52  ;;  %v53_v15 = vadd.s32 2176, %v4894_v13  ;;  %v1157_v14 = vadd.s32 %v1156_v33, %v1152_v22  ;;  %v5737_v22 = vld [vmem:[%s9008_s2 + $0x358] sm:$0xff] }
  0x8b   :  { %v5717_v4 = vsel %vm1086_vm1, nan, %v1095_v53  ;;  %v5742_v53 = vld [vmem:[%s9008_s2 + $0x2e0] sm:$0xff] }
  0x8c   :  { %9140 = vst [vmem:[#allocation31_spill] sm:$0xff] %v5717_v4  ;;  %v2098_v21 = vrot.slane %v5717_v4, %v5423_v49  ;;  %v2094_v12 = vrot.slane %v5717_v4, %v5441_v35  ;;  %v2106_v3 = vrot.slane %v5717_v4, %v5444_v36  ;;  %v2102_v37 = vrot.slane %v5717_v4, %v5459_v40  ;;  %v5751_v35 = vld [vmem:[%s9008_s2 + $0x2e8] sm:$0xff]  ;;  %v5756_v36 = vld [vmem:[%s9008_s2 + $0x260] sm:$0xff] }
  0x8d   :  { %v5761_v49 = vld [vmem:[%s9008_s2 + $0x268] sm:$0xff]  ;;  %v2114_v33 = vrot.slane %v5717_v4, %v5506_v5  ;;  %v2122_v40 = vrot.slane %v5717_v4, %v5695_v16  ;;  %v1158_v52 = vadd.s32 536870912, %v1157_v14  ;;  %v57_v5 = vadd.s32 2688, %v4894_v13 }
  0x8e   :  { %2335 = vmatprep.mubr.f32.mxu0 %v2098_v21  ;;  %2405 = vmatprep.mubr.f32.mxu1 %v2106_v3  ;;  %v5783_v21 = vld [vmem:[%s9008_s2 + $0x360] sm:$0xff]  ;;  %v5788_v3 = vld [vmem:[%s9008_s2 + $0x368] sm:$0xff]  ;;  %v59_v16 = vadd.s32 2944, %v4894_v13  ;;  %v5791_v4 = vand.u32 3, %v52_v42  ;;  %v5793_v11 = vand.u32 3, %v53_v15  ;;  %v5811_v42 = vld [vmem:[%s9008_s2 + $0x2f8] sm:$0xff] }
  0x8f   :  { %2336 = vmatmul.mubr.f32.vlgmr.msra.gmra.mrb[0].mxu0 %v2094_v12  ;;  %2406 = vmatmul.mubr.f32.vlgmr.msra.gmra.mrb[0].mxu1 %v2102_v37  ;;  %v9141_v12 = vpack.c.bf16 %v5393_v60, %v5388_v59  ;;  %v9142_v37 = vpack.c.bf16 %v5403_v25, %v5398_v24  ;;  %v5813_v56 = vshrl.u32 %v1158_v52, 30  ;;  %v5815_v15 = vand.u32 3, %v55_v0  ;;  %v6379_v13 = vld [vmem:[%s9008_s2 + $0x568] sm:$0xff] }
  0x90   :  { %v5817_v59 = vand.u32 3, %v56_v28  ;;  %v5819_v60 = vand.u32 3, %v57_v5  ;;  %v9143_v24 = vpack.c.bf16 %v5413_v29, %v5408_v26  ;;  %v9144_v25 = vpack.c.bf16 %v5438_v32, %v5433_v50  ;;  %2475 = vmatprep.mubr.f32.mxu0 %v2114_v33  ;;  %2545 = vmatprep.mubr.f32.mxu1 %v2122_v40 }
  0x91   :  { %4257 = vmatpush3.bf16.msra.mxu0 %v9141_v12  ;;  %4289 = vmatpush3.bf16.msra.mxu1 %v9142_v37  ;;  %v4308_v12 = vpack.c.bf16 %v5737_v22, %v5732_v45  ;;  %v4278_v52 = vpack.c.bf16 %v5751_v35, %v5742_v53  ;;  %v5831_v0 = vand.u32 3, %v58_v63  ;;  %v5833_v28 = vand.u32 3, %v59_v16  ;;  %v6105_v35 = vld [vmem:[%s9008_s2 + $0x518] sm:$0xff] }
  0x92   :  { %4259 = vmatprep.subr.bf16.mxu0 %v9143_v24  ;;  %4291 = vmatprep.subr.bf16.mxu1 %v9144_v25  ;;  %v4280_v5 = vpack.c.bf16 %v5761_v49, %v5756_v36  ;;  %v4310_v26 = vpack.c.bf16 %v5775_v20, %v5770_v8  ;;  %v1160_v29 = vshll.u32 %v5813_v56, 30  ;;  %vm522_vm3 = vcmp.eq.s32.totalorder %v5791_v4, 2  ;;  %v6168_v49 = vld [vmem:[%s9008_s2 + $0x528] sm:$0xff]  ;;  %v6173_v36 = vld [vmem:[%s9008_s2 + $0x4b0] sm:$0xff] }
  0x93   :  { %v4312_v50 = vpack.c.bf16 %v5788_v3, %v5783_v21  ;;  %v4282_v32 = vpack.c.bf16 %v5811_v42, %v5806_v48  ;;  %vm523_vm4 = vcmp.eq.s32.totalorder %v5793_v11, 2  ;;  %v9145_v63 = vpack.c.bf16 %v5428_v31, %v5418_v30  ;;  %v6178_v21 = vld [vmem:[%s9008_s2 + $0x4b8] sm:$0xff]  ;;  %v6208_v42 = vld [vmem:[%s9008_s2 + $0x530] sm:$0xff] }
  0x94   :  { %v9146_v40 = vpack.c.bf16 %v5456_v39, %v5451_v38  ;;  %v5853_v16 = vsub.s32 %v1157_v14, %v1160_v29  ;;  %vm525_vm6 = vcmp.eq.s32.totalorder %v5815_v15, 2  ;;  %vm526_vm7 = vcmp.eq.s32.totalorder %v5817_v59, 2  ;;  %v6203_v48 = vld [vmem:[%s9008_s2 + $0x5b8] sm:$0xff] }
  0x95   :  { %4261 = vmatpush3.bf16.msra.mxu0 %v9145_v63  ;;  %vm527_vm8 = vcmp.eq.s32.totalorder %v5819_v60, 2  ;;  %v9147_v33 = vpack.c.bf16 %v5473_v47, %v5468_v46  ;;  %v9148_v30 = vpack.c.bf16 %v5496_v62, %v5491_v61  ;;  %v5866_v31 = vadd.s32 %v5638_v41, %v5636_v44 }
  0x96   :  { %4293 = vmatpush3.bf16.msra.mxu1 %v9146_v40  ;;  %vm528_vm9 = vcmp.eq.s32.totalorder %v5831_v0, 2  ;;  %vm529_vm10 = vcmp.eq.s32.totalorder %v5833_v28, 2  ;;  %v560_v38 = vsel %vm522_vm3, %v5039_v17, %v5010_v6  ;;  %v1163_v39 = vsub.s32 0, %v5853_v16 }
  0x97   :  { %4263 = vmatprep.subr.bf16.mxu0 %v9147_v33  ;;  %4295 = vmatprep.subr.bf16.mxu1 %v9148_v30  ;;  %v561_v46 = vsel %vm523_vm4, %v5039_v17, %v5010_v6  ;;  %v562_v47 = vsel %vm524_vm5, %v5039_v17, %v5010_v6  ;;  %vm596_vm11 = vcmp.eq.s32.totalorder %v5791_v4, 1  ;;  %v563_v41 = vsel %vm525_vm6, %v5039_v17, %v5010_v6 }
  0x98   :  { %v564_v44 = vsel %vm526_vm7, %v5039_v17, %v5010_v6  ;;  %v565_v61 = vsel %vm527_vm8, %v5039_v17, %v5010_v6  ;;  %vm597_vm12 = vcmp.eq.s32.totalorder %v5793_v11, 1  ;;  %v9149_v62 = vpack.c.bf16 %v5486_v58, %v5478_v51 }
  0x99   :  { %v9150_v14 = vpack.c.bf16 %v5550_v19, %v5545_v43  ;;  %v3545_v37 = vmin.u32 %v1163_v39, %v5853_v16  ;;  %v566_v24 = vsel %vm528_vm9, %v5039_v17, %v5010_v6  ;;  %v567_v25 = vsel %vm529_vm10, %v5039_v17, %v5010_v6  ;;  %v6353_v17 = vld [vmem:[%s9008_s2 + $0x468] sm:$0xff]  ;;  %v6358_v6 = vld [vmem:[%s9008_s2 + $0x5e0] sm:$0xff] }
  0x9a   :  { %4265 = vmatpush3.bf16.msra.mxu0 %v9149_v62  ;;  %v9151_v29 = vpack.c.bf16 %v5560_v23, %v5555_v10  ;;  %v9152_v51 = vpack.c.bf16 %v5580_v9, %v5575_v7  ;;  %vm599_vm14 = vcmp.eq.s32.totalorder %v5815_v15, 1  ;;  %vm600_vm15 = vcmp.eq.s32.totalorder %v5817_v59, 1  ;;  %9197 = vst [vmem:[#allocation32_spill] sm:$0xff] %v6358_v6 }
  0x9b   :  { %4297 = vmatpush3.bf16.msra.mxu1 %v9150_v14  ;;  %vm601_vm0 = vcmp.eq.s32.totalorder %v5819_v60, 1  ;;  %vm602_vm1 = vcmp.eq.s32.totalorder %v5831_v0, 1  ;;  %v1165_v19 = vclz %v3545_v37  ;;  %vm603_vm2 = vcmp.eq.s32.totalorder %v5833_v28, 1  ;;  %v5959_v14 = vld [vmem:[%s9008_s2 + $0x278] sm:$0xff]  ;;  %v5964_v37 = vld [vmem:[%s9008_s2 + $0x3f0] sm:$0xff] }
  0x9c   :  { %4267 = vmatprep.subr.bf16.mxu0 %v9151_v29  ;;  %4299 = vmatprep.subr.bf16.mxu1 %v9152_v51  ;;  %v634_v58 = vsel %vm596_vm11, %v5149_v54, %v560_v38  ;;  %v635_v43 = vsel %vm597_vm12, %v5149_v54, %v561_v46  ;;  %v636_v10 = vsel %vm598_vm13, %v5149_v54, %v562_v47  ;;  %vm670_vm3 = vcmp.eq.s32.totalorder %v5791_v4, 0  ;;  %v9156_v46 = vld [vmem:[#allocation21_spill] sm:$0xff]  ;;  %v9157_v47 = vld [vmem:[#allocation20_spill] sm:$0xff] }
  0x9d   :  { %v637_v23 = vsel %vm599_vm14, %v5149_v54, %v563_v41  ;;  %v638_v7 = vsel %vm600_vm15, %v5149_v54, %v564_v44  ;;  %v639_v9 = vsel %vm601_vm0, %v5149_v54, %v565_v61  ;;  %v9153_v63 = vpack.c.bf16 %v5570_v2, %v5565_v34  ;;  %v9163_v44 = vld [vmem:[#allocation23_spill] sm:$0xff]  ;;  %v9164_v61 = vld [vmem:[#allocation22_spill] sm:$0xff] }
  0x9e   :  { %v9154_v40 = vpack.c.bf16 %v5595_v1, %v5590_v27  ;;  %v3546_v33 = vadd.s32 4294967294, %v1165_v19  ;;  %v640_v30 = vsel %vm602_vm1, %v5149_v54, %v566_v24  ;;  %v641_v38 = vsel %vm603_vm2, %v5149_v54, %v567_v25  ;;  %v5969_v24 = vld [vmem:[%s9008_s2 + $0x3f8] sm:$0xff] }
  0x9f   :  { %4269 = vmatpush3.bf16.msra.mxu0 %v9153_v63  ;;  %v9155_v39 = vpack.c.bf16 %v5610_v55, %v5600_v57  ;;  %v9158_v41 = vpack.c.bf16 %v9156_v46, %v9157_v47  ;;  %vm671_vm4 = vcmp.eq.s32.totalorder %v5793_v11, 0  ;;  %vm672_vm5 = vcmp.eq.s32.totalorder %v5795_v18, 0  ;;  %v5945_v55 = vld [vmem:[%s9008_s2 + $0x270] sm:$0xff]  ;;  %v9159_v11 = vld [vmem:[#allocation9_spill] sm:$0xff]  ;;  %v9161_v18 = vld [vmem:[#allocation18_spill] sm:$0xff] }
  0xa0   :  { %4301 = vmatpush3.bf16.msra.mxu1 %v9154_v40  ;;  %vm673_vm6 = vcmp.eq.s32.totalorder %v5815_v15, 0  ;;  %vm674_vm7 = vcmp.eq.s32.totalorder %v5817_v59, 0  ;;  %vm3547_vm8 = vcmp.lt.s32.totalorder %v3546_v33, 0  ;;  %vm675_vm9 = vcmp.eq.s32.totalorder %v5819_v60, 0  ;;  %v9160_v57 = vld [vmem:[#allocation19_spill] sm:$0xff]  ;;  %v9169_v63 = vld [vmem:[#allocation30_spill] sm:$0xff] }
  0xa1   :  { %4271 = vmatprep.subr.bf16.mxu0 %v9155_v39  ;;  %4303 = vmatprep.subr.bf16.mxu1 %v9158_v41  ;;  %vm676_vm10 = vcmp.eq.s32.totalorder %v5831_v0, 0  ;;  %vm677_vm11 = vcmp.eq.s32.totalorder %v5833_v28, 0  ;;  %v1168_v27 = vsel %vm3547_vm8, 0, %v3546_v33  ;;  %v708_v34 = vsel %vm670_vm3, %v9159_v11, %v634_v58  ;;  %v9166_v58 = vld [vmem:[#allocation25_spill] sm:$0xff]  ;;  %v5984_v39 = vld [vmem:[%s9008_s2 + $0x370] sm:$0xff]  ;;  %v9172_v15 = vld [vmem:[#allocation10_spill] sm:$0xff] }
  0xa2   :  { %v709_v2 = vsel %vm671_vm4, %v9159_v11, %v635_v43  ;;  %v710_v1 = vsel %vm672_vm5, %v9159_v11, %v636_v10  ;;  %v9162_v4 = vpack.c.bf16 %v9160_v57, %v9161_v18  ;;  %v9165_v62 = vpack.c.bf16 %v9163_v44, %v9164_v61  ;;  %v9167_v43 = vld [vmem:[#allocation24_spill] sm:$0xff]  ;;  %v9170_v40 = vld [vmem:[#allocation29_spill] sm:$0xff]  ;;  %v6002_v47 = vld [vmem:[%s9008_s2 + $0x488] sm:$0xff] }
  0xa3   :  { %v1169_v25 = vsub.s32 32, %v1168_v27  ;;  %v1170_v29 = vshll.u32 %v5853_v16, %v1168_v27  ;;  %v1173_v51 = vsub.s32 4294967266, %v1168_v27  ;;  %v711_v19 = vsel %vm673_vm6, %v9159_v11, %v637_v23  ;;  %v5989_v16 = vld [vmem:[%s9008_s2 + $0x378] sm:$0xff]  ;;  %v5997_v46 = vld [vmem:[%s9008_s2 + $0x480] sm:$0xff]  ;;  %v6031_v60 = vld [vmem:[%s9008_s2 + $0x588] sm:$0xff] }
  0xa4   :  { %4273 = vmatpush3.bf16.msra.mxu0 %v9162_v4  ;;  %4305 = vmatpush3.bf16.msra.mxu1 %v9165_v62  ;;  %v9168_v10 = vpack.c.bf16 %v9166_v58, %v9167_v43  ;;  %v9171_v33 = vpack.c.bf16 %v9169_v63, %v9170_v40  ;;  %v5992_v23 = vsub.s32 4, %v9172_v15  ;;  %v712_v41 = vsel %vm674_vm7, %v9159_v11, %v638_v7  ;;  %v6016_v18 = vld [vmem:[%s9008_s2 + $0x400] sm:$0xff]  ;;  %v6021_v4 = vld [vmem:[%s9008_s2 + $0x408] sm:$0xff]  ;;  %v6057_v28 = vld [vmem:[%s9008_s2 + $0x498] sm:$0xff] }
  0xa5   :  { %v713_v27 = vsel %vm675_vm9, %v9159_v11, %v639_v9  ;;  %v714_v57 = vsel %vm676_vm10, %v9159_v11, %v640_v30  ;;  %v6026_v59 = vld [vmem:[%s9008_s2 + $0x580] sm:$0xff]  ;;  %v1171_v0 = vshrl.u32 %v5866_v31, %v1169_v25  ;;  %v1174_v7 = vadd.s32 127, %v1173_v51  ;;  %v6047_v62 = vld [vmem:[%s9008_s2 + $0x508] sm:$0xff]  ;;  %v6052_v31 = vld [vmem:[%s9008_s2 + $0x490] sm:$0xff] }
  0xa6   :  { %4275 = vmatprep.subr.bf16.mxu0 %v9168_v10  ;;  %4307 = vmatprep.subr.bf16.mxu1 %v9171_v33  ;;  %9173 = vst [vmem:[#allocation21_spill] sm:$0xff] %v5992_v23  ;;  %v715_v9 = vsel %vm677_vm11, %v9159_v11, %v641_v38  ;;  %v862_v30 = vcombine.low %v708_v34, %v709_v2  ;;  %v6042_v61 = vld [vmem:[%s9008_s2 + $0x500] sm:$0xff]  ;;  %v9174_v25 = vld [vmem:[#allocation28_spill] sm:$0xff]  ;;  %v9175_v51 = vld [vmem:[#allocation26_spill] sm:$0xff] }
  0xa7   :  { %v4284_v44 = vpack.c.bf16 %v5959_v14, %v5945_v55  ;;  %v863_v38 = vcombine.low %v710_v1, %v711_v19  ;;  %v864_v34 = vcombine.low %v712_v41, %v713_v27  ;;  %v865_v2 = vcombine.low %v714_v57, %v715_v9  ;;  %v6070_v10 = vld [vmem:[%s9008_s2 + $0x410] sm:$0xff]  ;;  %v6075_v1 = vld [vmem:[%s9008_s2 + $0x418] sm:$0xff]  ;;  %v6117_v40 = vld [vmem:[%s9008_s2 + $0x4a0] sm:$0xff] }
  0xa8   :  { %v9176_v58 = vpack.c.bf16 %v9174_v25, %v9175_v51  ;;  %4309 = vmatpush3.bf16.msra.mxu1 %v4308_v12  ;;  %v4314_v43 = vpack.c.bf16 %v5969_v24, %v5964_v37  ;;  %v6080_v19 = vld [vmem:[%s9008_s2 + $0x590] sm:$0xff]  ;;  %v1172_v45 = vor.u32 %v1171_v0, %v1170_v29  ;;  %v1175_v22 = vshll.u32 %v1174_v7, 23  ;;  %v6095_v24 = vld [vmem:[%s9008_s2 + $0x598] sm:$0xff]  ;;  %v6122_v33 = vld [vmem:[%s9008_s2 + $0x4a8] sm:$0xff] }
  0xa9   :  { %v9177_v12 = vld [vmem:[#allocation11_spill] sm:$0xff]  ;;  %4311 = vmatprep.subr.bf16.mxu1 %v4310_v26  ;;  %v6090_v37 = vsub.s32 6, %v9172_v15  ;;  %v4318_v26 = vpack.c.bf16 %v6002_v47, %v5997_v46  ;;  %v6127_v15 = vld [vmem:[%s9008_s2 + $0x420] sm:$0xff]  ;;  %v4350_v46 = vpack.c.bf16 %v6031_v60, %v6026_v59  ;;  %v6136_v47 = vld [vmem:[%s9008_s2 + $0x428] sm:$0xff] }
  0xaa   :  { %4277 = vmatpush3.bf16.msra.mxu0 %v9176_v58  ;;  %v872_v63 = vrot.slane %v862_v30, %v9177_v12  ;;  %v6100_v29 = vld [vmem:[%s9008_s2 + $0x510] sm:$0xff]  ;;  %v879_v8 = vrot.slane %v863_v38, %v9177_v12  ;;  %v886_v20 = vrot.slane %v864_v34, %v9177_v12  ;;  %v893_v53 = vrot.slane %v865_v2, %v9177_v12  ;;  %v6141_v27 = vld [vmem:[%s9008_s2 + $0x5a0] sm:$0xff]  ;;  %v6146_v57 = vld [vmem:[%s9008_s2 + $0x5a8] sm:$0xff] }
  0xab   :  { %4279 = vmatprep.subr.bf16.mxu0 %v4278_v52  ;;  %9178 = vst [vmem:[#allocation20_spill] sm:$0xff] %v6090_v37  ;;  %v4316_v52 = vpack.c.bf16 %v5989_v16, %v5984_v39  ;;  %v1176_v41 = vor.u32 4788187, %v1175_v22  ;;  %v1179_v39 = vcvt.s32.f32 %v1172_v45  ;;  %v6163_v30 = vld [vmem:[%s9008_s2 + $0x520] sm:$0xff]  ;;  %v6193_v38 = vld [vmem:[%s9008_s2 + $0x438] sm:$0xff]  ;;  %v6198_v34 = vld [vmem:[%s9008_s2 + $0x5b0] sm:$0xff] }
  0xac   :  { %v894_v0 = vcombine.low %v872_v63, %v879_v8  ;;  %v895_v7 = vcombine.low %v886_v20, %v893_v53  ;;  %4313 = vmatpush3.bf16.msra.mxu1 %v4312_v50  ;;  %v6188_v50 = vld [vmem:[%s9008_s2 + $0x430] sm:$0xff]  ;;  %v6226_v45 = vld [vmem:[%s9008_s2 + $0x4c0] sm:$0xff]  ;;  %v6231_v22 = vld [vmem:[%s9008_s2 + $0x4c8] sm:$0xff] }
  0xad   :  { %v1177_v3 = vand.u32 2147483647, %v1176_v41  ;;  %4315 = vmatprep.subr.bf16.mxu1 %v4314_v43  ;;  %9179 = vst [vmem:[#allocation19_spill] sm:$0xff] %v6226_v45  ;;  %9180 = vst [vmem:[#allocation18_spill] sm:$0xff] %v6231_v22  ;;  %v6236_v63 = vld [vmem:[%s9008_s2 + $0x440] sm:$0xff]  ;;  %v6241_v8 = vld [vmem:[%s9008_s2 + $0x448] sm:$0xff]  ;;  %v9201_v22 = vpack.c.bf16 %v6057_v28, %v6052_v31  ;;  %v9202_v45 = vpack.c.bf16 %v6095_v24, %v6080_v19 }
  0xae   :  { %4281 = vmatpush3.bf16.msra.mxu0 %v4280_v5  ;;  %v902_v2 = vrot.slane %v894_v0, %v9177_v12  ;;  %v909_v25 = vrot.slane %v895_v7, %v9177_v12  ;;  %9181 = vst [vmem:[#allocation23_spill] sm:$0xff] %v6236_v63  ;;  %9182 = vst [vmem:[#allocation22_spill] sm:$0xff] %v6241_v8  ;;  %v32_v53 = vld [vmem:[%s9007_s1 + $0x10] sm:$0xff]  ;;  %v6253_v43 = vld [vmem:[%s9008_s2 + $0x5c0] sm:$0xff]  ;;  %v9199_v63 = vpack.c.bf16 %v6021_v4, %v6016_v18 }
  0xaf   :  { %4283 = vmatprep.subr.bf16.mxu0 %v4282_v32  ;;  %v6213_v32 = vld [vmem:[%s9008_s2 + $0x538] sm:$0xff]  ;;  %v1180_v20 = vmul.f32 %v1179_v39, %v1177_v3  ;;  %v9183_v41 = vld [vmem:[#allocation31_spill] sm:$0xff]  ;;  %v6258_v58 = vld [vmem:[%s9008_s2 + $0x5c8] sm:$0xff]  ;;  %v9200_v8 = vpack.c.bf16 %v6047_v62, %v6042_v61 }
  0xb0   :  { %v2110_v0 = vrot.slane %v9183_v41, %v5992_v23  ;;  %v2118_v7 = vrot.slane %v9183_v41, %v6090_v37  ;;  %v6263_v39 = vld [vmem:[%s9008_s2 + $0x540] sm:$0xff]  ;;  %v6268_v3 = vld [vmem:[%s9008_s2 + $0x548] sm:$0xff]  ;;  %v9185_v41 = vld [vmem:[#allocation12_spill] sm:$0xff]  ;;  %v910_v51 = vcombine.low %v902_v2, %v909_v25  ;;  %4317 = vmatpush3.bf16.msra.mxu1 %v4316_v52  ;;  %v1183_v25 = vsub.s32 4, %v5813_v56 }
  0xb1   :  { %9184 = vst [vmem:[#allocation25_spill] sm:$0xff] %v6263_v39  ;;  %vm1099_vm12 = vcmp.lt.s32.totalorder %v9185_v41, 0  ;;  %v6279_v5 = vld [vmem:[%s9008_s2 + $0x4d0] sm:$0xff]  ;;  %v6284_v60 = vld [vmem:[%s9008_s2 + $0x4d8] sm:$0xff]  ;;  %v9188_v14 = vand.u32 2147483647, %v9185_v41  ;;  %4351 = vmatprep.subr.bf16.mxu1 %v4350_v46  ;;  %vm1189_vm15 = vweird.f32 %v9185_v41 }
  0xb2   :  { %4285 = vmatpush3.bf16.msra.mxu0 %v4284_v44  ;;  %v6289_v2 = vld [vmem:[%s9008_s2 + $0x450] sm:$0xff]  ;;  %v6294_v55 = vld [vmem:[%s9008_s2 + $0x458] sm:$0xff]  ;;  %v1181_v52 = vxor.u32 2147483648, %v1180_v20  ;;  %v6330_v59 = vld [vmem:[%s9008_s2 + $0x4e0] sm:$0xff]  ;;  %v6342_v23 = vadd.f32 %v910_v51, %v32_v53  ;;  %9196 = vst [vmem:[#allocation12_spill] sm:$0xff] %v6353_v17  ;;  %v1184_v62 = vsel %vm1099_vm12, %v1183_v25, %v5813_v56  ;;  %v9205_v44 = vpack.c.bf16 %v6075_v1, %v6070_v10 }
  0xb3   :  { %9186 = vst [vmem:[#allocation24_spill] sm:$0xff] %v6289_v2  ;;  %9187 = vst [vmem:[#allocation30_spill] sm:$0xff] %v6294_v55  ;;  %vm6298_vm13 = vcmp.le.f32.partialorder %v9188_v14, 0.7853982  ;;  %4319 = vmatprep.subr.bf16.mxu0 %v4318_v26  ;;  %v6310_v16 = vld [vmem:[%s9008_s2 + $0x5d0] sm:$0xff]  ;;  %v6315_v14 = vld [vmem:[%s9008_s2 + $0x5d8] sm:$0xff]  ;;  %2546 = vmatmul.mubr.f32.vlgmr.msra.gmra.mrb[2].mxu1 %v2118_v7 }
  0xb4   :  { %v6320_v26 = vld [vmem:[%s9008_s2 + $0x550] sm:$0xff]  ;;  %v6325_v46 = vld [vmem:[%s9008_s2 + $0x558] sm:$0xff]  ;;  %9192 = vst [vmem:[#allocation10_spill] sm:$0xff] %v6330_v59  ;;  %v6335_v9 = vld [vmem:[%s9008_s2 + $0x4e8] sm:$0xff]  ;;  %v1182_v53 = vsel %vm1099_vm12, %v1181_v52, %v1180_v20  ;;  %v1203_v54 = vand.u32 2139095040, %v6342_v23  ;;  %4353 = vmatpush3.bf16.msra.mxu1 %v9200_v8 }
  0xb5   :  { %9191 = vst [vmem:[#allocation29_spill] sm:$0xff] %v6320_v26  ;;  %9193 = vst [vmem:[#allocation28_spill] sm:$0xff] %v6335_v9  ;;  %v6340_v37 = vld [vmem:[%s9008_s2 + $0x460] sm:$0xff]  ;;  %v6363_v51 = vld [vmem:[%s9008_s2 + $0x5e8] sm:$0xff]  ;;  %2476 = vmatmul.mubr.f32.vlgmr.msra.gmra.mrb[2].mxu0 %v2110_v0  ;;  %v1185_v12 = vsel %vm6298_vm13, %v9185_v41, %v1182_v53  ;;  %4355 = vmatprep.subr.bf16.mxu1 %v9202_v45  ;;  %v9087_v2 = vand.u32 2147483647, %v6342_v23 }
  0xb6   :  { %9194 = vst [vmem:[#allocation26_spill] sm:$0xff] %v6340_v37  ;;  %9195 = vst [vmem:[#allocation31_spill] sm:$0xff] %v6342_v23  ;;  %v6374_v11 = vld [vmem:[%s9008_s2 + $0x560] sm:$0xff]  ;;  %v6384_v20 = vld [vmem:[%s9008_s2 + $0x4f0] sm:$0xff]  ;;  %4321 = vmatpush3.bf16.msra.mxu0 %v9199_v63  ;;  %4798 = vcosq.f32 %v1185_v12  ;;  %v1204_v45 = vshrl.u32 %v1203_v54, 23  ;;  %v9219_v23 = vpack.c.bf16 %v6178_v21, %v6173_v36 }
  0xb7   :  { %9198 = vst [vmem:[#allocation33_spill] sm:$0xff] %v6363_v51  ;;  %v6389_v0 = vld [vmem:[%s9008_s2 + $0x4f8] sm:$0xff]  ;;  %v6394_v7 = vld [vmem:[%s9008_s2 + $0x470] sm:$0xff]  ;;  %v6441_v63 = vld [vmem:[%s9008_s2 + $0x680] sm:$0xff]  ;;  %4323 = vmatprep.subr.bf16.mxu0 %v9201_v22  ;;  %4800 = vsinq.f32 %v1185_v12  ;;  %v1186_v22 = vsel %vm6298_vm13, 0, %v1184_v62  ;;  %v9206_v62 = vpack.c.bf16 %v6105_v35, %v6100_v29  ;;  %v9209_v29 = vpack.c.bf16 %v6122_v33, %v6117_v40 }
  0xb8   :  { %v6399_v52 = vld [vmem:[%s9008_s2 + $0x478] sm:$0xff]  ;;  %v6418_v53 = vld [vmem:[%s9008_s2 + $0x5f0] sm:$0xff]  ;;  %v6446_v8 = vld [vmem:[%s9008_s2 + $0x688] sm:$0xff]  ;;  %v3548_v6 = vadd.s32 4294967169, %v1204_v45  ;;  %v9210_v35 = vpack.c.bf16 %v6146_v57, %v6141_v27  ;;  %v1190_v57 = vand.u32 3, %v1186_v22  ;;  %v9218_v51 = vpack.c.bf16 %v6168_v49, %v6163_v30 }
  0xb9   :  { %v6423_v18 = vld [vmem:[%s9008_s2 + $0x5f8] sm:$0xff]  ;;  %v6428_v4 = vld [vmem:[%s9008_s2 + $0x570] sm:$0xff]  ;;  %v6461_v39 = vld [vmem:[%s9008_s2 + $0x600] sm:$0xff]  ;;  %4357 = vmatpush3.bf16.msra.mxu1 %v9206_v62  ;;  %v9223_v49 = vpack.c.bf16 %v6213_v32, %v6208_v42  ;;  %v9224_v30 = vmov 2475754826  }
  0xba   :  { %v6433_v61 = vld [vmem:[%s9008_s2 + $0x578] sm:$0xff]  ;;  %v6466_v31 = vld [vmem:[%s9008_s2 + $0x608] sm:$0xff]  ;;  %v6471_v28 = vld [vmem:[%s9008_s2 + $0x780] sm:$0xff]  ;;  %4325 = vmatpush3.bf16.msra.mxu0 %v9205_v44  ;;  %4359 = vmatprep.subr.bf16.mxu1 %v9210_v35  ;;  %v1210_v27 = vadd.s32 1, %v3548_v6  ;;  %v9217_v35 = vpack.c.bf16 %v6136_v47, %v6127_v15  ;;  %v9220_v15 = vpack.c.bf16 %v6203_v48, %v6198_v34  ;;  %vm1191_vm0 = vcmp.lt.s32.totalorder %v1190_v57, 2 }
  0xbb   :  { %v6476_v19 = vld [vmem:[%s9008_s2 + $0x788] sm:$0xff]  ;;  %v6481_v12 = vld [vmem:[%s9008_s2 + $0x700] sm:$0xff]  ;;  %v6499_v55 = vld [vmem:[%s9008_s2 + $0x690] sm:$0xff]  ;;  %4327 = vmatprep.subr.bf16.mxu0 %v9209_v29  ;;  %v6617_v29 = vand.u32 8388607, %v9087_v2  ;;  %vm1192_vm1 = vcmp.eq.s32.totalorder %v1190_v57, 0 }
  0xbc   :  { %9203 = vst [vmem:[#allocation34_spill] sm:$0xff] %v6481_v12  ;;  %v6486_v24 = vld [vmem:[%s9008_s2 + $0x708] sm:$0xff]  ;;  %v6504_v54 = vld [vmem:[%s9008_s2 + $0x698] sm:$0xff]  ;;  %v6509_v25 = vld [vmem:[%s9008_s2 + $0x610] sm:$0xff]  ;;  %vm1211_vm14 = vcmp.gt.s32.totalorder %v1210_v27, 0  ;;  %vm1195_vm2 = vcmp.eq.s32.totalorder %v1190_v57, 2 }
  0xbd   :  { %v6514_v56 = vld [vmem:[%s9008_s2 + $0x618] sm:$0xff]  ;;  %v6523_v37 = vld [vmem:[%s9008_s2 + $0x790] sm:$0xff]  ;;  %v6556_v10 = vld [vmem:[%s9008_s2 + $0x6a0] sm:$0xff]  ;;  %4361 = vmatpush3.bf16.msra.mxu1 %v9218_v51  ;;  %v1212_v2 = vsel %vm1211_vm14, %v1210_v27, 0  ;;  %v1208_v21 = vor.u32 8388608, %v6617_v29 }
  0xbe   :  { %v6528_v17 = vld [vmem:[%s9008_s2 + $0x798] sm:$0xff]  ;;  %v6533_v59 = vld [vmem:[%s9008_s2 + $0x710] sm:$0xff]  ;;  %9207 = vst [vmem:[#allocation36_spill] sm:$0xff] %v6556_v10  ;;  %v6561_v1 = vld [vmem:[%s9008_s2 + $0x6a8] sm:$0xff]  ;;  %4329 = vmatpush3.bf16.msra.mxu0 %v9217_v35  ;;  %4363 = vmatprep.subr.bf16.mxu1 %v9220_v15  ;;  %v1214_v51 = vand.u32 31, %v1212_v2  ;;  %v9222_v15 = vpack.c.bf16 %v6193_v38, %v6188_v50  ;;  %v6661_v38 = vshrl.u32 %v1212_v2, 5 }
  0xbf   :  { %9204 = vst [vmem:[#allocation35_spill] sm:$0xff] %v6533_v59  ;;  %v6551_v45 = vld [vmem:[%s9008_s2 + $0x718] sm:$0xff]  ;;  %9208 = vst [vmem:[#allocation37_spill] sm:$0xff] %v6561_v1  ;;  %v6578_v9 = vld [vmem:[%s9008_s2 + $0x620] sm:$0xff]  ;;  %4331 = vmatprep.subr.bf16.mxu0 %v9219_v23  ;;  %v9221_v48 = vmov 683565275  }
  0xc0   :  { %9211 = vst [vmem:[#allocation38_spill] sm:$0xff] %v6578_v9  ;;  %v6583_v40 = vld [vmem:[%s9008_s2 + $0x628] sm:$0xff]  ;;  %v6588_v33 = vld [vmem:[%s9008_s2 + $0x7a0] sm:$0xff]  ;;  %v4799_v35 = vpop.eup %4798  ;;  %v1215_v34 = vsub.s32 32, %v1214_v51  ;;  %v1217_v27 = vshll.u32 %v9221_v48, %v1214_v51  ;;  %v1220_v26 = vshll.u32 %v9224_v30, %v1214_v51  ;;  %v9225_v22 = vmov 2131351028  }
  0xc1   :  { %9212 = vst [vmem:[#allocation39_spill] sm:$0xff] %v6583_v40  ;;  %9213 = vst [vmem:[#allocation40_spill] sm:$0xff] %v6588_v33  ;;  %v6599_v62 = vld [vmem:[%s9008_s2 + $0x7a8] sm:$0xff]  ;;  %v6604_v44 = vld [vmem:[%s9008_s2 + $0x720] sm:$0xff]  ;;  %v4801_v23 = vpop.eup %4800  ;;  %v1196_v36 = vxor.u32 2147483648, %v4799_v35  ;;  %4365 = vmatpush3.bf16.msra.mxu1 %v9223_v49  ;;  %v1223_v12 = vshll.u32 %v9225_v22, %v1214_v51  ;;  %v9230_v33 = vpack.c.bf16 %v6258_v58, %v6253_v43  ;;  %vm1232_vm3 = vcmp.lt.s32.totalorder %v6661_v38, 1 }
  0xc2   :  { %9214 = vst [vmem:[#allocation41_spill] sm:$0xff] %v6599_v62  ;;  %9215 = vst [vmem:[#allocation42_spill] sm:$0xff] %v6604_v44  ;;  %v6609_v6 = vld [vmem:[%s9008_s2 + $0x728] sm:$0xff]  ;;  %4333 = vmatpush3.bf16.msra.mxu0 %v9222_v15  ;;  %v1193_v47 = vxor.u32 2147483648, %v4801_v23  ;;  %v9226_v44 = vmov 2102212464   ;;  %v1218_v42 = vshrl.u32 %v9224_v30, %v1215_v34  ;;  %v1221_v43 = vshrl.u32 %v9225_v22, %v1215_v34 }
  0xc3   :  { %9216 = vst [vmem:[#allocation43_spill] sm:$0xff] %v6609_v6  ;;  %v1226_v6 = vshll.u32 %v9226_v44, %v1214_v51  ;;  %v9227_v9 = vld [vmem:[#allocation18_spill] sm:$0xff]  ;;  %v9228_v29 = vld [vmem:[#allocation19_spill] sm:$0xff]  ;;  %4367 = vmatprep.subr.bf16.mxu1 %v9230_v33  ;;  %v1197_v50 = vsel %vm1195_vm2, %v1196_v36, %v4801_v23  ;;  %v9231_v32 = vmov 920167782   ;;  %v1224_v2 = vshrl.u32 %v9226_v44, %v1215_v34  ;;  %v9236_v44 = vld [vmem:[#allocation25_spill] sm:$0xff] }
  0xc4   :  { %v9229_v40 = vpack.c.bf16 %v9227_v9, %v9228_v29  ;;  %v1229_v49 = vshll.u32 %v9231_v32, %v1214_v51  ;;  %v1194_v15 = vsel %vm1192_vm1, %v4799_v35, %v1193_v47  ;;  %v6669_v62 = vld [vmem:[%s9008_s2 + $0x6b0] sm:$0xff]  ;;  %v6674_v9 = vld [vmem:[%s9008_s2 + $0x6b8] sm:$0xff]  ;;  %v1216_v23 = vshrl.u32 %v9221_v48, %v1215_v34  ;;  %v9266_v41 = vld [vmem:[#allocation17_spill] sm:$0xff] }
  0xc5   :  { %v6679_v58 = vld [vmem:[%s9008_s2 + $0x630] sm:$0xff]  ;;  %v1198_v33 = vsel %vm1191_vm0, %v1194_v15, %v1197_v50  ;;  %v6688_v47 = vld [vmem:[%s9008_s2 + $0x638] sm:$0xff]  ;;  %v1219_v36 = vor.u32 %v1218_v42, %v1217_v27  ;;  %v9232_v57 = vmov 1326507024   ;;  %v9233_v50 = vld [vmem:[#allocation22_spill] sm:$0xff]  ;;  %v9237_v22 = vpack.c.bf16 %v6268_v3, %v9236_v44 }
  0xc6   :  { %4335 = vmatprep.subr.bf16.mxu0 %v9229_v40  ;;  %v1227_v40 = vshrl.u32 %v9231_v32, %v1215_v34  ;;  %v6693_v51 = vld [vmem:[%s9008_s2 + $0x7b0] sm:$0xff]  ;;  %v6698_v35 = vld [vmem:[%s9008_s2 + $0x7b8] sm:$0xff]  ;;  %v1230_v29 = vshrl.u32 %v9232_v57, %v1215_v34  ;;  %v6710_v30 = vsel %vm1189_vm15, nan, %v1198_v33  ;;  %v1222_v10 = vor.u32 %v1221_v43, %v1220_v26  ;;  %v9240_v42 = vld [vmem:[#allocation13_spill] sm:$0xff] }
  0xc7   :  { %v9234_v15 = vld [vmem:[#allocation23_spill] sm:$0xff]  ;;  %4369 = vmatpush3.bf16.msra.mxu1 %v9237_v22  ;;  %v1225_v1 = vor.u32 %v1224_v2, %v1223_v12  ;;  %v9238_v27 = vpack.c.bf16 %v6284_v60, %v6279_v5  ;;  %v9239_v34 = vpack.c.bf16 %v6315_v14, %v6310_v16  ;;  %v6737_v5 = vld [vmem:[%s9008_s2 + $0x738] sm:$0xff]  ;;  %vm1234_vm4 = vcmp.lt.s32.totalorder %v6661_v38, 3  ;;  %v9242_v22 = vld [vmem:[#allocation30_spill] sm:$0xff] }
  0xc8   :  { %v9235_v32 = vpack.c.bf16 %v9233_v50, %v9234_v15  ;;  %v1228_v59 = vor.u32 %v1227_v40, %v1226_v6  ;;  %v9241_v3 = vld [vmem:[#allocation15_spill] sm:$0xff]  ;;  %v6740_v14 = vshll.u32 %v1208_v21, 8  ;;  %v1231_v12 = vor.u32 %v1230_v29, %v1229_v49  ;;  %v9243_v43 = vld [vmem:[#allocation24_spill] sm:$0xff]  ;;  %v9245_v40 = vld [vmem:[#allocation29_spill] sm:$0xff] }
  0xc9   :  { %4371 = vmatprep.subr.bf16.mxu1 %v9239_v34  ;;  %v2138_v44 = vrot.slane %v6710_v30, %v9241_v3  ;;  %v6732_v16 = vld [vmem:[%s9008_s2 + $0x730] sm:$0xff]  ;;  %vm1233_vm5 = vcmp.lt.s32.totalorder %v6661_v38, 2  ;;  %vm1235_vm6 = vcmp.lt.s32.totalorder %v6661_v38, 4  ;;  %v1236_v6 = vsel %vm1232_vm3, %v1216_v23, %v1219_v36  ;;  %v9247_v50 = vld [vmem:[#allocation28_spill] sm:$0xff]  ;;  %v9248_v15 = vld [vmem:[#allocation10_spill] sm:$0xff] }
  0xca   :  { %4337 = vmatpush3.bf16.msra.mxu0 %v9235_v32  ;;  %v2130_v32 = vrot.slane %v6710_v30, %v9240_v42  ;;  %v9244_v2 = vpack.c.bf16 %v9242_v22, %v9243_v43  ;;  %v9246_v33 = vpack.c.bf16 %v6325_v46, %v9245_v40  ;;  %v1237_v21 = vsel %vm1235_vm6, %v1225_v1, 2102212464  ;;  %v9250_v34 = vld [vmem:[#allocation33_spill] sm:$0xff]  ;;  %v6776_v22 = vld [vmem:[%s9008_s2 + $0x6c8] sm:$0xff]  ;;  %v9254_v26 = vld [vmem:[#allocation12_spill] sm:$0xff] }
  0xcb   :  { %4339 = vmatprep.subr.bf16.mxu0 %v9238_v27  ;;  %2685 = vmatprep.mubr.f32.mxu1 %v2138_v44  ;;  %v1240_v49 = vsel %vm1232_vm3, %v1219_v36, %v1222_v10  ;;  %v1241_v29 = vsel %vm1235_vm6, %v1228_v59, 920167782  ;;  %v1244_v23 = vsel %vm1232_vm3, %v1222_v10, %v1225_v1  ;;  %v9249_v27 = vpack.c.bf16 %v9247_v50, %v9248_v15  ;;  %v6771_v36 = vld [vmem:[%s9008_s2 + $0x6c0] sm:$0xff]  ;;  %v6792_v50 = vld [vmem:[%s9008_s2 + $0x648] sm:$0xff] }
  0xcc   :  { %2615 = vmatprep.mubr.f32.mxu0 %v2130_v32  ;;  %4373 = vmatpush3.bf16.msra.mxu1 %v9246_v33  ;;  %v9251_v32 = vld [vmem:[#allocation32_spill] sm:$0xff]  ;;  %v6781_v43 = vld [vmem:[%s9008_s2 + $0x640] sm:$0xff]  ;;  %v1242_v40 = vsel %vm1234_vm4, %v1225_v1, %v1241_v29  ;;  %v1245_v33 = vsel %vm1235_vm6, %v1231_v12, 1326507024 }
  0xcd   :  { %v9252_v46 = vpack.c.bf16 %v9250_v34, %v9251_v32  ;;  %v6797_v15 = vld [vmem:[%s9008_s2 + $0x7c0] sm:$0xff]  ;;  %v1243_v1 = vsel %vm1233_vm5, %v1240_v49, %v1242_v40  ;;  %v1246_v12 = vsel %vm1234_vm4, %v1228_v59, %v1245_v33  ;;  %v9255_v49 = vld [vmem:[#allocation26_spill] sm:$0xff]  ;;  %v9257_v59 = vpack.c.bf16 %v6379_v13, %v6374_v11  ;;  %v6884_v13 = vld [vmem:[%s9008_s2 + $0x650] sm:$0xff] }
  0xce   :  { %4341 = vmatpush3.bf16.msra.mxu0 %v9244_v2  ;;  %v1238_v2 = vsel %vm1234_vm4, %v1222_v10, %v1237_v21  ;;  %v6802_v10 = vld [vmem:[%s9008_s2 + $0x7c8] sm:$0xff]  ;;  %v9253_v21 = vld [vmem:[#allocation5_spill] sm:$0xff]  ;;  %v1247_v32 = vsel %vm1233_vm5, %v1244_v23, %v1246_v12  ;;  %v9256_v40 = vpack.c.bf16 %v9254_v26, %v9255_v49  ;;  %v9258_v23 = vpack.c.bf16 %v6389_v0, %v6384_v20  ;;  %v9261_v49 = vld [vmem:[#allocation16_spill] sm:$0xff] }
  0xcf   :  { %4343 = vmatprep.subr.bf16.mxu0 %v9249_v27  ;;  %4375 = vmatprep.subr.bf16.mxu1 %v9252_v46  ;;  %v60_v29 = vadd.s32 3072, %v9253_v21  ;;  %v61_v27 = vadd.s32 3200, %v9253_v21  ;;  %v1239_v34 = vsel %vm1233_vm5, %v1236_v6, %v1238_v2  ;;  %v62_v38 = vadd.s32 3328, %v9253_v21  ;;  %v6879_v2 = vld [vmem:[%s9008_s2 + $0x6d8] sm:$0xff] }
  0xd0   :  { %v6815_v46 = vmul.u32.u64.low %v6740_v14, %v1243_v1  ;;  %v6816_v44 = vmul.u32.u64.high %v6740_v14, %v1243_v1, %v6815_v46  ;;  %4377 = vmatpush3.bf16.msra.mxu1 %v9257_v59  ;;  %v6826_v33 = vmul.u32.u64.low %v6740_v14, %v1247_v32  ;;  %v6827_v60 = vmul.u32.u64.high %v6740_v14, %v1247_v32, %v6826_v33  ;;  %v6855_v59 = vld [vmem:[%s9008_s2 + $0x740] sm:$0xff] }
  0xd1   :  { %v63_v6 = vadd.s32 3456, %v9253_v21  ;;  %v9259_v26 = vpack.c.bf16 %v6423_v18, %v6418_v53  ;;  %v64_v1 = vadd.s32 3584, %v9253_v21  ;;  %v1255_v12 = vmul.u32 %v6740_v14, %v1239_v34  ;;  %v9260_v18 = vld [vmem:[#allocation14_spill] sm:$0xff]  ;;  %v6865_v34 = vld [vmem:[%s9008_s2 + $0x6d0] sm:$0xff] }
  0xd2   :  { %4345 = vmatpush3.bf16.msra.mxu0 %v9256_v40  ;;  %v65_v20 = vadd.s32 3712, %v9253_v21  ;;  %v66_v0 = vadd.s32 3840, %v9253_v21  ;;  %v67_v53 = vadd.s32 3968, %v9253_v21  ;;  %v2126_v32 = vrot.slane %v6710_v30, %v9260_v18  ;;  %v6860_v14 = vld [vmem:[%s9008_s2 + $0x748] sm:$0xff] }
  0xd3   :  { %4347 = vmatprep.subr.bf16.mxu0 %v9258_v23  ;;  %4379 = vmatprep.subr.bf16.mxu1 %v9259_v26  ;;  %v2134_v40 = vrot.slane %v6710_v30, %v9261_v49  ;;  %v1258_v33 = vadd.s32 1, %v6816_v44  ;;  %v6868_v23 = vand.u32 3, %v60_v29  ;;  %v9262_v26 = vpack.c.bf16 %v6399_v52, %v6394_v7  ;;  %v6889_v29 = vld [vmem:[%s9008_s2 + $0x658] sm:$0xff] }
  0xd4   :  { %v9263_v11 = vpack.c.bf16 %v6433_v61, %v6428_v4  ;;  %vm1257_vm7 = vc.u32 %v6827_v60, %v6815_v46  ;;  %v6893_v7 = vand.u32 3, %v61_v27  ;;  %v6895_v52 = vand.u32 3, %v62_v38  ;;  %v9267_v38 = vld [vmem:[#allocation27_spill] sm:$0xff] }
  0xd5   :  { %v6897_v4 = vand.u32 3, %v63_v6  ;;  %v9264_v61 = vpack.c.bf16 %v6446_v8, %v6441_v63  ;;  %v2146_v27 = vrot.slane %v6710_v30, %v9266_v41  ;;  %v2154_v6 = vrot.slane %v6710_v30, %v9267_v38  ;;  %v6920_v63 = vld [vmem:[%s9008_s2 + $0x7d8] sm:$0xff]  ;;  %v6925_v8 = vld [vmem:[%s9008_s2 + $0x750] sm:$0xff]  ;;  %v9289_v38 = vld [vmem:[#allocation42_spill] sm:$0xff] }
  0xd6   :  { %4349 = vmatpush3.bf16.msra.mxu0 %v9262_v26  ;;  %4381 = vmatpush3.bf16.msra.mxu1 %v9263_v11  ;;  %v9265_v11 = vpack.c.bf16 %v6476_v19, %v6471_v28  ;;  %v6908_v26 = vld [vmem:[%s9008_s2 + $0x7d0] sm:$0xff]  ;;  %v1259_v49 = vsel %vm1257_vm7, %v1258_v33, %v6816_v44  ;;  %v6915_v18 = vand.u32 3, %v64_v1  ;;  %v6930_v28 = vld [vmem:[%s9008_s2 + $0x758] sm:$0xff]  ;;  %v6934_v44 = vand.u32 3, %v66_v0 }
  0xd7   :  { %4383 = vmatprep.subr.bf16.mxu0 %v9264_v61  ;;  %v1260_v19 = vadd.s32 %v1259_v49, %v1255_v12  ;;  %v6932_v61 = vand.u32 3, %v65_v20  ;;  %v6936_v1 = vand.u32 3, %v67_v53  ;;  %v9268_v12 = vpack.c.bf16 %v6466_v31, %v6461_v39  ;;  %v9269_v20 = vld [vmem:[#allocation34_spill] sm:$0xff] }
  0xd8   :  { %4415 = vmatprep.subr.bf16.mxu1 %v9265_v11  ;;  %v9270_v0 = vpack.c.bf16 %v6486_v24, %v9269_v20  ;;  %vm530_vm8 = vcmp.eq.s32.totalorder %v6868_v23, 2  ;;  %vm531_vm9 = vcmp.eq.s32.totalorder %v6893_v7, 2  ;;  %vm532_vm10 = vcmp.eq.s32.totalorder %v6895_v52, 2 }
  0xd9   :  { %2616 = vmatmul.mubr.f32.vlgmr.msra.gmra.mrb[4].mxu0 %v2126_v32  ;;  %2686 = vmatmul.mubr.f32.vlgmr.msra.gmra.mrb[4].mxu1 %v2134_v40  ;;  %v1261_v53 = vadd.s32 536870912, %v1260_v19  ;;  %v9271_v32 = vpack.c.bf16 %v6504_v54, %v6499_v55  ;;  %v9272_v49 = vpack.c.bf16 %v6528_v17, %v6523_v37  ;;  %vm533_vm11 = vcmp.eq.s32.totalorder %v6897_v4, 2  ;;  %v9273_v17 = vld [vmem:[#allocation6_spill] sm:$0xff]  ;;  %v9274_v37 = vld [vmem:[#allocation7_spill] sm:$0xff] }
  0xda   :  { %4385 = vmatpush3.bf16.msra.mxu0 %v9268_v12  ;;  %4417 = vmatpush3.bf16.msra.mxu1 %v9270_v0  ;;  %vm534_vm12 = vcmp.eq.s32.totalorder %v6915_v18, 2  ;;  %vm535_vm13 = vcmp.eq.s32.totalorder %v6932_v61, 2  ;;  %vm536_vm14 = vcmp.eq.s32.totalorder %v6934_v44, 2  ;;  %vm537_vm15 = vcmp.eq.s32.totalorder %v6936_v1, 2 }
  0xdb   :  { %4387 = vmatprep.subr.bf16.mxu0 %v9271_v32  ;;  %4419 = vmatprep.subr.bf16.mxu1 %v9272_v49  ;;  %v6965_v24 = vshrl.u32 %v1261_v53, 30  ;;  %v568_v55 = vsel %vm530_vm8, %v9274_v37, %v9273_v17  ;;  %v569_v54 = vsel %vm531_vm9, %v9274_v37, %v9273_v17  ;;  %v570_v40 = vsel %vm532_vm10, %v9274_v37, %v9273_v17  ;;  %v9278_v32 = vld [vmem:[#allocation37_spill] sm:$0xff]  ;;  %v9279_v49 = vld [vmem:[#allocation36_spill] sm:$0xff] }
  0xdc   :  { %2755 = vmatprep.mubr.f32.mxu0 %v2146_v27  ;;  %2825 = vmatprep.mubr.f32.mxu1 %v2154_v6  ;;  %vm604_vm0 = vcmp.eq.s32.totalorder %v6868_v23, 1  ;;  %v9275_v27 = vpack.c.bf16 %v6514_v56, %v6509_v25  ;;  %v9276_v6 = vld [vmem:[#allocation35_spill] sm:$0xff]  ;;  %v571_v0 = vsel %vm533_vm11, %v9274_v37, %v9273_v17  ;;  %v572_v53 = vsel %vm534_vm12, %v9274_v37, %v9273_v17  ;;  %v9281_v56 = vld [vmem:[#allocation41_spill] sm:$0xff]  ;;  %v9282_v25 = vld [vmem:[#allocation40_spill] sm:$0xff] }
  0xdd   :  { %v9277_v12 = vpack.c.bf16 %v6551_v45, %v9276_v6  ;;  %v1263_v20 = vshll.u32 %v6965_v24, 30  ;;  %vm605_vm1 = vcmp.eq.s32.totalorder %v6893_v7, 1  ;;  %v9280_v31 = vpack.c.bf16 %v9278_v32, %v9279_v49  ;;  %v9284_v32 = vld [vmem:[#allocation8_spill] sm:$0xff]  ;;  %v9285_v49 = vld [vmem:[#allocation39_spill] sm:$0xff] }
  0xde   :  { %4389 = vmatpush3.bf16.msra.mxu0 %v9275_v27  ;;  %v9283_v27 = vpack.c.bf16 %v9281_v56, %v9282_v25  ;;  %v573_v45 = vsel %vm535_vm13, %v9274_v37, %v9273_v17  ;;  %vm606_vm2 = vcmp.eq.s32.totalorder %v6895_v52, 1  ;;  %vm607_vm3 = vcmp.eq.s32.totalorder %v6897_v4, 1  ;;  %v9286_v56 = vld [vmem:[#allocation38_spill] sm:$0xff] }
  0xdf   :  { %4421 = vmatpush3.bf16.msra.mxu1 %v9277_v12  ;;  %4391 = vmatprep.subr.bf16.mxu0 %v9280_v31  ;;  %vm608_vm4 = vcmp.eq.s32.totalorder %v6915_v18, 1  ;;  %v7000_v6 = vsub.s32 %v1260_v19, %v1263_v20  ;;  %v574_v31 = vsel %vm536_vm14, %v9274_v37, %v9273_v17  ;;  %v575_v12 = vsel %vm537_vm15, %v9274_v37, %v9273_v17 }
  0xe0   :  { %4423 = vmatprep.subr.bf16.mxu1 %v9283_v27  ;;  %vm609_vm5 = vcmp.eq.s32.totalorder %v6932_v61, 1  ;;  %vm610_vm6 = vcmp.eq.s32.totalorder %v6934_v44, 1  ;;  %vm611_vm7 = vcmp.eq.s32.totalorder %v6936_v1, 1  ;;  %v642_v19 = vsel %vm604_vm0, %v9284_v32, %v568_v55  ;;  %v9288_v27 = vld [vmem:[#allocation43_spill] sm:$0xff] }
  0xe1   :  { %v643_v20 = vsel %vm605_vm1, %v9284_v32, %v569_v54  ;;  %v9287_v25 = vpack.c.bf16 %v9285_v49, %v9286_v56  ;;  %v9290_v39 = vpack.c.bf16 %v9288_v27, %v9289_v38  ;;  %v1266_v11 = vsub.s32 0, %v7000_v6  ;;  %v7128_v56 = vld [vmem:[%s9008_s2 + $0x6f0] sm:$0xff]  ;;  %v7142_v27 = vld [vmem:[%s9008_s2 + $0x6f8] sm:$0xff] }
  0xe2   :  { %v644_v33 = vsel %vm606_vm2, %v9284_v32, %v570_v40  ;;  %v645_v37 = vsel %vm607_vm3, %v9284_v32, %v571_v0  ;;  %v646_v17 = vsel %vm608_vm4, %v9284_v32, %v572_v53  ;;  %v9291_v55 = vpack.c.bf16 %v6674_v9, %v6669_v62  ;;  %v9295_v0 = vld [vmem:[#allocation9_spill] sm:$0xff] }
  0xe3   :  { %4393 = vmatpush3.bf16.msra.mxu0 %v9287_v25  ;;  %4425 = vmatpush3.bf16.msra.mxu1 %v9290_v39  ;;  %v9292_v54 = vpack.c.bf16 %v6698_v35, %v6693_v51  ;;  %v647_v49 = vsel %vm609_vm5, %v9284_v32, %v573_v45  ;;  %vm678_vm8 = vcmp.eq.s32.totalorder %v6868_v23, 0  ;;  %vm679_vm9 = vcmp.eq.s32.totalorder %v6893_v7, 0  ;;  %v7058_v35 = vld [vmem:[%s9008_s2 + $0x6e0] sm:$0xff]  ;;  %v1762_v7 = vld [vmem:[%s9008_s2 + $0x7e8] sm:$0xff] }
  0xe4   :  { %4395 = vmatprep.subr.bf16.mxu0 %v9291_v55  ;;  %vm680_vm10 = vcmp.eq.s32.totalorder %v6895_v52, 0  ;;  %v3549_v38 = vmin.u32 %v1266_v11, %v7000_v6  ;;  %v648_v39 = vsel %vm610_vm6, %v9284_v32, %v574_v31  ;;  %v649_v62 = vsel %vm611_vm7, %v9284_v32, %v575_v12  ;;  %v7063_v11 = vld [vmem:[%s9008_s2 + $0x6e8] sm:$0xff]  ;;  %v1761_v23 = vld [vmem:[%s9008_s2 + $0x7e0] sm:$0xff]  ;;  %v7158_v55 = vld [vmem:[%s9008_s2 + $0x670] sm:$0xff] }
  0xe5   :  { %4427 = vmatprep.subr.bf16.mxu1 %v9292_v54  ;;  %vm681_vm11 = vcmp.eq.s32.totalorder %v6897_v4, 0  ;;  %vm682_vm12 = vcmp.eq.s32.totalorder %v6915_v18, 0  ;;  %vm683_vm13 = vcmp.eq.s32.totalorder %v6932_v61, 0  ;;  %vm684_vm14 = vcmp.eq.s32.totalorder %v6934_v44, 0  ;;  %v7106_v18 = vld [vmem:[%s9008_s2 + $0x660] sm:$0xff]  ;;  %v7111_v61 = vld [vmem:[%s9008_s2 + $0x668] sm:$0xff] }
  0xe6   :  { %vm685_vm15 = vcmp.eq.s32.totalorder %v6936_v1, 0  ;;  %v9293_v9 = vpack.c.bf16 %v6688_v47, %v6679_v58  ;;  %v9294_v51 = vpack.c.bf16 %v6737_v5, %v6732_v16  ;;  %v1268_v40 = vclz %v3549_v38  ;;  %v7163_v54 = vld [vmem:[%s9008_s2 + $0x678] sm:$0xff] }
  0xe7   :  { %v716_v58 = vsel %vm678_vm8, %v9295_v0, %v642_v19  ;;  %v717_v47 = vsel %vm679_vm9, %v9295_v0, %v643_v20  ;;  %v718_v16 = vsel %vm680_vm10, %v9295_v0, %v644_v33  ;;  %v9296_v5 = vpack.c.bf16 %v6776_v22, %v6771_v36  ;;  %v1745_v19 = vld [vmem:[%s9008_s2 + $0x760] sm:$0xff]  ;;  %v1746_v20 = vld [vmem:[%s9008_s2 + $0x768] sm:$0xff]  ;;  %v7173_v38 = vld [vmem:[%s9008_s2 + $0x778] sm:$0xff] }
  0xe8   :  { %4397 = vmatpush3.bf16.msra.mxu0 %v9293_v9  ;;  %4429 = vmatpush3.bf16.msra.mxu1 %v9294_v51  ;;  %v9297_v53 = vpack.c.bf16 %v6802_v10, %v6797_v15  ;;  %v719_v52 = vsel %vm681_vm11, %v9295_v0, %v645_v37  ;;  %v720_v36 = vsel %vm682_vm12, %v9295_v0, %v646_v17  ;;  %v3550_v15 = vadd.s32 4294967294, %v1268_v40  ;;  %v7191_v40 = vld [vmem:[%s9008_s2 + $0x800] sm:$0xff] }
  0xe9   :  { %4399 = vmatprep.subr.bf16.mxu0 %v9296_v5  ;;  %v721_v22 = vsel %vm683_vm13, %v9295_v0, %v647_v49  ;;  %v722_v10 = vsel %vm684_vm14, %v9295_v0, %v648_v39  ;;  %v723_v33 = vsel %vm685_vm15, %v9295_v0, %v649_v62  ;;  %v911_v45 = vcombine.low %v716_v58, %v717_v47  ;;  %v7168_v49 = vld [vmem:[%s9008_s2 + $0x770] sm:$0xff]  ;;  %v7178_v39 = vld [vmem:[%s9008_s2 + $0x880] sm:$0xff]  ;;  %v7196_v58 = vld [vmem:[%s9008_s2 + $0x808] sm:$0xff] }
  0xea   :  { %4431 = vmatprep.subr.bf16.mxu1 %v9297_v53  ;;  %v4406_v4 = vpack.c.bf16 %v7063_v11, %v7058_v35  ;;  %v912_v44 = vcombine.low %v718_v16, %v719_v52  ;;  %v913_v17 = vcombine.low %v720_v36, %v721_v22  ;;  %v914_v37 = vcombine.low %v722_v10, %v723_v33  ;;  %v7186_v11 = vld [vmem:[%s9008_s2 + $0x888] sm:$0xff]  ;;  %v7230_v22 = vld [vmem:[%s9008_s2 + $0x890] sm:$0xff] }
  0xeb   :  { %v9298_v1 = vpack.c.bf16 %v6792_v50, %v6781_v43  ;;  %v9299_v31 = vpack.c.bf16 %v6860_v14, %v6855_v59  ;;  %v4438_v12 = vpack.c.bf16 %v1762_v7, %v1761_v23  ;;  %v1256_v43 = vadd.s32 %v6815_v46, %v6827_v60  ;;  %v9300_v50 = vld [vmem:[#allocation11_spill] sm:$0xff]  ;;  %v1764_v46 = vld [vmem:[%s9008_s2 + $0x7f8] sm:$0xff]  ;;  %v7209_v7 = vld [vmem:[%s9008_s2 + $0x980] sm:$0xff] }
  0xec   :  { %vm3551_vm0 = vcmp.lt.s32.totalorder %v3550_v15, 0  ;;  %v921_v59 = vrot.slane %v911_v45, %v9300_v50  ;;  %v9301_v14 = vpack.c.bf16 %v6879_v2, %v6865_v34  ;;  %v9302_v25 = vpack.c.bf16 %v6920_v63, %v6908_v26  ;;  %v7147_v60 = vld [vmem:[%s9008_s2 + $0x7f0] sm:$0xff]  ;;  %v7214_v52 = vld [vmem:[%s9008_s2 + $0x988] sm:$0xff] }
  0xed   :  { %4401 = vmatpush3.bf16.msra.mxu0 %v9298_v1  ;;  %4433 = vmatpush3.bf16.msra.mxu1 %v9299_v31  ;;  %v1271_v2 = vsel %vm3551_vm0, 0, %v3550_v15  ;;  %v928_v34 = vrot.slane %v912_v44, %v9300_v50  ;;  %v935_v26 = vrot.slane %v913_v17, %v9300_v50  ;;  %v942_v63 = vrot.slane %v914_v37, %v9300_v50  ;;  %v7235_v15 = vld [vmem:[%s9008_s2 + $0x898] sm:$0xff]  ;;  %v7240_v10 = vld [vmem:[%s9008_s2 + $0x810] sm:$0xff] }
  0xee   :  { %4403 = vmatprep.subr.bf16.mxu0 %v9301_v14  ;;  %4435 = vmatprep.subr.bf16.mxu1 %v9302_v25  ;;  %v1272_v62 = vsub.s32 32, %v1271_v2  ;;  %v1273_v9 = vshll.u32 %v7000_v6, %v1271_v2  ;;  %v1276_v51 = vsub.s32 4294967266, %v1271_v2  ;;  %v4408_v35 = vpack.c.bf16 %v7111_v61, %v7106_v18  ;;  %v7252_v18 = vld [vmem:[%s9008_s2 + $0x990] sm:$0xff]  ;;  %v33_v17 = vld [vmem:[%s9007_s1 + $0x18] sm:$0xff]  ;;  %v7288_v14 = vld [vmem:[%s9008_s2 + $0x8a8] sm:$0xff] }
  0xef   :  { %v943_v6 = vcombine.low %v921_v59, %v928_v34  ;;  %v944_v47 = vcombine.low %v935_v26, %v942_v63  ;;  %v9303_v16 = vpack.c.bf16 %v6889_v29, %v6884_v13  ;;  %v9304_v5 = vpack.c.bf16 %v6930_v28, %v6925_v8  ;;  %v7219_v13 = vld [vmem:[%s9008_s2 + $0x900] sm:$0xff]  ;;  %v7224_v29 = vld [vmem:[%s9008_s2 + $0x908] sm:$0xff] }
  0xf0   :  { %v4440_v53 = vpack.c.bf16 %v1746_v20, %v1745_v19  ;;  %v4410_v23 = vpack.c.bf16 %v7142_v27, %v7128_v56  ;;  %v1274_v8 = vshrl.u32 %v1256_v43, %v1272_v62  ;;  %v1277_v28 = vadd.s32 127, %v1276_v51  ;;  %v7271_v19 = vld [vmem:[%s9008_s2 + $0x910] sm:$0xff]  ;;  %v7276_v20 = vld [vmem:[%s9008_s2 + $0x918] sm:$0xff]  ;;  %v7283_v59 = vld [vmem:[%s9008_s2 + $0x8a0] sm:$0xff] }
  0xf1   :  { %4405 = vmatpush3.bf16.msra.mxu0 %v9303_v16  ;;  %4437 = vmatpush3.bf16.msra.mxu1 %v9304_v5  ;;  %v4442_v36 = vpack.c.bf16 %v1764_v46, %v7147_v60  ;;  %v951_v33 = vrot.slane %v943_v6, %v9300_v50  ;;  %v958_v45 = vrot.slane %v944_v47, %v9300_v50  ;;  %v7293_v25 = vld [vmem:[%s9008_s2 + $0x820] sm:$0xff]  ;;  %v7298_v27 = vld [vmem:[%s9008_s2 + $0x828] sm:$0xff]  ;;  %v1286_v26 = vsub.s32 4, %v6965_v24  ;;  %v7351_v6 = vld [vmem:[%s9008_s2 + $0x838] sm:$0xff] }
  0xf2   :  { %4407 = vmatprep.subr.bf16.mxu0 %v4406_v4  ;;  %4439 = vmatprep.subr.bf16.mxu1 %v4438_v12  ;;  %v7247_v4 = vld [vmem:[%s9008_s2 + $0x818] sm:$0xff]  ;;  %v1275_v61 = vor.u32 %v1274_v8, %v1273_v9  ;;  %v1278_v44 = vshll.u32 %v1277_v28, 23  ;;  %v4412_v37 = vpack.c.bf16 %v7163_v54, %v7158_v55  ;;  %v4444_v1 = vpack.c.bf16 %v7173_v38, %v7168_v49  ;;  %v7303_v60 = vld [vmem:[%s9008_s2 + $0x9a0] sm:$0xff]  ;;  %v7308_v46 = vld [vmem:[%s9008_s2 + $0x9a8] sm:$0xff] }
  0xf3   :  { %v4446_v31 = vpack.c.bf16 %v7186_v11, %v7178_v39  ;;  %v7266_v12 = vld [vmem:[%s9008_s2 + $0x998] sm:$0xff]  ;;  %v959_v56 = vcombine.low %v951_v33, %v958_v45  ;;  %v4448_v43 = vpack.c.bf16 %v7196_v58, %v7191_v40  ;;  %v4478_v63 = vpack.c.bf16 %v7214_v52, %v7209_v7  ;;  %v7318_v54 = vld [vmem:[%s9008_s2 + $0x920] sm:$0xff]  ;;  %v7323_v49 = vld [vmem:[%s9008_s2 + $0x928] sm:$0xff] }
  0xf4   :  { %v1279_v2 = vor.u32 4788187, %v1278_v44  ;;  %v1282_v34 = vcvt.s32.f32 %v1275_v61  ;;  %v4480_v55 = vpack.c.bf16 %v7224_v29, %v7219_v13  ;;  %v7328_v38 = vld [vmem:[%s9008_s2 + $0x8b0] sm:$0xff]  ;;  %v7333_v39 = vld [vmem:[%s9008_s2 + $0x8b8] sm:$0xff]  ;;  %v4450_v9 = vpack.c.bf16 %v7235_v15, %v7230_v22  ;;  %v9306_v5 = vld [vmem:[#allocation21_spill] sm:$0xff] }
  0xf5   :  { %4409 = vmatpush3.bf16.msra.mxu0 %v4408_v35  ;;  %4441 = vmatpush3.bf16.msra.mxu1 %v4440_v53  ;;  %v7335_v62 = vadd.f32 %v959_v56, %v33_v17  ;;  %v4452_v51 = vpack.c.bf16 %v7247_v4, %v7240_v10  ;;  %v4482_v35 = vpack.c.bf16 %v7266_v12, %v7252_v18  ;;  %v7346_v11 = vld [vmem:[%s9008_s2 + $0x830] sm:$0xff]  ;;  %v7365_v52 = vld [vmem:[%s9008_s2 + $0x9b8] sm:$0xff]  ;;  %v7389_v22 = vld [vmem:[%s9008_s2 + $0x8c8] sm:$0xff] }
  0xf6   :  { %4411 = vmatprep.subr.bf16.mxu0 %v4410_v23  ;;  %4443 = vmatprep.subr.bf16.mxu1 %v4442_v36  ;;  %v7356_v47 = vld [vmem:[%s9008_s2 + $0x9b0] sm:$0xff]  ;;  %v1280_v16 = vand.u32 2147483647, %v1279_v2  ;;  %v2142_v53 = vrot.slane %v6710_v30, %v9306_v5  ;;  %v9307_v23 = vld [vmem:[#allocation20_spill] sm:$0xff]  ;;  %v7384_v36 = vld [vmem:[%s9008_s2 + $0x8c0] sm:$0xff]  ;;  %v4454_v18 = vpack.c.bf16 %v7288_v14, %v7283_v59  ;;  %v4456_v61 = vpack.c.bf16 %v7298_v27, %v7293_v25 }
  0xf7   :  { %9305 = vst [vmem:[#allocation18_spill] sm:$0xff] %v7335_v62  ;;  %v2150_v7 = vrot.slane %v6710_v30, %v9307_v23  ;;  %v7370_v13 = vld [vmem:[%s9008_s2 + $0x930] sm:$0xff]  ;;  %v7375_v29 = vld [vmem:[%s9008_s2 + $0x938] sm:$0xff]  ;;  %v1306_v28 = vand.u32 2139095040, %v7335_v62  ;;  %v4484_v30 = vpack.c.bf16 %v7276_v20, %v7271_v19  ;;  %v7394_v15 = vld [vmem:[%s9008_s2 + $0x840] sm:$0xff]  ;;  %v4486_v44 = vpack.c.bf16 %v7308_v46, %v7303_v60 }
  0xf8   :  { %v9308_v8 = vld [vmem:[#allocation31_spill] sm:$0xff]  ;;  %v1283_v33 = vmul.f32 %v1282_v34, %v1280_v16  ;;  %v7408_v17 = vld [vmem:[%s9008_s2 + $0x848] sm:$0xff]  ;;  %v7427_v19 = vld [vmem:[%s9008_s2 + $0x940] sm:$0xff]  ;;  %v7586_v5 = vadd.s32 4096, %v9253_v21  ;;  %v9318_v25 = vpack.c.bf16 %v7365_v52, %v7356_v47  ;;  %v7603_v47 = vadd.s32 4224, %v9253_v21 }
  0xf9   :  { %vm1202_vm1 = vcmp.lt.s32.totalorder %v9308_v8, 0  ;;  %4413 = vmatpush3.bf16.msra.mxu0 %v4412_v37  ;;  %4445 = vmatpush3.bf16.msra.mxu1 %v4444_v1  ;;  %v7418_v37 = vld [vmem:[%s9008_s2 + $0x9c8] sm:$0xff]  ;;  %v1307_v1 = vshrl.u32 %v1306_v28, 23  ;;  %v7437_v56 = vld [vmem:[%s9008_s2 + $0x8d0] sm:$0xff]  ;;  %v9309_v59 = vand.u32 2147483647, %v9308_v8  ;;  %vm1292_vm6 = vweird.f32 %v9308_v8 }
  0xfa   :  { %v1287_v45 = vsel %vm1202_vm1, %v1286_v26, %v6965_v24  ;;  %4447 = vmatprep.subr.bf16.mxu0 %v4446_v31  ;;  %4479 = vmatprep.subr.bf16.mxu1 %v4478_v63  ;;  %v7413_v24 = vld [vmem:[%s9008_s2 + $0x9c0] sm:$0xff]  ;;  %v7432_v20 = vld [vmem:[%s9008_s2 + $0x948] sm:$0xff]  ;;  %v1284_v60 = vxor.u32 2147483648, %v1283_v33  ;;  %v7452_v34 = vld [vmem:[%s9008_s2 + $0x8d8] sm:$0xff] }
  0xfb   :  { %vm7441_vm2 = vcmp.le.f32.partialorder %v9309_v59, 0.7853982  ;;  %v7457_v26 = vld [vmem:[%s9008_s2 + $0x850] sm:$0xff]  ;;  %v7462_v63 = vld [vmem:[%s9008_s2 + $0x858] sm:$0xff]  ;;  %v7505_v28 = vld [vmem:[%s9008_s2 + $0x8e8] sm:$0xff] }
  0xfc   :  { %2756 = vmatmul.mubr.f32.vlgmr.msra.gmra.mrb[6].mxu0 %v2142_v53  ;;  %2826 = vmatmul.mubr.f32.vlgmr.msra.gmra.mrb[6].mxu1 %v2150_v7  ;;  %v1289_v16 = vsel %vm7441_vm2, 0, %v1287_v45  ;;  %v3552_v53 = vadd.s32 4294967169, %v1307_v1  ;;  %v7476_v59 = vld [vmem:[%s9008_s2 + $0x9d0] sm:$0xff]  ;;  %v7481_v45 = vld [vmem:[%s9008_s2 + $0x9d8] sm:$0xff]  ;;  %v1285_v58 = vsel %vm1202_vm1, %v1284_v60, %v1283_v33  ;;  %v7500_v1 = vld [vmem:[%s9008_s2 + $0x8e0] sm:$0xff] }
  0xfd   :  { %4449 = vmatpush3.bf16.msra.mxu0 %v4448_v43  ;;  %4481 = vmatpush3.bf16.msra.mxu1 %v4480_v55  ;;  %v7486_v40 = vld [vmem:[%s9008_s2 + $0x950] sm:$0xff]  ;;  %v7495_v55 = vld [vmem:[%s9008_s2 + $0x958] sm:$0xff]  ;;  %v7518_v7 = vld [vmem:[%s9008_s2 + $0x860] sm:$0xff]  ;;  %v9316_v43 = vmov 920167782  }
  0xfe   :  { %4451 = vmatprep.subr.bf16.mxu0 %v4450_v9  ;;  %4483 = vmatprep.subr.bf16.mxu1 %v4482_v35  ;;  %v1288_v9 = vsel %vm7441_vm2, %v9308_v8, %v1285_v58  ;;  %v9105_v35 = vand.u32 2147483647, %v7335_v62  ;;  %v1313_v33 = vadd.s32 1, %v3552_v53  ;;  %v7523_v46 = vld [vmem:[%s9008_s2 + $0x868] sm:$0xff]  ;;  %v7528_v14 = vld [vmem:[%s9008_s2 + $0x9e0] sm:$0xff]  ;;  %v7530_v53 = vand.u32 3, %v1289_v16 }
  0xff   :  { %4802 = vcosq.f32 %v1288_v9  ;;  %v7539_v60 = vld [vmem:[%s9008_s2 + $0x9e8] sm:$0xff]  ;;  %v7544_v2 = vld [vmem:[%s9008_s2 + $0x960] sm:$0xff]  ;;  %v9314_v58 = vmov 2131351028   ;;  %v9317_v62 = vpack.c.bf16 %v7333_v39, %v7328_v38 }
 0x100   :  { %v7549_v16 = vld [vmem:[%s9008_s2 + $0x968] sm:$0xff]  ;;  %4804 = vsinq.f32 %v1288_v9  ;;  %vm1314_vm3 = vcmp.gt.s32.totalorder %v1313_v33, 0  ;;  %v1310_v10 = vand.u32 8388607, %v9105_v35  ;;  %vm1294_vm4 = vcmp.lt.s32.totalorder %v7530_v53, 2 }
 0x101   :  { %4453 = vmatpush3.bf16.msra.mxu0 %v4452_v51  ;;  %4485 = vmatpush3.bf16.msra.mxu1 %v4484_v30  ;;  %v1315_v31 = vsel %vm1314_vm3, %v1313_v33, 0  ;;  %vm1295_vm5 = vcmp.eq.s32.totalorder %v7530_v53, 0  ;;  %vm1298_vm7 = vcmp.eq.s32.totalorder %v7530_v53, 2  ;;  %v9312_v33 = vmov 2475754826  }
 0x102   :  { %4455 = vmatprep.subr.bf16.mxu0 %v4454_v18  ;;  %4487 = vmatprep.subr.bf16.mxu1 %v4486_v44  ;;  %v7564_v4 = vshrl.u32 %v1315_v31, 5  ;;  %v1317_v51 = vand.u32 31, %v1315_v31  ;;  %v9313_v31 = vpack.c.bf16 %v7323_v49, %v7318_v54  ;;  %v9315_v30 = vmov 2102212464  }
 0x103   :  { %v1311_v27 = vor.u32 8388608, %v1310_v10  ;;  %v9319_v10 = vpack.c.bf16 %v7351_v6, %v7346_v11  ;;  %v7621_v11 = vld [vmem:[%s9008_s2 + $0x8f0] sm:$0xff]  ;;  %v7626_v6 = vld [vmem:[%s9008_s2 + $0x8f8] sm:$0xff] }
 0x104   :  { %v1318_v18 = vsub.s32 32, %v1317_v51  ;;  %v1320_v44 = vshll.u32 %v9221_v48, %v1317_v51  ;;  %v1323_v35 = vshll.u32 %v9312_v33, %v1317_v51  ;;  %v1326_v9 = vshll.u32 %v9314_v58, %v1317_v51 }
 0x105   :  { %4457 = vmatpush3.bf16.msra.mxu0 %v4456_v61  ;;  %4489 = vmatpush3.bf16.msra.mxu1 %v9313_v31  ;;  %v1329_v12 = vshll.u32 %v9315_v30, %v1317_v51  ;;  %v1332_v23 = vshll.u32 %v9316_v43, %v1317_v51  ;;  %vm1335_vm8 = vcmp.lt.s32.totalorder %v7564_v4, 1  ;;  %vm1338_vm9 = vcmp.lt.s32.totalorder %v7564_v4, 4 }
 0x106   :  { %4459 = vmatprep.subr.bf16.mxu0 %v9317_v62  ;;  %4491 = vmatprep.subr.bf16.mxu1 %v9318_v25  ;;  %v1321_v54 = vshrl.u32 %v9312_v33, %v1318_v18  ;;  %v1324_v49 = vshrl.u32 %v9314_v58, %v1318_v18  ;;  %v1319_v61 = vshrl.u32 %v9221_v48, %v1318_v18  ;;  %vm1337_vm10 = vcmp.lt.s32.totalorder %v7564_v4, 3 }
 0x107   :  { %v1327_v51 = vshrl.u32 %v9315_v30, %v1318_v18  ;;  %v1330_v31 = vshrl.u32 %v9316_v43, %v1318_v18  ;;  %v1333_v38 = vshrl.u32 %v9232_v57, %v1318_v18  ;;  %v9320_v25 = vpack.c.bf16 %v7375_v29, %v7370_v13 }
 0x108   :  { %v1322_v39 = vor.u32 %v1321_v54, %v1320_v44  ;;  %v1325_v62 = vor.u32 %v1324_v49, %v1323_v35  ;;  %v9321_v18 = vpack.c.bf16 %v7389_v22, %v7384_v36  ;;  %v9322_v44 = vpack.c.bf16 %v7418_v37, %v7413_v24  ;;  %v7636_v36 = vld [vmem:[%s9008_s2 + $0x870] sm:$0xff]  ;;  %v7641_v22 = vld [vmem:[%s9008_s2 + $0x878] sm:$0xff] }
 0x109   :  { %v4803_v52 = vpop.eup %4802  ;;  %4461 = vmatpush3.bf16.msra.mxu0 %v9319_v10  ;;  %4493 = vmatpush3.bf16.msra.mxu1 %v9320_v25  ;;  %v1328_v30 = vor.u32 %v1327_v51, %v1326_v9  ;;  %v1331_v43 = vor.u32 %v1330_v31, %v1329_v12  ;;  %v1334_v58 = vor.u32 %v1333_v38, %v1332_v23  ;;  %vm1336_vm11 = vcmp.lt.s32.totalorder %v7564_v4, 2  ;;  %v7657_v54 = vld [vmem:[%s9008_s2 + $0x9f8] sm:$0xff]  ;;  %v7662_v49 = vld [vmem:[%s9008_s2 + $0x970] sm:$0xff]  ;;  %v7826_v4 = vld [vmem:[%s9008_s2 + $0xaa0] sm:$0xff] }
 0x10a   :  { %v4805_v35 = vpop.eup %4804  ;;  %4463 = vmatprep.subr.bf16.mxu0 %v9321_v18  ;;  %4495 = vmatprep.subr.bf16.mxu1 %v9322_v44  ;;  %v1299_v23 = vxor.u32 2147483648, %v4803_v52  ;;  %v1343_v13 = vsel %vm1335_vm8, %v1322_v39, %v1325_v62  ;;  %v7631_v29 = vshll.u32 %v1311_v27, 8  ;;  %v1339_v37 = vsel %vm1335_vm8, %v1319_v61, %v1322_v39  ;;  %v7652_v27 = vld [vmem:[%s9008_s2 + $0x9f0] sm:$0xff]  ;;  %v7681_v25 = vld [vmem:[%s9008_s2 + $0x978] sm:$0xff]  ;;  %v7716_v44 = vld [vmem:[%s9008_s2 + $0xa08] sm:$0xff] }
 0x10b   :  { %v1296_v24 = vxor.u32 2147483648, %v4805_v35  ;;  %v1340_v12 = vsel %vm1338_vm9, %v1328_v30, 2102212464  ;;  %v1344_v9 = vsel %vm1338_vm9, %v1331_v43, 920167782  ;;  %v1347_v31 = vsel %vm1335_vm8, %v1325_v62, %v1328_v30 }
 0x10c   :  { %v1300_v61 = vsel %vm1298_vm7, %v1299_v23, %v4805_v35  ;;  %v1345_v51 = vsel %vm1337_vm10, %v1328_v30, %v1344_v9  ;;  %v1348_v38 = vsel %vm1338_vm9, %v1334_v58, 1326507024  ;;  %v9323_v39 = vpack.c.bf16 %v7408_v17, %v7394_v15  ;;  %v7688_v58 = vld [vmem:[%s9008_s2 + $0xa80] sm:$0xff]  ;;  %v7693_v15 = vld [vmem:[%s9008_s2 + $0xa88] sm:$0xff] }
 0x10d   :  { %v9324_v10 = vpack.c.bf16 %v7432_v20, %v7427_v19  ;;  %v1297_v35 = vsel %vm1295_vm5, %v4803_v52, %v1296_v24  ;;  %v1341_v17 = vsel %vm1337_vm10, %v1325_v62, %v1340_v12  ;;  %v1346_v19 = vsel %vm1336_vm11, %v1343_v13, %v1345_v51  ;;  %v7711_v62 = vld [vmem:[%s9008_s2 + $0xa00] sm:$0xff]  ;;  %v7754_v12 = vld [vmem:[%s9008_s2 + $0xa90] sm:$0xff] }
 0x10e   :  { %4465 = vmatpush3.bf16.msra.mxu0 %v9323_v39  ;;  %v70_v20 = vadd.s32 4352, %v9253_v21  ;;  %v9325_v30 = vpack.c.bf16 %v7452_v34, %v7437_v56  ;;  %v9326_v52 = vpack.c.bf16 %v7481_v45, %v7476_v59  ;;  %v1301_v18 = vsel %vm1294_vm4, %v1297_v35, %v1300_v61  ;;  %v7721_v56 = vld [vmem:[%s9008_s2 + $0xb80] sm:$0xff]  ;;  %v7726_v34 = vld [vmem:[%s9008_s2 + $0xb88] sm:$0xff]  ;;  %v7795_v39 = vld [vmem:[%s9008_s2 + $0xb90] sm:$0xff] }
 0x10f   :  { %4497 = vmatpush3.bf16.msra.mxu1 %v9324_v10  ;;  %v1349_v59 = vsel %vm1337_vm10, %v1331_v43, %v1348_v38  ;;  %v7731_v45 = vmul.u32.u64.low %v7631_v29, %v1346_v19  ;;  %v7732_v53 = vmul.u32.u64.high %v7631_v29, %v1346_v19, %v7731_v45  ;;  %v4474_v23 = vpack.c.bf16 %v7626_v6, %v7621_v11  ;;  %v7744_v24 = vld [vmem:[%s9008_s2 + $0xb00] sm:$0xff]  ;;  %v7749_v43 = vld [vmem:[%s9008_s2 + $0xb08] sm:$0xff]  ;;  %v7770_v38 = vld [vmem:[%s9008_s2 + $0xa98] sm:$0xff] }
 0x110   :  { %4467 = vmatprep.subr.bf16.mxu0 %v9325_v30  ;;  %4499 = vmatprep.subr.bf16.mxu1 %v9326_v52  ;;  %v7739_v13 = vsel %vm1292_vm6, nan, %v1301_v18  ;;  %v1350_v8 = vsel %vm1336_vm11, %v1347_v31, %v1349_v59  ;;  %v71_v11 = vadd.s32 4480, %v9253_v21  ;;  %v4476_v6 = vpack.c.bf16 %v7641_v22, %v7636_v36  ;;  %v7775_v21 = vld [vmem:[%s9008_s2 + $0xa10] sm:$0xff]  ;;  %v7780_v36 = vld [vmem:[%s9008_s2 + $0xa18] sm:$0xff] }
 0x111   :  { %v4506_v9 = vpack.c.bf16 %v7657_v54, %v7652_v27  ;;  %v2162_v61 = vrot.slane %v7739_v13, %v9240_v42  ;;  %v2170_v51 = vrot.slane %v7739_v13, %v9241_v3  ;;  %v9327_v22 = vpack.c.bf16 %v7462_v63, %v7457_v26  ;;  %v7800_v26 = vld [vmem:[%s9008_s2 + $0xb98] sm:$0xff]  ;;  %v7805_v63 = vld [vmem:[%s9008_s2 + $0xb10] sm:$0xff] }
 0x112   :  { %v9328_v27 = vpack.c.bf16 %v7495_v55, %v7486_v40  ;;  %v4508_v54 = vpack.c.bf16 %v7681_v25, %v7662_v49  ;;  %v4510_v31 = vpack.c.bf16 %v7693_v15, %v7688_v58  ;;  %v1342_v40 = vsel %vm1336_vm11, %v1339_v37, %v1341_v17  ;;  %v7821_v25 = vld [vmem:[%s9008_s2 + $0xb18] sm:$0xff]  ;;  %v9335_v59 = vld [vmem:[#allocation27_spill] sm:$0xff] }
 0x113   :  { %4469 = vmatpush3.bf16.msra.mxu0 %v9327_v22  ;;  %v7810_v55 = vand.u32 3, %v7586_v5  ;;  %v9329_v49 = vpack.c.bf16 %v7505_v28, %v7500_v1  ;;  %v9330_v10 = vpack.c.bf16 %v7539_v60, %v7528_v14  ;;  %v7831_v5 = vld [vmem:[%s9008_s2 + $0xaa8] sm:$0xff]  ;;  %v7838_v60 = vand.u32 3, %v7603_v47  ;;  %2895 = vmatprep.mubr.f32.mxu0 %v2162_v61  ;;  %v1881_v61 = vld [vmem:[%s9008_s2 + $0xba0] sm:$0xff] }
 0x114   :  { %4501 = vmatpush3.bf16.msra.mxu1 %v9328_v27  ;;  %v7834_v28 = vmul.u32.u64.low %v7631_v29, %v1350_v8  ;;  %v7835_v1 = vmul.u32.u64.high %v7631_v29, %v1350_v8, %v7834_v28  ;;  %v7840_v14 = vand.u32 3, %v70_v20  ;;  %2965 = vmatprep.mubr.f32.mxu1 %v2170_v51  ;;  %v4512_v37 = vpack.c.bf16 %v7716_v44, %v7711_v62  ;;  %v1882_v51 = vld [vmem:[%s9008_s2 + $0xba8] sm:$0xff] }
 0x115   :  { %4471 = vmatprep.subr.bf16.mxu0 %v9329_v49  ;;  %4503 = vmatprep.subr.bf16.mxu1 %v9330_v10  ;;  %v4542_v35 = vpack.c.bf16 %v7726_v34, %v7721_v56  ;;  %v1361_v58 = vadd.s32 1, %v7732_v53  ;;  %v7847_v15 = vand.u32 3, %v71_v11  ;;  %v4544_v17 = vpack.c.bf16 %v7749_v43, %v7744_v24  ;;  %v9336_v24 = vld [vmem:[#allocation6_spill] sm:$0xff]  ;;  %v9337_v43 = vld [vmem:[#allocation7_spill] sm:$0xff]  ;;  %v1865_v49 = vld [vmem:[%s9008_s2 + $0xb20] sm:$0xff] }
 0x116   :  { %v4514_v47 = vpack.c.bf16 %v7770_v38, %v7754_v12  ;;  %v4516_v19 = vpack.c.bf16 %v7780_v36, %v7775_v21  ;;  %v1358_v20 = vmul.u32 %v7631_v29, %v1342_v40  ;;  %v9331_v30 = vpack.c.bf16 %v7523_v46, %v7518_v7  ;;  %v9333_v29 = vld [vmem:[#allocation14_spill] sm:$0xff]  ;;  %v1851_v28 = vld [vmem:[%s9008_s2 + $0xab0] sm:$0xff]  ;;  %v7994_v21 = vld [vmem:[%s9008_s2 + $0xbc0] sm:$0xff] }
 0x117   :  { %v9332_v52 = vpack.c.bf16 %v7549_v16, %v7544_v2  ;;  %v4546_v18 = vpack.c.bf16 %v7800_v26, %v7795_v39  ;;  %v4548_v62 = vpack.c.bf16 %v7821_v25, %v7805_v63  ;;  %v4518_v44 = vpack.c.bf16 %v7831_v5, %v7826_v4  ;;  %v9334_v2 = vld [vmem:[#allocation16_spill] sm:$0xff]  ;;  %v1866_v10 = vld [vmem:[%s9008_s2 + $0xb28] sm:$0xff]  ;;  %v8016_v4 = vld [vmem:[%s9008_s2 + $0xb40] sm:$0xff] }
 0x118   :  { %4473 = vmatpush3.bf16.msra.mxu0 %v9331_v30  ;;  %vm538_vm12 = vcmp.eq.s32.totalorder %v7810_v55, 2  ;;  %v2158_v46 = vrot.slane %v7739_v13, %v9333_v29  ;;  %vm1360_vm13 = vc.u32 %v7835_v1, %v7731_v45  ;;  %vm539_vm14 = vcmp.eq.s32.totalorder %v7838_v60, 2  ;;  %v7970_v30 = vld [vmem:[%s9008_s2 + $0xb38] sm:$0xff]  ;;  %v8021_v5 = vld [vmem:[%s9008_s2 + $0xb48] sm:$0xff] }
 0x119   :  { %4505 = vmatpush3.bf16.msra.mxu1 %v9332_v52  ;;  %4475 = vmatprep.subr.bf16.mxu0 %v4474_v23  ;;  %vm540_vm15 = vcmp.eq.s32.totalorder %v7840_v14, 2  ;;  %v2166_v7 = vrot.slane %v7739_v13, %v9334_v2  ;;  %v1362_v16 = vsel %vm1360_vm13, %v1361_v58, %v7732_v53  ;;  %vm541_vm0 = vcmp.eq.s32.totalorder %v7847_v15, 2  ;;  %v1883_v58 = vld [vmem:[%s9008_s2 + $0xbb0] sm:$0xff] }
 0x11a   :  { %4507 = vmatprep.subr.bf16.mxu1 %v4506_v9  ;;  %vm612_vm1 = vcmp.eq.s32.totalorder %v7810_v55, 1  ;;  %v2178_v56 = vrot.slane %v7739_v13, %v9266_v41  ;;  %v1363_v34 = vadd.s32 %v1362_v16, %v1358_v20  ;;  %vm613_vm2 = vcmp.eq.s32.totalorder %v7838_v60, 1  ;;  %v7965_v20 = vld [vmem:[%s9008_s2 + $0xb30] sm:$0xff]  ;;  %v7984_v16 = vld [vmem:[%s9008_s2 + $0xac0] sm:$0xff] }
 0x11b   :  { %vm614_vm3 = vcmp.eq.s32.totalorder %v7840_v14, 1  ;;  %v2186_v23 = vrot.slane %v7739_v13, %v9335_v59  ;;  %v576_v53 = vsel %vm538_vm12, %v9337_v43, %v9336_v24  ;;  %v577_v12 = vsel %vm539_vm14, %v9337_v43, %v9336_v24 }
 0x11c   :  { %4477 = vmatpush3.bf16.msra.mxu0 %v4476_v6  ;;  %vm615_vm4 = vcmp.eq.s32.totalorder %v7847_v15, 1  ;;  %v1364_v8 = vadd.s32 536870912, %v1363_v34  ;;  %v578_v11 = vsel %vm540_vm15, %v9337_v43, %v9336_v24  ;;  %v579_v6 = vsel %vm541_vm0, %v9337_v43, %v9336_v24  ;;  %v8032_v24 = vld [vmem:[%s9008_s2 + $0xad8] sm:$0xff]  ;;  %v8037_v43 = vld [vmem:[%s9008_s2 + $0xa50] sm:$0xff] }
 0x11d   :  { %4509 = vmatpush3.bf16.msra.mxu1 %v4508_v54  ;;  %4511 = vmatprep.subr.bf16.mxu0 %v4510_v31  ;;  %v650_v9 = vsel %vm612_vm1, %v9284_v32, %v576_v53  ;;  %v651_v38 = vsel %vm613_vm2, %v9284_v32, %v577_v12  ;;  %v652_v22 = vsel %vm614_vm3, %v9284_v32, %v578_v11  ;;  %vm686_vm5 = vcmp.eq.s32.totalorder %v7810_v55, 0  ;;  %v1833_v31 = vld [vmem:[%s9008_s2 + $0xa20] sm:$0xff]  ;;  %v8042_v53 = vld [vmem:[%s9008_s2 + $0xa58] sm:$0xff]  ;;  %v8047_v12 = vld [vmem:[%s9008_s2 + $0xbd0] sm:$0xff] }
 0x11e   :  { %4543 = vmatprep.subr.bf16.mxu1 %v4542_v35  ;;  %v653_v27 = vsel %vm615_vm4, %v9284_v32, %v579_v6  ;;  %v7918_v54 = vshrl.u32 %v1364_v8, 30  ;;  %vm687_vm6 = vcmp.eq.s32.totalorder %v7838_v60, 0  ;;  %vm688_vm7 = vcmp.eq.s32.totalorder %v7840_v14, 0  ;;  %v1834_v32 = vld [vmem:[%s9008_s2 + $0xa28] sm:$0xff]  ;;  %v1852_v35 = vld [vmem:[%s9008_s2 + $0xab8] sm:$0xff]  ;;  %v8057_v6 = vld [vmem:[%s9008_s2 + $0xb50] sm:$0xff] }
 0x11f   :  { %2896 = vmatmul.mubr.f32.vlgmr.msra.gmra.mrb[8].mxu0 %v2158_v46  ;;  %vm689_vm8 = vcmp.eq.s32.totalorder %v7847_v15, 0  ;;  %v724_v39 = vsel %vm686_vm5, %v9295_v0, %v650_v9  ;;  %v725_v26 = vsel %vm687_vm6, %v9295_v0, %v651_v38  ;;  %v726_v40 = vsel %vm688_vm7, %v9295_v0, %v652_v22  ;;  %v1884_v15 = vld [vmem:[%s9008_s2 + $0xbb8] sm:$0xff]  ;;  %v34_v38 = vld [vmem:[%s9007_s1 + $0x20] sm:$0xf] }
 0x120   :  { %2966 = vmatmul.mubr.f32.vlgmr.msra.gmra.mrb[8].mxu1 %v2166_v7  ;;  %4513 = vmatpush3.bf16.msra.mxu0 %v4512_v37  ;;  %v4550_v55 = vpack.c.bf16 %v1882_v51, %v1881_v61  ;;  %v1366_v60 = vshll.u32 %v7918_v54, 30  ;;  %v727_v14 = vsel %vm689_vm8, %v9295_v0, %v653_v27  ;;  %v960_v37 = vcombine.low %v724_v39, %v725_v26  ;;  %v7955_v0 = vld [vmem:[%s9008_s2 + $0xa30] sm:$0xff]  ;;  %v8052_v8 = vld [vmem:[%s9008_s2 + $0xbd8] sm:$0xff]  ;;  %v8067_v61 = vld [vmem:[%s9008_s2 + $0xae0] sm:$0xff] }
 0x121   :  { %4545 = vmatpush3.bf16.msra.mxu1 %v4544_v17  ;;  %4515 = vmatprep.subr.bf16.mxu0 %v4514_v47  ;;  %v961_v17 = vcombine.low %v726_v40, %v727_v14  ;;  %v7960_v47 = vld [vmem:[%s9008_s2 + $0xa38] sm:$0xff]  ;;  %v4520_v46 = vpack.c.bf16 %v1834_v32, %v1833_v31  ;;  %v4552_v7 = vpack.c.bf16 %v1866_v10, %v1865_v49  ;;  %v8080_v31 = vld [vmem:[%s9008_s2 + $0xae8] sm:$0xff]  ;;  %v8085_v32 = vld [vmem:[%s9008_s2 + $0xa60] sm:$0xff] }
 0x122   :  { %4547 = vmatprep.subr.bf16.mxu1 %v4546_v18  ;;  %3035 = vmatprep.mubr.f32.mxu0 %v2178_v56  ;;  %v7972_v52 = vsub.s32 %v1363_v34, %v1366_v60  ;;  %v968_v18 = vrot.slane %v960_v37, %v9300_v50  ;;  %v7989_v56 = vld [vmem:[%s9008_s2 + $0xac8] sm:$0xff]  ;;  %v4522_v63 = vpack.c.bf16 %v1852_v35, %v1851_v28  ;;  %v8062_v9 = vld [vmem:[%s9008_s2 + $0xb58] sm:$0xff]  ;;  %v8099_v49 = vld [vmem:[%s9008_s2 + $0xbe0] sm:$0xff] }
 0x123   :  { %3105 = vmatprep.mubr.f32.mxu1 %v2186_v23  ;;  %v975_v36 = vrot.slane %v961_v17, %v9300_v50  ;;  %v4554_v25 = vpack.c.bf16 %v1884_v15, %v1883_v58  ;;  %v1886_v34 = vld [vmem:[%s9008_s2 + $0xbc8] sm:$0xff]  ;;  %v8027_v23 = vld [vmem:[%s9008_s2 + $0xad0] sm:$0xff]  ;;  %v4524_v22 = vpack.c.bf16 %v7960_v47, %v7955_v0  ;;  %v4556_v27 = vpack.c.bf16 %v7970_v30, %v7965_v20  ;;  %v8128_v58 = vld [vmem:[%s9008_s2 + $0xaf8] sm:$0xff] }
 0x124   :  { %4517 = vmatpush3.bf16.msra.mxu0 %v4516_v19  ;;  %v8003_v19 = vld [vmem:[%s9008_s2 + $0xa40] sm:$0xff]  ;;  %v8090_v39 = vld [vmem:[%s9008_s2 + $0xa68] sm:$0xff]  ;;  %v4526_v40 = vpack.c.bf16 %v7989_v56, %v7984_v16  ;;  %v4560_v14 = vpack.c.bf16 %v8021_v5, %v8016_v4  ;;  %v8123_v35 = vld [vmem:[%s9008_s2 + $0xaf0] sm:$0xff]  ;;  %v4530_v17 = vpack.c.bf16 %v8032_v24, %v8027_v23  ;;  %v4532_v0 = vpack.c.bf16 %v8042_v53, %v8037_v43 }
 0x125   :  { %4549 = vmatpush3.bf16.msra.mxu1 %v4548_v62  ;;  %4519 = vmatprep.subr.bf16.mxu0 %v4518_v44  ;;  %v8008_v62 = vld [vmem:[%s9008_s2 + $0xa48] sm:$0xff]  ;;  %v1369_v44 = vsub.s32 0, %v7972_v52  ;;  %v976_v11 = vcombine.low %v968_v18, %v975_v36  ;;  %v4562_v47 = vpack.c.bf16 %v8052_v8, %v8047_v12  ;;  %v8141_v20 = vld [vmem:[%s9008_s2 + $0xa70] sm:$0xff]  ;;  %v8146_v30 = vld [vmem:[%s9008_s2 + $0xa78] sm:$0xff]  ;;  %v4564_v56 = vpack.c.bf16 %v8062_v9, %v8057_v6 }
 0x126   :  { %4551 = vmatprep.subr.bf16.mxu1 %v4550_v55  ;;  %v4558_v55 = vpack.c.bf16 %v1886_v34, %v7994_v21  ;;  %v8104_v10 = vld [vmem:[%s9008_s2 + $0xbe8] sm:$0xff]  ;;  %v4528_v60 = vpack.c.bf16 %v8008_v62, %v8003_v19  ;;  %v8151_v18 = vld [vmem:[%s9008_s2 + $0xbf0] sm:$0xff]  ;;  %v4534_v21 = vpack.c.bf16 %v8080_v31, %v8067_v61  ;;  %v8170_v36 = vld [vmem:[%s9008_s2 + $0xb78] sm:$0xff]  ;;  %v4536_v34 = vpack.c.bf16 %v8090_v39, %v8085_v32 }
 0x127   :  { %v3553_v51 = vmin.u32 %v1369_v44, %v7972_v52  ;;  %v983_v26 = vrot.slane %v976_v11, %v9300_v50  ;;  %v8109_v50 = vld [vmem:[%s9008_s2 + $0xb60] sm:$0xff]  ;;  %v8118_v37 = vld [vmem:[%s9008_s2 + $0xb68] sm:$0xff]  ;;  %v4566_v4 = vpack.c.bf16 %v8104_v10, %v8099_v49  ;;  %v1359_v24 = vadd.s32 %v7731_v45, %v7835_v1  ;;  %v8227_v61 = vld [vmem:[%s9008_s2 + $0xc90] sm:$0xff] }
 0x128   :  { %4521 = vmatpush3.bf16.msra.mxu0 %v4520_v46  ;;  %v8156_v46 = vld [vmem:[%s9008_s2 + $0xbf8] sm:$0xff]  ;;  %v8191_v5 = vld [vmem:[%s9008_s2 + $0xc00] sm:$0xff]  ;;  %v8196_v44 = vld [vmem:[%s9008_s2 + $0xc08] sm:$0xff]  ;;  %v4568_v12 = vpack.c.bf16 %v8118_v37, %v8109_v50  ;;  %v4538_v8 = vpack.c.bf16 %v8128_v58, %v8123_v35 }
 0x129   :  { %4553 = vmatpush3.bf16.msra.mxu1 %v4552_v7  ;;  %4523 = vmatprep.subr.bf16.mxu0 %v4522_v63  ;;  %v1371_v28 = vclz %v3553_v51  ;;  %v8130_v15 = vadd.f32 %v983_v26, %v34_v38  ;;  %v8161_v7 = vld [vmem:[%s9008_s2 + $0xb70] sm:$0xff]  ;;  %v8175_v63 = vld [vmem:[%s9008_s2 + $0xc80] sm:$0xff]  ;;  %v8212_v11 = vld [vmem:[%s9008_s2 + $0xd88] sm:$0xff]  ;;  %v4540_v26 = vpack.c.bf16 %v8146_v30, %v8141_v20 }
 0x12a   :  { %4555 = vmatprep.subr.bf16.mxu1 %v4554_v25  ;;  %v8180_v25 = vld [vmem:[%s9008_s2 + $0xc88] sm:$0xff]  ;;  %v8201_v23 = vld [vmem:[%s9008_s2 + $0xd80] sm:$0xff]  ;;  %v8232_v51 = vld [vmem:[%s9008_s2 + $0xc98] sm:$0xff] }
 0x12b   :  { %v3554_v16 = vadd.s32 4294967294, %v1371_v28  ;;  %v9111_v19 = vand.u32 2147483647, %v8130_v15  ;;  %v1409_v62 = vand.u32 2139095040, %v8130_v15  ;;  %v8217_v6 = vld [vmem:[%s9008_s2 + $0xd00] sm:$0xff]  ;;  %v8222_v45 = vld [vmem:[%s9008_s2 + $0xd08] sm:$0xff]  ;;  %v4574_v28 = vpack.c.bf16 %v8180_v25, %v8175_v63 }
 0x12c   :  { %4525 = vmatpush3.bf16.msra.mxu0 %v4524_v22  ;;  %v8246_v49 = vld [vmem:[%s9008_s2 + $0xc10] sm:$0xff]  ;;  %v9339_v43 = vld [vmem:[#allocation21_spill] sm:$0xff]  ;;  %vm1408_vm7 = vcmp.lt.s32.totalorder %v8130_v15, 0 }
 0x12d   :  { %4557 = vmatpush3.bf16.msra.mxu1 %v4556_v27  ;;  %4527 = vmatprep.subr.bf16.mxu0 %v4526_v40  ;;  %vm3555_vm9 = vcmp.lt.s32.totalorder %v3554_v16, 0  ;;  %v1410_v9 = vshrl.u32 %v1409_v62, 23  ;;  %v1413_v31 = vand.u32 8388607, %v9111_v19  ;;  %v4570_v40 = vpack.c.bf16 %v8156_v46, %v8151_v18  ;;  %v8256_v10 = vld [vmem:[%s9008_s2 + $0xd90] sm:$0xff] }
 0x12e   :  { %4559 = vmatprep.subr.bf16.mxu1 %v4558_v55  ;;  %v1374_v1 = vsel %vm3555_vm9, 0, %v3554_v16  ;;  %v4572_v55 = vpack.c.bf16 %v8170_v36, %v8161_v7  ;;  %v8270_v37 = vld [vmem:[%s9008_s2 + $0xd10] sm:$0xff]  ;;  %v4606_v46 = vpack.c.bf16 %v8212_v11, %v8201_v23  ;;  %v4608_v7 = vpack.c.bf16 %v8222_v45, %v8217_v6  ;;  %v1929_v6 = vld [vmem:[%s9008_s2 + $0xd20] sm:$0xff]  ;;  %v1930_v45 = vld [vmem:[%s9008_s2 + $0xd28] sm:$0xff] }
 0x12f   :  { %v1375_v38 = vsub.s32 32, %v1374_v1  ;;  %v1376_v22 = vshll.u32 %v7972_v52, %v1374_v1  ;;  %v1379_v27 = vsub.s32 4294967266, %v1374_v1  ;;  %v8251_v52 = vld [vmem:[%s9008_s2 + $0xc18] sm:$0xff]  ;;  %v3556_v50 = vadd.s32 4294967169, %v1410_v9  ;;  %v9338_v9 = vld [vmem:[#allocation18_spill] sm:$0xff] }
 0x130   :  { %4529 = vmatpush3.bf16.msra.mxu0 %v4528_v60  ;;  %v4576_v60 = vpack.c.bf16 %v8196_v44, %v8191_v5  ;;  %v4578_v16 = vpack.c.bf16 %v8232_v51, %v8227_v61  ;;  %v1389_v62 = vsub.s32 4, %v7918_v54  ;;  %v1414_v1 = vor.u32 8388608, %v1413_v31 }
 0x131   :  { %4561 = vmatpush3.bf16.msra.mxu1 %v4560_v14  ;;  %4531 = vmatprep.subr.bf16.mxu0 %v4530_v17  ;;  %v8265_v14 = vld [vmem:[%s9008_s2 + $0xd98] sm:$0xff]  ;;  %v1380_v18 = vadd.s32 127, %v1379_v27  ;;  %v1416_v36 = vadd.s32 1, %v3556_v50  ;;  %v4580_v23 = vpack.c.bf16 %v8251_v52, %v8246_v49  ;;  %vm1305_vm11 = vcmp.lt.s32.totalorder %v9338_v9, 0  ;;  %v1931_v49 = vld [vmem:[%s9008_s2 + $0xd30] sm:$0xff] }
 0x132   :  { %4563 = vmatprep.subr.bf16.mxu1 %v4562_v47  ;;  %v8275_v17 = vld [vmem:[%s9008_s2 + $0xd18] sm:$0xff]  ;;  %v1377_v47 = vshrl.u32 %v1359_v24, %v1375_v38  ;;  %v4610_v24 = vpack.c.bf16 %v8265_v14, %v8256_v10  ;;  %v2174_v53 = vrot.slane %v7739_v13, %v9339_v43  ;;  %vm1395_vm5 = vweird.f32 %v9338_v9 }
 0x133   :  { %v1381_v25 = vshll.u32 %v1380_v18, 23  ;;  %vm1417_vm10 = vcmp.gt.s32.totalorder %v1416_v36, 0  ;;  %v8309_v18 = vsel %vm1305_vm11, %v1389_v62, %v7918_v54  ;;  %v9345_v62 = vmov 2102212464   ;;  %v1916_v14 = vld [vmem:[%s9008_s2 + $0xcb8] sm:$0xff] }
 0x134   :  { %v1378_v63 = vor.u32 %v1377_v47, %v1376_v22  ;;  %4533 = vmatpush3.bf16.msra.mxu0 %v4532_v0  ;;  %v1418_v27 = vsel %vm1417_vm10, %v1416_v36, 0  ;;  %v9340_v0 = vand.u32 2147483647, %v9338_v9  ;;  %v9343_v47 = vld [vmem:[#allocation20_spill] sm:$0xff]  ;;  %v8311_v36 = vshll.u32 %v1414_v1, 8 }
 0x135   :  { %4565 = vmatpush3.bf16.msra.mxu1 %v4564_v56  ;;  %4535 = vmatprep.subr.bf16.mxu0 %v4534_v21  ;;  %v1382_v38 = vor.u32 4788187, %v1381_v25  ;;  %v8302_v31 = vshrl.u32 %v1418_v27, 5  ;;  %v1420_v50 = vand.u32 31, %v1418_v27  ;;  %v2182_v21 = vrot.slane %v7739_v13, %v9343_v47  ;;  %v1932_v52 = vld [vmem:[%s9008_s2 + $0xd38] sm:$0xff] }
 0x136   :  { %4567 = vmatprep.subr.bf16.mxu1 %v4566_v4  ;;  %v1385_v22 = vcvt.s32.f32 %v1378_v63  ;;  %vm8298_vm12 = vcmp.le.f32.partialorder %v9340_v0, 0.7853982  ;;  %v9344_v0 = vmov 2131351028  }
 0x137   :  { %v1383_v4 = vand.u32 2147483647, %v1382_v38  ;;  %v1421_v63 = vsub.s32 32, %v1420_v50  ;;  %v1423_v25 = vshll.u32 %v9221_v48, %v1420_v50  ;;  %v1426_v27 = vshll.u32 %v9312_v33, %v1420_v50 }
 0x138   :  { %4537 = vmatpush3.bf16.msra.mxu0 %v4536_v34  ;;  %v1429_v13 = vshll.u32 %v9344_v0, %v1420_v50  ;;  %v1432_v1 = vshll.u32 %v9345_v62, %v1420_v50  ;;  %v9346_v38 = vmov 920167782   ;;  %vm1438_vm13 = vcmp.lt.s32.totalorder %v8302_v31, 1 }
 0x139   :  { %4569 = vmatpush3.bf16.msra.mxu1 %v4568_v12  ;;  %4539 = vmatprep.subr.bf16.mxu0 %v4538_v8  ;;  %v1386_v54 = vmul.f32 %v1385_v22, %v1383_v4  ;;  %v1435_v19 = vshll.u32 %v9346_v38, %v1420_v50  ;;  %v1422_v32 = vshrl.u32 %v9221_v48, %v1421_v63  ;;  %vm1439_vm14 = vcmp.lt.s32.totalorder %v8302_v31, 2 }
 0x13a   :  { %4571 = vmatprep.subr.bf16.mxu1 %v4570_v40  ;;  %v1424_v39 = vshrl.u32 %v9312_v33, %v1421_v63  ;;  %v1427_v34 = vshrl.u32 %v9344_v0, %v1421_v63  ;;  %v1430_v12 = vshrl.u32 %v9345_v62, %v1421_v63  ;;  %v1433_v35 = vshrl.u32 %v9346_v38, %v1421_v63  ;;  %v1913_v33 = vld [vmem:[%s9008_s2 + $0xca0] sm:$0xff]  ;;  %v1899_v38 = vld [vmem:[%s9008_s2 + $0xc30] sm:$0xff] }
 0x13b   :  { %v1387_v11 = vxor.u32 2147483648, %v1386_v54  ;;  %v1436_v58 = vshrl.u32 %v9232_v57, %v1421_v63  ;;  %vm1440_vm15 = vcmp.lt.s32.totalorder %v8302_v31, 3  ;;  %v1914_v57 = vld [vmem:[%s9008_s2 + $0xca8] sm:$0xff]  ;;  %vm1441_vm0 = vcmp.lt.s32.totalorder %v8302_v31, 4 }
 0x13c   :  { %4541 = vmatpush3.bf16.msra.mxu0 %v4540_v26  ;;  %v1425_v8 = vor.u32 %v1424_v39, %v1423_v25  ;;  %v1428_v48 = vor.u32 %v1427_v34, %v1426_v27  ;;  %v1431_v40 = vor.u32 %v1430_v12, %v1429_v13  ;;  %v1434_v30 = vor.u32 %v1433_v35, %v1432_v1  ;;  %v1898_v25 = vld [vmem:[%s9008_s2 + $0xc28] sm:$0xff]  ;;  %v1949_v35 = vld [vmem:[%s9008_s2 + $0xdc0] sm:$0xff] }
 0x13d   :  { %4573 = vmatpush3.bf16.msra.mxu1 %v4572_v55  ;;  %4575 = vmatprep.subr.bf16.mxu0 %v4574_v28  ;;  %v1388_v20 = vsel %vm1305_vm11, %v1387_v11, %v1386_v54  ;;  %v1437_v26 = vor.u32 %v1436_v58, %v1435_v19  ;;  %v1945_v55 = vld [vmem:[%s9008_s2 + $0xda0] sm:$0xff]  ;;  %v1946_v28 = vld [vmem:[%s9008_s2 + $0xda8] sm:$0xff]  ;;  %v1392_v61 = vsel %vm8298_vm12, 0, %v8309_v18  ;;  %v9347_v62 = vpack.c.bf16 %v8275_v17, %v8270_v37 }
 0x13e   :  { %4607 = vmatprep.subr.bf16.mxu1 %v4606_v46  ;;  %v1391_v46 = vsel %vm8298_vm12, %v9338_v9, %v1388_v20  ;;  %v1442_v22 = vsel %vm1438_vm13, %v1422_v32, %v1425_v8  ;;  %v1443_v19 = vsel %vm1441_vm0, %v1431_v40, 2102212464  ;;  %v1446_v11 = vsel %vm1438_vm13, %v1425_v8, %v1428_v48  ;;  %v1900_v32 = vld [vmem:[%s9008_s2 + $0xc38] sm:$0xff]  ;;  %v1917_v37 = vld [vmem:[%s9008_s2 + $0xcc0] sm:$0xff]  ;;  %v1918_v12 = vld [vmem:[%s9008_s2 + $0xcc8] sm:$0xff] }
 0x13f   :  { %3036 = vmatmul.mubr.f32.vlgmr.msra.gmra.mrb[10].mxu0 %v2174_v53  ;;  %4806 = vcosq.f32 %v1391_v46  ;;  %v1444_v50 = vsel %vm1440_vm15, %v1428_v48, %v1443_v19  ;;  %v1447_v4 = vsel %vm1441_vm0, %v1434_v30, 920167782  ;;  %v1450_v63 = vsel %vm1438_vm13, %v1428_v48, %v1431_v40  ;;  %v1950_v58 = vld [vmem:[%s9008_s2 + $0xdc8] sm:$0xff] }
 0x140   :  { %3106 = vmatmul.mubr.f32.vlgmr.msra.gmra.mrb[10].mxu1 %v2182_v21  ;;  %4577 = vmatpush3.bf16.msra.mxu0 %v4576_v60  ;;  %v4582_v53 = vpack.c.bf16 %v1914_v57, %v1913_v33  ;;  %v1897_v21 = vld [vmem:[%s9008_s2 + $0xc20] sm:$0xff]  ;;  %4808 = vsinq.f32 %v1391_v46  ;;  %v1448_v27 = vsel %vm1440_vm15, %v1431_v40, %v1447_v4  ;;  %v1451_v5 = vsel %vm1441_vm0, %v1437_v26, 1326507024  ;;  %v1915_v60 = vld [vmem:[%s9008_s2 + $0xcb0] sm:$0xff]  ;;  %v1902_v33 = vld [vmem:[%s9008_s2 + $0xc48] sm:$0xff] }
 0x141   :  { %4609 = vmatpush3.bf16.msra.mxu1 %v4608_v7  ;;  %4579 = vmatprep.subr.bf16.mxu0 %v4578_v16  ;;  %v4614_v44 = vpack.c.bf16 %v1946_v28, %v1945_v55  ;;  %v1449_v51 = vsel %vm1439_vm14, %v1446_v11, %v1448_v27  ;;  %v1452_v10 = vsel %vm1440_vm15, %v1434_v30, %v1451_v5  ;;  %v1947_v7 = vld [vmem:[%s9008_s2 + $0xdb0] sm:$0xff]  ;;  %v1948_v16 = vld [vmem:[%s9008_s2 + $0xdb8] sm:$0xff]  ;;  %v1396_v17 = vand.u32 3, %v1392_v61  ;;  %v1901_v40 = vld [vmem:[%s9008_s2 + $0xc40] sm:$0xff] }
 0x142   :  { %4611 = vmatprep.subr.bf16.mxu1 %v4610_v24  ;;  %v1445_v24 = vsel %vm1439_vm14, %v1442_v22, %v1444_v50  ;;  %v1453_v56 = vsel %vm1439_vm14, %v1450_v63, %v1452_v10  ;;  %v8418_v18 = vmul.u32.u64.low %v8311_v36, %v1449_v51  ;;  %v8419_v0 = vmul.u32.u64.high %v8311_v36, %v1449_v51, %v8418_v18  ;;  %v1933_v55 = vld [vmem:[%s9008_s2 + $0xd40] sm:$0xff]  ;;  %v1934_v28 = vld [vmem:[%s9008_s2 + $0xd48] sm:$0xff]  ;;  %v1919_v46 = vld [vmem:[%s9008_s2 + $0xcd0] sm:$0xff] }
 0x143   :  { %v8423_v13 = vmul.u32.u64.low %v8311_v36, %v1453_v56  ;;  %v8424_v54 = vmul.u32.u64.high %v8311_v36, %v1453_v56, %v8423_v13  ;;  %v4584_v1 = vpack.c.bf16 %v1898_v25, %v1897_v21  ;;  %v4616_v31 = vpack.c.bf16 %v1930_v45, %v1929_v6  ;;  %v1920_v11 = vld [vmem:[%s9008_s2 + $0xcd8] sm:$0xff]  ;;  %v1951_v50 = vld [vmem:[%s9008_s2 + $0xdd0] sm:$0xff]  ;;  %v1921_v10 = vld [vmem:[%s9008_s2 + $0xce0] sm:$0xff] }
 0x144   :  { %4581 = vmatpush3.bf16.msra.mxu0 %v4580_v23  ;;  %v4586_v39 = vpack.c.bf16 %v1916_v14, %v1915_v60  ;;  %v4618_v34 = vpack.c.bf16 %v1948_v16, %v1947_v7  ;;  %v1461_v23 = vmul.u32 %v8311_v36, %v1445_v24  ;;  %v1464_v8 = vadd.s32 1, %v8419_v0  ;;  %v1952_v4 = vld [vmem:[%s9008_s2 + $0xdd8] sm:$0xff]  ;;  %v1903_v5 = vld [vmem:[%s9008_s2 + $0xc50] sm:$0xff]  ;;  %v1922_v16 = vld [vmem:[%s9008_s2 + $0xce8] sm:$0xff] }
 0x145   :  { %4613 = vmatpush3.bf16.msra.mxu1 %v9347_v62  ;;  %4583 = vmatprep.subr.bf16.mxu0 %v4582_v53  ;;  %vm1463_vm1 = vc.u32 %v8424_v54, %v8418_v18  ;;  %v4588_v36 = vpack.c.bf16 %v1900_v32, %v1899_v38  ;;  %v4620_v48 = vpack.c.bf16 %v1932_v52, %v1931_v49  ;;  %vm1401_vm2 = vcmp.eq.s32.totalorder %v1396_v17, 2  ;;  %v1935_v61 = vld [vmem:[%s9008_s2 + $0xd50] sm:$0xff]  ;;  %v1936_v51 = vld [vmem:[%s9008_s2 + $0xd58] sm:$0xff]  ;;  %v1953_v24 = vld [vmem:[%s9008_s2 + $0xde0] sm:$0xff] }
 0x146   :  { %4615 = vmatprep.subr.bf16.mxu1 %v4614_v44  ;;  %v1465_v57 = vsel %vm1463_vm1, %v1464_v8, %v8419_v0  ;;  %v4590_v30 = vpack.c.bf16 %v1918_v12, %v1917_v37  ;;  %v4622_v26 = vpack.c.bf16 %v1950_v58, %v1949_v35  ;;  %vm1398_vm3 = vcmp.eq.s32.totalorder %v1396_v17, 0  ;;  %v1904_v44 = vld [vmem:[%s9008_s2 + $0xc58] sm:$0xff]  ;;  %v1954_v56 = vld [vmem:[%s9008_s2 + $0xde8] sm:$0xff]  ;;  %v1905_v38 = vld [vmem:[%s9008_s2 + $0xc60] sm:$0xff] }
 0x147   :  { %v1466_v22 = vadd.s32 %v1465_v57, %v1461_v23  ;;  %vm1397_vm4 = vcmp.lt.s32.totalorder %v1396_v17, 2  ;;  %v4592_v25 = vpack.c.bf16 %v1902_v33, %v1901_v40  ;;  %v4624_v27 = vpack.c.bf16 %v1934_v28, %v1933_v55  ;;  %v1906_v32 = vld [vmem:[%s9008_s2 + $0xc68] sm:$0xff]  ;;  %v1937_v52 = vld [vmem:[%s9008_s2 + $0xd60] sm:$0xff]  ;;  %v1923_v17 = vld [vmem:[%s9008_s2 + $0xcf0] sm:$0xff] }
 0x148   :  { %4585 = vmatpush3.bf16.msra.mxu0 %v4584_v1  ;;  %v4594_v45 = vpack.c.bf16 %v1920_v11, %v1919_v46  ;;  %v4626_v60 = vpack.c.bf16 %v1952_v4, %v1951_v50  ;;  %v4596_v13 = vpack.c.bf16 %v1904_v44, %v1903_v5  ;;  %v4630_v49 = vpack.c.bf16 %v1954_v56, %v1953_v24  ;;  %v1938_v37 = vld [vmem:[%s9008_s2 + $0xd68] sm:$0xff]  ;;  %v1924_v23 = vld [vmem:[%s9008_s2 + $0xcf8] sm:$0xff]  ;;  %v1955_v12 = vld [vmem:[%s9008_s2 + $0xdf0] sm:$0xff] }
 0x149   :  { %4617 = vmatpush3.bf16.msra.mxu1 %v4616_v31  ;;  %v4807_v20 = vpop.eup %4806  ;;  %4587 = vmatprep.subr.bf16.mxu0 %v4586_v39  ;;  %v1467_v21 = vadd.s32 536870912, %v1466_v22  ;;  %v4628_v31 = vpack.c.bf16 %v1936_v51, %v1935_v61  ;;  %v1956_v35 = vld [vmem:[%s9008_s2 + $0xdf8] sm:$0xff]  ;;  %v4600_v8 = vpack.c.bf16 %v1906_v32, %v1905_v38  ;;  %v4602_v57 = vpack.c.bf16 %v1924_v23, %v1923_v17  ;;  %v1973_v55 = vld [vmem:[%s9008_s2 + $0xe80] sm:$0xff]  ;;  %v1974_v28 = vld [vmem:[%s9008_s2 + $0xe88] sm:$0xff] }
 0x14a   :  { %4619 = vmatprep.subr.bf16.mxu1 %v4618_v34  ;;  %v4809_v19 = vpop.eup %4808  ;;  %v1402_v63 = vxor.u32 2147483648, %v4807_v20  ;;  %v4598_v34 = vpack.c.bf16 %v1922_v16, %v1921_v10  ;;  %v1908_v40 = vld [vmem:[%s9008_s2 + $0xc78] sm:$0xff]  ;;  %v2005_v46 = vld [vmem:[%s9008_s2 + $0xf80] sm:$0xff]  ;;  %v1990_v5 = vld [vmem:[%s9008_s2 + $0xf08] sm:$0xff]  ;;  %vm1498_vm12 = vweird.f32 %v8130_v15 }
 0x14b   :  { %v1399_v53 = vxor.u32 2147483648, %v4809_v19  ;;  %v8503_v7 = vshrl.u32 %v1467_v21, 30  ;;  %v1957_v4 = vld [vmem:[%s9008_s2 + $0xe00] sm:$0xff]  ;;  %v4638_v21 = vpack.c.bf16 %v1974_v28, %v1973_v55  ;;  %v1975_v44 = vld [vmem:[%s9008_s2 + $0xe90] sm:$0xff]  ;;  %v1960_v56 = vld [vmem:[%s9008_s2 + $0xe18] sm:$0xff] }
 0x14c   :  { %4589 = vmatpush3.bf16.msra.mxu0 %v4588_v36  ;;  %v1403_v6 = vsel %vm1401_vm2, %v1402_v63, %v4809_v19  ;;  %v4632_v36 = vpack.c.bf16 %v1938_v37, %v1937_v52  ;;  %v1958_v63 = vld [vmem:[%s9008_s2 + $0xe08] sm:$0xff]  ;;  %v1959_v24 = vld [vmem:[%s9008_s2 + $0xe10] sm:$0xff]  ;;  %v1992_v38 = vld [vmem:[%s9008_s2 + $0xf18] sm:$0xff] }
 0x14d   :  { %4621 = vmatpush3.bf16.msra.mxu1 %v4620_v48  ;;  %4591 = vmatprep.subr.bf16.mxu0 %v4590_v30  ;;  %v1400_v14 = vsel %vm1398_vm3, %v4807_v20, %v1399_v53  ;;  %v1469_v1 = vshll.u32 %v8503_v7, 30  ;;  %v1907_v48 = vld [vmem:[%s9008_s2 + $0xc70] sm:$0xff]  ;;  %v4634_v20 = vpack.c.bf16 %v1956_v35, %v1955_v12  ;;  %v1977_v32 = vld [vmem:[%s9008_s2 + $0xea0] sm:$0xff]  ;;  %v4644_v17 = vpack.c.bf16 %v1960_v56, %v1959_v24  ;;  %v1962_v35 = vld [vmem:[%s9008_s2 + $0xe28] sm:$0xff] }
 0x14e   :  { %4623 = vmatprep.subr.bf16.mxu1 %v4622_v26  ;;  %v1404_v0 = vsel %vm1397_vm4, %v1400_v14, %v1403_v6  ;;  %v1939_v30 = vld [vmem:[%s9008_s2 + $0xd70] sm:$0xff]  ;;  %v1940_v26 = vld [vmem:[%s9008_s2 + $0xd78] sm:$0xff]  ;;  %v4604_v11 = vpack.c.bf16 %v1908_v40, %v1907_v48  ;;  %v4640_v14 = vpack.c.bf16 %v1958_v63, %v1957_v4  ;;  %v1961_v12 = vld [vmem:[%s9008_s2 + $0xe20] sm:$0xff] }
 0x14f   :  { %v8517_v62 = vsel %vm1395_vm5, nan, %v1404_v0  ;;  %v8548_v58 = vsub.s32 %v1466_v22, %v1469_v1  ;;  %v2006_v22 = vld [vmem:[%s9008_s2 + $0xf88] sm:$0xff]  ;;  %v4636_v50 = vpack.c.bf16 %v1940_v26, %v1939_v30  ;;  %v1976_v6 = vld [vmem:[%s9008_s2 + $0xe98] sm:$0xff]  ;;  %v1462_v0 = vadd.s32 %v8418_v18, %v8424_v54  ;;  %v1993_v48 = vld [vmem:[%s9008_s2 + $0xf20] sm:$0xff] }
 0x150   :  { %4593 = vmatpush3.bf16.msra.mxu0 %v4592_v25  ;;  %v2194_v39 = vrot.slane %v8517_v62, %v9240_v42  ;;  %v2202_v9 = vrot.slane %v8517_v62, %v9241_v3  ;;  %v4670_v25 = vpack.c.bf16 %v2006_v22, %v2005_v46  ;;  %v2190_v51 = vrot.slane %v8517_v62, %v9333_v29  ;;  %v1994_v40 = vld [vmem:[%s9008_s2 + $0xf28] sm:$0xff]  ;;  %v2012_v30 = vld [vmem:[%s9008_s2 + $0xfb8] sm:$0xff]  ;;  %v1963_v22 = vld [vmem:[%s9008_s2 + $0xe30] sm:$0xff] }
 0x151   :  { %4625 = vmatpush3.bf16.msra.mxu1 %v4624_v27  ;;  %4595 = vmatprep.subr.bf16.mxu0 %v4594_v45  ;;  %v1472_v33 = vsub.s32 0, %v8548_v58  ;;  %v1989_v27 = vld [vmem:[%s9008_s2 + $0xf00] sm:$0xff]  ;;  %v2007_v45 = vld [vmem:[%s9008_s2 + $0xf90] sm:$0xff]  ;;  %v2198_v10 = vrot.slane %v8517_v62, %v9334_v2  ;;  %v2210_v18 = vrot.slane %v8517_v62, %v9266_v41  ;;  %v4648_v28 = vpack.c.bf16 %v1962_v35, %v1961_v12  ;;  %v1998_v56 = vld [vmem:[%s9008_s2 + $0xf48] sm:$0xff] }
 0x152   :  { %4627 = vmatprep.subr.bf16.mxu1 %v4626_v60  ;;  %3175 = vmatprep.mubr.f32.mxu0 %v2194_v39  ;;  %v2008_v60 = vld [vmem:[%s9008_s2 + $0xf98] sm:$0xff]  ;;  %v4672_v16 = vpack.c.bf16 %v1990_v5, %v1989_v27  ;;  %v1978_v39 = vld [vmem:[%s9008_s2 + $0xea8] sm:$0xff]  ;;  %v4680_v46 = vpack.c.bf16 %v1994_v40, %v1993_v48  ;;  %v2013_v5 = vld [vmem:[%s9008_s2 + $0xfc0] sm:$0xff] }
 0x153   :  { %3245 = vmatprep.mubr.f32.mxu1 %v2202_v9  ;;  %v3557_v19 = vmin.u32 %v1472_v33, %v8548_v58  ;;  %v4674_v1 = vpack.c.bf16 %v2008_v60, %v2007_v45  ;;  %v2009_v9 = vld [vmem:[%s9008_s2 + $0xfa0] sm:$0xff]  ;;  %v1979_v33 = vld [vmem:[%s9008_s2 + $0xeb0] sm:$0xff]  ;;  %v1982_v27 = vld [vmem:[%s9008_s2 + $0xec8] sm:$0xff] }
 0x154   :  { %4597 = vmatpush3.bf16.msra.mxu0 %v4596_v13  ;;  %v4642_v13 = vpack.c.bf16 %v1976_v6, %v1975_v44  ;;  %v2014_v44 = vld [vmem:[%s9008_s2 + $0xfc8] sm:$0xff]  ;;  %v1985_v12 = vld [vmem:[%s9008_s2 + $0xee0] sm:$0xff] }
 0x155   :  { %4629 = vmatpush3.bf16.msra.mxu1 %v4628_v31  ;;  %4599 = vmatprep.subr.bf16.mxu0 %v4598_v34  ;;  %v1474_v53 = vclz %v3557_v19  ;;  %v1991_v31 = vld [vmem:[%s9008_s2 + $0xf10] sm:$0xff]  ;;  %v2010_v34 = vld [vmem:[%s9008_s2 + $0xfa8] sm:$0xff]  ;;  %v1964_v19 = vld [vmem:[%s9008_s2 + $0xe38] sm:$0xff]  ;;  %v4686_v24 = vpack.c.bf16 %v2014_v44, %v2013_v5 }
 0x156   :  { %4631 = vmatprep.subr.bf16.mxu1 %v4630_v49  ;;  %v2218_v49 = vrot.slane %v8517_v62, %v9335_v59  ;;  %v4676_v23 = vpack.c.bf16 %v1992_v38, %v1991_v31  ;;  %v4652_v45 = vpack.c.bf16 %v1964_v19, %v1963_v22  ;;  %v2016_v31 = vld [vmem:[%s9008_s2 + $0xfd8] sm:$0xff]  ;;  %v9348_v38 = vand.u32 2147483647, %v8130_v15  ;;  %v1971_v44 = vld [vmem:[%s9008_s2 + $0xe70] sm:$0xff] }
 0x157   :  { %v3558_v61 = vadd.s32 4294967294, %v1474_v53  ;;  %v1995_v53 = vld [vmem:[%s9008_s2 + $0xf30] sm:$0xff]  ;;  %v1988_v19 = vld [vmem:[%s9008_s2 + $0xef8] sm:$0xff] }
 0x158   :  { %4601 = vmatpush3.bf16.msra.mxu0 %v4600_v8  ;;  %vm8710_vm8 = vcmp.le.f32.partialorder %v9348_v38, 0.7853982 }
 0x159   :  { %4633 = vmatpush3.bf16.msra.mxu1 %v4632_v36  ;;  %4603 = vmatprep.subr.bf16.mxu0 %v4602_v57  ;;  %vm3559_vm6 = vcmp.lt.s32.totalorder %v3558_v61, 0  ;;  %v4678_v36 = vpack.c.bf16 %v2010_v34, %v2009_v9  ;;  %v1980_v57 = vld [vmem:[%s9008_s2 + $0xeb8] sm:$0xff]  ;;  %v1967_v34 = vld [vmem:[%s9008_s2 + $0xe50] sm:$0xff] }
 0x15a   :  { %4635 = vmatprep.subr.bf16.mxu1 %v4634_v20  ;;  %v1477_v54 = vsel %vm3559_vm6, 0, %v3558_v61  ;;  %v2011_v20 = vld [vmem:[%s9008_s2 + $0xfb0] sm:$0xff]  ;;  %v4650_v4 = vpack.c.bf16 %v1980_v57, %v1979_v33  ;;  %v1965_v61 = vld [vmem:[%s9008_s2 + $0xe40] sm:$0xff]  ;;  %v1970_v57 = vld [vmem:[%s9008_s2 + $0xe68] sm:$0xff] }
 0x15b   :  { %v1478_v52 = vsub.s32 32, %v1477_v54  ;;  %v1479_v37 = vshll.u32 %v8548_v58, %v1477_v54  ;;  %v1482_v41 = vsub.s32 4294967266, %v1477_v54  ;;  %v4646_v58 = vpack.c.bf16 %v1978_v39, %v1977_v32  ;;  %v1969_v33 = vld [vmem:[%s9008_s2 + $0xe60] sm:$0xff] }
 0x15c   :  { %4605 = vmatpush3.bf16.msra.mxu0 %v4604_v11  ;;  %v4682_v63 = vpack.c.bf16 %v2012_v30, %v2011_v20  ;;  %v1492_v54 = vsub.s32 4, %v8503_v7  ;;  %v2021_v32 = vld [vmem:[%s9008_s2 + $0x1000] sm:$0xff] }
 0x15d   :  { %4637 = vmatpush3.bf16.msra.mxu1 %v4636_v50  ;;  %4639 = vmatprep.subr.bf16.mxu0 %v4638_v21  ;;  %v1480_v8 = vshrl.u32 %v1462_v0, %v1478_v52  ;;  %v1483_v59 = vadd.s32 127, %v1482_v41  ;;  %v1996_v21 = vld [vmem:[%s9008_s2 + $0xf38] sm:$0xff]  ;;  %v1983_v0 = vld [vmem:[%s9008_s2 + $0xed0] sm:$0xff] }
 0x15e   :  { %4671 = vmatprep.subr.bf16.mxu1 %v4670_v25  ;;  %v1981_v25 = vld [vmem:[%s9008_s2 + $0xec0] sm:$0xff]  ;;  %v4684_v60 = vpack.c.bf16 %v1996_v21, %v1995_v53  ;;  %v4664_v21 = vpack.c.bf16 %v1970_v57, %v1969_v33  ;;  %v2055_v33 = vld [vmem:[%s9008_s2 + $0x1110] sm:$0xff]  ;;  %v2056_v57 = vld [vmem:[%s9008_s2 + $0x1118] sm:$0xff] }
 0x15f   :  { %3176 = vmatmul.mubr.f32.vlgmr.msra.gmra.mrb[12].mxu0 %v2190_v51  ;;  %v1481_v26 = vor.u32 %v1480_v8, %v1479_v37  ;;  %v1484_v55 = vshll.u32 %v1483_v59, 23  ;;  %v1966_v51 = vld [vmem:[%s9008_s2 + $0xe48] sm:$0xff]  ;;  %v2017_v59 = vld [vmem:[%s9008_s2 + $0xfe0] sm:$0xff] }
 0x160   :  { %3246 = vmatmul.mubr.f32.vlgmr.msra.gmra.mrb[12].mxu1 %v2198_v10  ;;  %4641 = vmatpush3.bf16.msra.mxu0 %v4640_v14  ;;  %v1997_v10 = vld [vmem:[%s9008_s2 + $0xf40] sm:$0xff]  ;;  %v4656_v39 = vpack.c.bf16 %v1966_v51, %v1965_v61  ;;  %v1986_v8 = vld [vmem:[%s9008_s2 + $0xee8] sm:$0xff]  ;;  %v2003_v51 = vld [vmem:[%s9008_s2 + $0xf70] sm:$0xff] }
 0x161   :  { %4673 = vmatpush3.bf16.msra.mxu1 %v4672_v16  ;;  %4643 = vmatprep.subr.bf16.mxu0 %v4642_v13  ;;  %v1485_v11 = vor.u32 4788187, %v1484_v55  ;;  %v1488_v50 = vcvt.s32.f32 %v1481_v26  ;;  %v4654_v16 = vpack.c.bf16 %v1982_v27, %v1981_v25  ;;  %v1984_v13 = vld [vmem:[%s9008_s2 + $0xed8] sm:$0xff]  ;;  %v4688_v9 = vpack.c.bf16 %v1998_v56, %v1997_v10  ;;  %v2002_v26 = vld [vmem:[%s9008_s2 + $0xf68] sm:$0xff]  ;;  %v1987_v55 = vld [vmem:[%s9008_s2 + $0xef0] sm:$0xff] }
 0x162   :  { %4675 = vmatprep.subr.bf16.mxu1 %v4674_v1  ;;  %3315 = vmatprep.mubr.f32.mxu0 %v2210_v18  ;;  %v2015_v1 = vld [vmem:[%s9008_s2 + $0xfd0] sm:$0xff]  ;;  %v4658_v37 = vpack.c.bf16 %v1984_v13, %v1983_v0  ;;  %v4662_v20 = vpack.c.bf16 %v1986_v8, %v1985_v12  ;;  %v3627_v22 = vpop.f32.mrb[0].mxu1  ;;  %v2004_v10 = vld [vmem:[%s9008_s2 + $0xf78] sm:$0xff]  ;;  %v2069_v56 = vld [vmem:[%s9008_s2 + $0x1180] sm:$0xff]  ;;  %v2214_v8 = vrot.slane %v8517_v62, %v9343_v47 }
 0x163   :  { %3385 = vmatprep.mubr.f32.mxu1 %v2218_v49  ;;  %v1486_v6 = vand.u32 2147483647, %v1485_v11  ;;  %v1968_v49 = vld [vmem:[%s9008_s2 + $0xe58] sm:$0xff]  ;;  %v4690_v41 = vpack.c.bf16 %v2016_v31, %v2015_v1  ;;  %v2019_v11 = vld [vmem:[%s9008_s2 + $0xff0] sm:$0xff]  ;;  %v3628_v53 = vpop.f32.mrb[1].mxu1  ;;  %v2070_v0 = vld [vmem:[%s9008_s2 + $0x1188] sm:$0xff]  ;;  %v4700_v38 = vpack.c.bf16 %v2004_v10, %v2003_v51 }
 0x164   :  { %4645 = vmatpush3.bf16.msra.mxu0 %v4644_v17  ;;  %v1999_v17 = vld [vmem:[%s9008_s2 + $0xf50] sm:$0xff]  ;;  %v4660_v48 = vpack.c.bf16 %v1968_v49, %v1967_v34  ;;  %v3629_v27 = vadd.f32 %v3628_v53, %v3627_v22  ;;  %v2053_v34 = vld [vmem:[%s9008_s2 + $0x1100] sm:$0xff]  ;;  %v2054_v49 = vld [vmem:[%s9008_s2 + $0x1108] sm:$0xff] }
 0x165   :  { %4677 = vmatpush3.bf16.msra.mxu1 %v4676_v23  ;;  %4647 = vmatprep.subr.bf16.mxu0 %v4646_v58  ;;  %v1489_v14 = vmul.f32 %v1488_v50, %v1486_v6  ;;  %v2000_v23 = vld [vmem:[%s9008_s2 + $0xf58] sm:$0xff]  ;;  %v2018_v58 = vld [vmem:[%s9008_s2 + $0xfe8] sm:$0xff]  ;;  %v2043_v53 = vld [vmem:[%s9008_s2 + $0x10b0] sm:$0xff] }
 0x166   :  { %4679 = vmatprep.subr.bf16.mxu1 %v4678_v36  ;;  %v1493_v36 = vsel %vm1408_vm7, %v1492_v54, %v8503_v7  ;;  %v4692_v40 = vpack.c.bf16 %v2000_v23, %v1999_v17  ;;  %v4694_v30 = vpack.c.bf16 %v2018_v58, %v2017_v59  ;;  %v2001_v7 = vld [vmem:[%s9008_s2 + $0xf60] sm:$0xff]  ;;  %v2020_v50 = vld [vmem:[%s9008_s2 + $0xff8] sm:$0xff]  ;;  %v2071_v17 = vld [vmem:[%s9008_s2 + $0x1190] sm:$0xff] }
 0x167   :  { %v1490_v18 = vxor.u32 2147483648, %v1489_v14  ;;  %v4696_v5 = vpack.c.bf16 %v2002_v26, %v2001_v7  ;;  %v1972_v6 = vld [vmem:[%s9008_s2 + $0xe78] sm:$0xff]  ;;  %v4698_v61 = vpack.c.bf16 %v2020_v50, %v2019_v11  ;;  %v2042_v7 = vld [vmem:[%s9008_s2 + $0x10a8] sm:$0xff]  ;;  %v2073_v26 = vld [vmem:[%s9008_s2 + $0x11a0] sm:$0xff]  ;;  %v4740_v11 = vpack.c.bf16 %v2056_v57, %v2055_v33 }
 0x168   :  { %4649 = vmatpush3.bf16.msra.mxu0 %v4648_v28  ;;  %v1495_v28 = vsel %vm8710_vm8, 0, %v1493_v36  ;;  %v4668_v31 = vpack.c.bf16 %v1972_v6, %v1971_v44  ;;  %v2072_v23 = vld [vmem:[%s9008_s2 + $0x1198] sm:$0xff]  ;;  %v4736_v36 = vpack.c.bf16 %v2054_v49, %v2053_v34  ;;  %v2025_v50 = vld [vmem:[%s9008_s2 + $0x1020] sm:$0xff]  ;;  %v2027_v6 = vld [vmem:[%s9008_s2 + $0x1030] sm:$0xff] }
 0x169   :  { %4681 = vmatpush3.bf16.msra.mxu1 %v4680_v46  ;;  %4651 = vmatprep.subr.bf16.mxu0 %v4650_v4  ;;  %v1491_v52 = vsel %vm1408_vm7, %v1490_v18, %v1489_v14  ;;  %v3592_v46 = vpop.f32.mrb[0].mxu0  ;;  %v2085_v4 = vld [vmem:[%s9009_s3] sm:$0x1]  ;;  %v2022_v18 = vld [vmem:[%s9008_s2 + $0x1008] sm:$0xff]  ;;  %v2059_v51 = vld [vmem:[%s9008_s2 + $0x1130] sm:$0xff] }
 0x16a   :  { %4683 = vmatprep.subr.bf16.mxu1 %v4682_v63  ;;  %v1494_v35 = vsel %vm8710_vm8, %v8130_v15, %v1491_v52  ;;  %v3593_v63 = vpop.f32.mrb[1].mxu0  ;;  %v2037_v14 = vld [vmem:[%s9008_s2 + $0x1080] sm:$0xff]  ;;  %v2039_v52 = vld [vmem:[%s9008_s2 + $0x1090] sm:$0xff]  ;;  %v4704_v58 = vpack.c.bf16 %v2022_v18, %v2021_v32  ;;  %v2026_v15 = vld [vmem:[%s9008_s2 + $0x1028] sm:$0xff] }
 0x16b   :  { %4810 = vcosq.f32 %v1494_v35  ;;  %v3594_v25 = vadd.f32 %v3593_v63, %v3592_v46  ;;  %v2060_v10 = vld [vmem:[%s9008_s2 + $0x1138] sm:$0xff]  ;;  %v2079_v49 = vld [vmem:[%s9008_s2 + $0x11d0] sm:$0xff]  ;;  %v2034_v33 = vld [vmem:[%s9008_s2 + $0x1068] sm:$0xff] }
 0x16c   :  { %4653 = vmatpush3.bf16.msra.mxu0 %v4652_v45  ;;  %4812 = vsinq.f32 %v1494_v35  ;;  %v1499_v45 = vand.u32 3, %v1495_v28  ;;  %v2206_v35 = vrot.slane %v8517_v62, %v9339_v43  ;;  %v4738_v62 = vpack.c.bf16 %v2072_v23, %v2071_v17  ;;  %v2048_v34 = vld [vmem:[%s9008_s2 + $0x10d8] sm:$0xff]  ;;  %v2031_v17 = vld [vmem:[%s9008_s2 + $0x1050] sm:$0xff] }
 0x16d   :  { %4685 = vmatpush3.bf16.msra.mxu1 %v4684_v60  ;;  %4655 = vmatprep.subr.bf16.mxu0 %v4654_v16  ;;  %v4666_v60 = vpack.c.bf16 %v1988_v19, %v1987_v55  ;;  %v2338_v16 = vadd.f32 %v3594_v25, %v2085_v4  ;;  %v2074_v55 = vld [vmem:[%s9008_s2 + $0x11a8] sm:$0xff]  ;;  %v2075_v25 = vld [vmem:[%s9008_s2 + $0x11b0] sm:$0xff]  ;;  %v2032_v23 = vld [vmem:[%s9008_s2 + $0x1058] sm:$0xff] }
 0x16e   :  { %4687 = vmatprep.subr.bf16.mxu1 %v4686_v24  ;;  %v2038_v24 = vld [vmem:[%s9008_s2 + $0x1088] sm:$0xff]  ;;  %vm1504_vm9 = vcmp.eq.s32.totalorder %v1499_v45, 2  ;;  %vm1501_vm10 = vcmp.eq.s32.totalorder %v1499_v45, 0  ;;  %vm1500_vm11 = vcmp.lt.s32.totalorder %v1499_v45, 2  ;;  %v4742_v63 = vpack.c.bf16 %v2074_v55, %v2073_v26  ;;  %v2028_v45 = vld [vmem:[%s9008_s2 + $0x1038] sm:$0xff]  ;;  %v2051_v26 = vld [vmem:[%s9008_s2 + $0x10f0] sm:$0xff] }
 0x16f   :  { %v8800_v1 = vadd.f32 %v3629_v27, %v2338_v16  ;;  %v2076_v27 = vld [vmem:[%s9008_s2 + $0x11b8] sm:$0xff]  ;;  %v2046_v16 = vld [vmem:[%s9008_s2 + $0x10c8] sm:$0xff] }
 0x170   :  { %4657 = vmatpush3.bf16.msra.mxu0 %v4656_v39  ;;  %v4702_v39 = vpack.c.bf16 %v2038_v24, %v2037_v14  ;;  %v2045_v14 = vld [vmem:[%s9008_s2 + $0x10c0] sm:$0xff] }
 0x171   :  { %4689 = vmatpush3.bf16.msra.mxu1 %v4688_v9  ;;  %4659 = vmatprep.subr.bf16.mxu0 %v4658_v37  ;;  %v4734_v9 = vpack.c.bf16 %v2070_v0, %v2069_v56  ;;  %v2077_v24 = vld [vmem:[%s9008_s2 + $0x11c0] sm:$0xff]  ;;  %v2078_v56 = vld [vmem:[%s9008_s2 + $0x11c8] sm:$0xff]  ;;  %v4716_v0 = vpack.c.bf16 %v2028_v45, %v2027_v6  ;;  %v4718_v32 = vpack.c.bf16 %v2046_v16, %v2045_v14 }
 0x172   :  { %4691 = vmatprep.subr.bf16.mxu1 %v4690_v41  ;;  %v2040_v41 = vld [vmem:[%s9008_s2 + $0x1098] sm:$0xff]  ;;  %v4750_v18 = vpack.c.bf16 %v2078_v56, %v2077_v24 }
 0x173   :  { %v4706_v47 = vpack.c.bf16 %v2040_v41, %v2039_v52  ;;  %v2080_v52 = vld [vmem:[%s9008_s2 + $0x11d8] sm:$0xff] }
 0x174   :  { %4661 = vmatpush3.bf16.msra.mxu0 %v4660_v48  ;;  %v2023_v48 = vld [vmem:[%s9008_s2 + $0x1010] sm:$0xff] }
 0x175   :  { %4693 = vmatpush3.bf16.msra.mxu1 %v4692_v40  ;;  %4663 = vmatprep.subr.bf16.mxu0 %v4662_v20  ;;  %v4811_v13 = vpop.eup %4810  ;;  %v2024_v40 = vld [vmem:[%s9008_s2 + $0x1018] sm:$0xff]  ;;  %v2041_v20 = vld [vmem:[%s9008_s2 + $0x10a0] sm:$0xff] }
 0x176   :  { %4695 = vmatprep.subr.bf16.mxu1 %v4694_v30  ;;  %v4813_v54 = vpop.eup %4812  ;;  %v1505_v37 = vxor.u32 2147483648, %v4811_v13  ;;  %v4708_v19 = vpack.c.bf16 %v2024_v40, %v2023_v48  ;;  %v4710_v4 = vpack.c.bf16 %v2042_v7, %v2041_v20  ;;  %v2081_v48 = vld [vmem:[%s9008_s2 + $0x11e0] sm:$0xff]  ;;  %v2082_v40 = vld [vmem:[%s9008_s2 + $0x11e8] sm:$0xff] }
 0x177   :  { %v1502_v12 = vxor.u32 2147483648, %v4813_v54  ;;  %v4758_v20 = vpack.c.bf16 %v2082_v40, %v2081_v48  ;;  %v2066_v7 = vld [vmem:[%s9008_s2 + $0x1168] sm:$0xff] }
 0x178   :  { %4665 = vmatpush3.bf16.msra.mxu0 %v4664_v21  ;;  %v1506_v59 = vsel %vm1504_vm9, %v1505_v37, %v4813_v54  ;;  %v2044_v21 = vld [vmem:[%s9008_s2 + $0x10b8] sm:$0xff]  ;;  %v2061_v54 = vld [vmem:[%s9008_s2 + $0x1140] sm:$0xff] }
 0x179   :  { %4697 = vmatpush3.bf16.msra.mxu1 %v4696_v5  ;;  %4667 = vmatprep.subr.bf16.mxu0 %v4666_v60  ;;  %v1503_v43 = vsel %vm1501_vm10, %v4811_v13, %v1502_v12  ;;  %v4712_v5 = vpack.c.bf16 %v2026_v15, %v2025_v50  ;;  %v4714_v60 = vpack.c.bf16 %v2044_v21, %v2043_v53  ;;  %v2035_v53 = vld [vmem:[%s9008_s2 + $0x1070] sm:$0xff] }
 0x17a   :  { %4699 = vmatprep.subr.bf16.mxu1 %v4698_v61  ;;  %v1507_v30 = vsel %vm1500_vm11, %v1503_v43, %v1506_v59  ;;  %v4746_v61 = vpack.c.bf16 %v2076_v27, %v2075_v25  ;;  %v4748_v13 = vpack.c.bf16 %v2060_v10, %v2059_v51  ;;  %v2064_v59 = vld [vmem:[%s9008_s2 + $0x1158] sm:$0xff]  ;;  %v4724_v43 = vpack.c.bf16 %v2032_v23, %v2031_v17 }
 0x17b   :  { %v8860_v28 = vsel %vm1498_vm12, nan, %v1507_v30  ;;  %v2065_v30 = vld [vmem:[%s9008_s2 + $0x1160] sm:$0xff]  ;;  %v2036_v25 = vld [vmem:[%s9008_s2 + $0x1078] sm:$0xff] }
 0x17c   :  { %4669 = vmatpush3.bf16.msra.mxu0 %v4668_v31  ;;  %v2226_v46 = vrot.slane %v8860_v28, %v9240_v42  ;;  %v2234_v22 = vrot.slane %v8860_v28, %v9241_v3  ;;  %v2057_v42 = vld [vmem:[%s9008_s2 + $0x1120] sm:$0xff]  ;;  %v2058_v3 = vld [vmem:[%s9008_s2 + $0x1128] sm:$0xff]  ;;  %v2222_v51 = vrot.slane %v8860_v28, %v9333_v29  ;;  %v2230_v10 = vrot.slane %v8860_v28, %v9334_v2 }
 0x17d   :  { %4701 = vmatpush3.bf16.msra.mxu1 %v4700_v38  ;;  %4703 = vmatprep.subr.bf16.mxu0 %v4702_v39  ;;  %v4744_v44 = vpack.c.bf16 %v2058_v3, %v2057_v42  ;;  %v2029_v31 = vld [vmem:[%s9008_s2 + $0x1040] sm:$0xff]  ;;  %v2030_v38 = vld [vmem:[%s9008_s2 + $0x1048] sm:$0xff]  ;;  %v4760_v3 = vpack.c.bf16 %v2066_v7, %v2065_v30 }
 0x17e   :  { %4735 = vmatprep.subr.bf16.mxu1 %v4734_v9  ;;  %v2062_v39 = vld [vmem:[%s9008_s2 + $0x1148] sm:$0xff]  ;;  %v2047_v9 = vld [vmem:[%s9008_s2 + $0x10d0] sm:$0xff]  ;;  %v4720_v37 = vpack.c.bf16 %v2030_v38, %v2029_v31 }
 0x17f   :  { %3316 = vmatmul.mubr.f32.vlgmr.msra.gmra.mrb[14].mxu0 %v2206_v35  ;;  %v4752_v41 = vpack.c.bf16 %v2062_v39, %v2061_v54  ;;  %v4722_v12 = vpack.c.bf16 %v2048_v34, %v2047_v9  ;;  %v4754_v35 = vpack.c.bf16 %v2080_v52, %v2079_v49 }
 0x180   :  { %3386 = vmatmul.mubr.f32.vlgmr.msra.gmra.mrb[14].mxu1 %v2214_v8  ;;  %4705 = vmatpush3.bf16.msra.mxu0 %v4704_v58  ;;  %v2063_v8 = vld [vmem:[%s9008_s2 + $0x1150] sm:$0xff]  ;;  %v2049_v58 = vld [vmem:[%s9008_s2 + $0x10e0] sm:$0xff] }
 0x181   :  { %4737 = vmatpush3.bf16.msra.mxu1 %v4736_v36  ;;  %4707 = vmatprep.subr.bf16.mxu0 %v4706_v47  ;;  %v2050_v36 = vld [vmem:[%s9008_s2 + $0x10e8] sm:$0xff]  ;;  %v4756_v47 = vpack.c.bf16 %v2064_v59, %v2063_v8 }
 0x182   :  { %4739 = vmatprep.subr.bf16.mxu1 %v4738_v62  ;;  %3455 = vmatprep.mubr.f32.mxu0 %v2226_v46  ;;  %v2033_v62 = vld [vmem:[%s9008_s2 + $0x1060] sm:$0xff]  ;;  %v4726_v57 = vpack.c.bf16 %v2050_v36, %v2049_v58 }
 0x183   :  { %3525 = vmatprep.mubr.f32.mxu1 %v2234_v22  ;;  %v2052_v22 = vld [vmem:[%s9008_s2 + $0x10f8] sm:$0xff] }
 0x184   :  { %4709 = vmatpush3.bf16.msra.mxu0 %v4708_v19  ;;  %v2083_v19 = vld [vmem:[%s9008_s2 + $0x11f0] sm:$0xff]  ;;  %v4730_v21 = vpack.c.bf16 %v2052_v22, %v2051_v26 }
 0x185   :  { %4741 = vmatpush3.bf16.msra.mxu1 %v4740_v11  ;;  %4711 = vmatprep.subr.bf16.mxu0 %v4710_v4  ;;  %v2084_v11 = vld [vmem:[%s9008_s2 + $0x11f8] sm:$0xff]  ;;  %v4728_v4 = vpack.c.bf16 %v2034_v33, %v2033_v62 }
 0x186   :  { %4743 = vmatprep.subr.bf16.mxu1 %v4742_v63  ;;  %v3697_v46 = vpop.f32.mrb[2].mxu1  ;;  %v4762_v27 = vpack.c.bf16 %v2084_v11, %v2083_v19 }
 0x187   :  { %v3698_v15 = vpop.f32.mrb[3].mxu1 }
 0x188   :  { %4713 = vmatpush3.bf16.msra.mxu0 %v4712_v5  ;;  %v3662_v55 = vpop.f32.mrb[2].mxu0  ;;  %v3699_v42 = vadd.f32 %v3698_v15, %v3697_v46  ;;  %v2067_v5 = vld [vmem:[%s9008_s2 + $0x1170] sm:$0xff] }
 0x189   :  { %4745 = vmatpush3.bf16.msra.mxu1 %v4744_v44  ;;  %4715 = vmatprep.subr.bf16.mxu0 %v4714_v60  ;;  %v3663_v50 = vpop.f32.mrb[3].mxu0  ;;  %v2068_v44 = vld [vmem:[%s9008_s2 + $0x1178] sm:$0xff]  ;;  %v4732_v60 = vpack.c.bf16 %v2036_v25, %v2035_v53 }
 0x18a   :  { %4747 = vmatprep.subr.bf16.mxu1 %v4746_v61  ;;  %v3664_v63 = vadd.f32 %v3663_v50, %v3662_v55  ;;  %v4764_v61 = vpack.c.bf16 %v2068_v44, %v2067_v5 }
 0x18c   :  { %4717 = vmatpush3.bf16.msra.mxu0 %v4716_v0  ;;  %v2478_v6 = vadd.f32 %v3664_v63, %v8800_v1 }
 0x18d   :  { %4749 = vmatpush3.bf16.msra.mxu1 %v4748_v13  ;;  %4719 = vmatprep.subr.bf16.mxu0 %v4718_v32 }
 0x18e   :  { %4751 = vmatprep.subr.bf16.mxu1 %v4750_v18  ;;  %v2548_v45 = vadd.f32 %v3699_v42, %v2478_v6 }
 0x190   :  { %4721 = vmatpush3.bf16.msra.mxu0 %v4720_v37 }
 0x191   :  { %4753 = vmatpush3.bf16.msra.mxu1 %v4752_v41  ;;  %4723 = vmatprep.subr.bf16.mxu0 %v4722_v12 }
 0x192   :  { %4755 = vmatprep.subr.bf16.mxu1 %v4754_v35 }
 0x194   :  { %4725 = vmatpush3.bf16.msra.mxu0 %v4724_v43 }
 0x195   :  { %4757 = vmatpush3.bf16.msra.mxu1 %v4756_v47  ;;  %4727 = vmatprep.subr.bf16.mxu0 %v4726_v57 }
 0x196   :  { %4759 = vmatprep.subr.bf16.mxu1 %v4758_v20 }
 0x198   :  { %4729 = vmatpush3.bf16.msra.mxu0 %v4728_v4 }
 0x199   :  { %4761 = vmatpush3.bf16.msra.mxu1 %v4760_v3  ;;  %4731 = vmatprep.subr.bf16.mxu0 %v4730_v21 }
 0x19a   :  { %4763 = vmatprep.subr.bf16.mxu1 %v4762_v27 }
 0x19c   :  { %4733 = vmatpush3.bf16.msra.mxu0 %v4732_v60 }
 0x19d   :  { %4765 = vmatpush3.bf16.msra.mxu1 %v4764_v61 }
 0x19f   :  { %3456 = vmatmul.mubr.f32.vlgmr.msra.gmra.mrb[16].mxu0 %v2222_v51 }
 0x1a0   :  { %3526 = vmatmul.mubr.f32.vlgmr.msra.gmra.mrb[16].mxu1 %v2230_v10 }
 0x1ac   :  { %v3732_v14 = vpop.f32.mrb[4].mxu0  ;;  %v3767_v16 = vpop.f32.mrb[4].mxu1 }
 0x1ad   :  { %v3733_v1 = vpop.f32.mrb[5].mxu0  ;;  %v3768_v24 = vpop.f32.mrb[5].mxu1 }
 0x1ae   :  { %v3734_v56 = vadd.f32 %v3733_v1, %v3732_v14  ;;  %v3769_v0 = vadd.f32 %v3768_v24, %v3767_v16 }
 0x1b0   :  { %v2618_v13 = vadd.f32 %v3734_v56, %v2548_v45 }
 0x1b2   :  { %v2688_v31 = vadd.f32 %v3769_v0, %v2618_v13 }
 0x1cf   :  { %v3802_v38 = vpop.f32.mrb[6].mxu0  ;;  %v3837_v32 = vpop.f32.mrb[6].mxu1 }
 0x1d0   :  { %v3803_v18 = vpop.f32.mrb[7].mxu0  ;;  %v3838_v54 = vpop.f32.mrb[7].mxu1 }
 0x1d1   :  { %v3804_v29 = vadd.f32 %v3803_v18, %v3802_v38  ;;  %v3839_v39 = vadd.f32 %v3838_v54, %v3837_v32 }
 0x1d3   :  { %v2758_v9 = vadd.f32 %v3804_v29, %v2688_v31 }
 0x1d5   :  { %v2828_v2 = vadd.f32 %v3839_v39, %v2758_v9 }
 0x1f2   :  { %v3872_v28 = vpop.f32.mrb[8].mxu0 }
 0x1f3   :  { %v3907_v34 = vpop.f32.mrb[8].mxu1  ;;  %v3873_v49 = vpop.f32.mrb[9].mxu0 }
 0x1f4   :  { %v3908_v52 = vpop.f32.mrb[9].mxu1  ;;  %v3874_v37 = vadd.f32 %v3873_v49, %v3872_v28 }
 0x1f5   :  { %v3909_v41 = vadd.f32 %v3908_v52, %v3907_v34 }
 0x1f6   :  { %v2898_v17 = vadd.f32 %v3874_v37, %v2828_v2 }
 0x1f8   :  { %v2968_v23 = vadd.f32 %v3909_v41, %v2898_v17 }
 0x212   :  { %v3942_v12 = vpop.f32.mrb[10].mxu0 }
 0x213   :  { %v3977_v35 = vpop.f32.mrb[10].mxu1  ;;  %v3943_v8 = vpop.f32.mrb[11].mxu0 }
 0x214   :  { %v3978_v59 = vpop.f32.mrb[11].mxu1  ;;  %v3944_v58 = vadd.f32 %v3943_v8, %v3942_v12 }
 0x215   :  { %v3979_v36 = vadd.f32 %v3978_v59, %v3977_v35 }
 0x216   :  { %v3038_v48 = vadd.f32 %v3944_v58, %v2968_v23 }
 0x218   :  { %v3108_v40 = vadd.f32 %v3979_v36, %v3038_v48 }
 0x232   :  { %v4012_v43 = vpop.f32.mrb[12].mxu0 }
 0x233   :  { %v4047_v47 = vpop.f32.mrb[12].mxu1  ;;  %v4013_v62 = vpop.f32.mrb[13].mxu0 }
 0x234   :  { %v4048_v33 = vpop.f32.mrb[13].mxu1  ;;  %v4014_v57 = vadd.f32 %v4013_v62, %v4012_v43 }
 0x235   :  { %v4049_v20 = vadd.f32 %v4048_v33, %v4047_v47 }
 0x236   :  { %v3178_v30 = vadd.f32 %v4014_v57, %v3108_v40 }
 0x238   :  { %v3248_v7 = vadd.f32 %v4049_v20, %v3178_v30 }
 0x252   :  { %v4082_v26 = vpop.f32.mrb[14].mxu0 }
 0x253   :  { %v4117_v55 = vpop.f32.mrb[14].mxu1  ;;  %v4083_v46 = vpop.f32.mrb[15].mxu0 }
 0x254   :  { %v4118_v22 = vpop.f32.mrb[15].mxu1  ;;  %v4084_v19 = vadd.f32 %v4083_v46, %v4082_v26 }
 0x255   :  { %v4119_v11 = vadd.f32 %v4118_v22, %v4117_v55 }
 0x256   :  { %v3318_v50 = vadd.f32 %v4084_v19, %v3248_v7 }
 0x258   :  { %v3388_v15 = vadd.f32 %v4119_v11, %v3318_v50 }
 0x272   :  { %v4152_v4 = vpop.f32.mrb[16].mxu0 }
 0x273   :  { %v4187_v63 = vpop.f32.mrb[16].mxu1  ;;  %v4153_v42 = vpop.f32.mrb[17].mxu0 }
 0x274   :  { %v4188_v3 = vpop.f32.mrb[17].mxu1  ;;  %v4154_v53 = vadd.f32 %v4153_v42, %v4152_v4 }
 0x275   :  { %v4189_v21 = vadd.f32 %v4188_v3, %v4187_v63 }
 0x276   :  { %v3458_v25 = vadd.f32 %v4154_v53, %v3388_v15 }
 0x278   :  { %v3528_v27 = vadd.f32 %v4189_v21, %v3458_v25 }
 0x27a   :  { %3531 = vst [vmem:[%s9010_s4] sm:$0x1] %v3528_v27 }
 0x27b   :  { %3536 = vsyncpa [#allocation3], 1 }

</bundles_post_ra>
